<compile_context>
chip_gen: v5e
topology: v5e:2x2
jax: 0.10.0
libtpu: 0.0.40
codegen_flags: <defaults>
</compile_context>

<pallas_src>
import jax
import jax.numpy as jnp
from jax import lax
from jax.experimental import pallas as pl
from jax.experimental.pallas import tpu as pltpu

MATMUL_DTYPE = jnp.bfloat16  # matmul operand / activation dtype (f32 accumulation)


def _round_up(x, m):
    return ((x + m - 1) // m) * m


_COMPILER_PARAMS = pltpu.CompilerParams(
    dimension_semantics=("parallel",),      # independent row tiles -> 2 TCs on v7x
    vmem_limit_bytes=32 * 1024 * 1024,      # explicit; safe on v5e/v6e/v7x
)


# --------------------------------------------------------------------------
# Kernels
# --------------------------------------------------------------------------
def _conv_relu_pool_kernel(p_ref, w_ref, b_ref, o_ref):
    # p_ref: (4, R, pack*K) bf16 -- per 2x2 pool offset, R rows of `pack`
    #        consecutive output pixels' patches concatenated along K.
    # w_ref: (pack*K, 128) bf16 block-diagonal(pack x (K, Cout)) weights, so the
    #        matmul emits `pack` pixels' Cout outputs per 128-lane row.
    # b_ref: (1, 128) f32 bias tiled `pack` times.
    # o_ref: (R, 128) bf16 lane-dense packed conv+ReLU+pool output.
    w = w_ref[...]
    acc = jnp.dot(p_ref[0], w, preferred_element_type=jnp.float32)
    acc = jnp.maximum(acc, jnp.dot(p_ref[1], w, preferred_element_type=jnp.float32))
    acc = jnp.maximum(acc, jnp.dot(p_ref[2], w, preferred_element_type=jnp.float32))
    acc = jnp.maximum(acc, jnp.dot(p_ref[3], w, preferred_element_type=jnp.float32))
    # Bias + ReLU once, after the pool max (equivalent: bias shared per offset).
    o_ref[...] = jnp.maximum(acc + b_ref[...], 0.0).astype(o_ref.dtype)


def _linear_kernel(x_ref, w_ref, b_ref, o_ref):
    # x_ref: (TN, K) bf16   w_ref: (K, F) bf16   b_ref: (1, F) f32   o_ref: (TN, F) f32
    o_ref[...] = (jnp.dot(x_ref[...], w_ref[...],
                          preferred_element_type=jnp.float32) + b_ref[...])


# --------------------------------------------------------------------------
# Conv + ReLU + MaxPool(2) block (NHWC in, NHWC out, bf16 activations)
# --------------------------------------------------------------------------
def conv_relu_pool_nhwc(x_nhwc, w_oihw, b, *, tm_max=512):
    n, h, w, cin = x_nhwc.shape
    cout, cin_w, kh, kw = w_oihw.shape
    assert cin == cin_w and kh == 5 and kw == 5
    assert 128 % cout == 0, "lane-dense packing requires Cout | 128"
    assert h % 2 == 0 and w % 2 == 0, "even spatial dims required (MaxPool2d(2))"
    ho, wo = h // 2, w // 2
    m = n * ho * wo                       # pooled output pixels
    k = cin * kh * kw                     # patch length, order (Cin, kh, kw)
    pack = 128 // cout                    # output pixels packed per 128-lane row

    xc = x_nhwc.astype(MATMUL_DTYPE)

    # One strided im2col per 2x2 pool offset: rows = pooled output positions,
    # feature order (Cin, kh, kw) matches OIHW weight flattening (validated).
    def offset_patches(di, dj):
        p = lax.conv_general_dilated_patches(
            xc, (kh, kw), (2, 2),
            ((2 - di, 1 + di), (2 - dj, 1 + dj)),
            dimension_numbers=("NHWC", "HWIO", "NHWC"))        # (N, Ho, Wo, K)
        return p.reshape(m, k)

    patches = jnp.stack([offset_patches(di, dj)
                         for di in (0, 1) for dj in (0, 1)], axis=0)  # (4, m, k)

    # Tile size: multiple of 16*pack (bf16 sublane quantum after packing),
    # aiming for >=2 grid steps so both v7x TensorCores get work.
    quantum = 16 * pack
    tm = min(_round_up(tm_max, quantum),
             max(quantum, _round_up(pl.cdiv(m, 2), quantum)))
    m_pad = _round_up(m, tm)
    if m_pad != m:
        patches = jnp.pad(patches, ((0, 0), (0, m_pad - m), (0, 0)))
    # Group `pack` consecutive rows: contiguous (free) reshape in XLA.
    patches = patches.reshape(4, m_pad // pack, pack * k)

    # Block-diagonal weights: (pack*K, 128).  Zero blocks cost nothing numerically
    # and let every MXU output row be a full, unmasked 128-lane store.
    wmat = w_oihw.reshape(cout, k).T.astype(jnp.float32)             # (K, Cout)
    wblk = jnp.kron(jnp.eye(pack, dtype=jnp.float32), wmat).astype(MATMUL_DTYPE)
    bpk = jnp.tile(b.reshape(1, cout).astype(jnp.float32), (1, pack))  # (1, 128)

    rows, rows_blk = m_pad // pack, tm // pack
    out = pl.pallas_call(
        _conv_relu_pool_kernel,
        out_shape=jax.ShapeDtypeStruct((rows, 128), MATMUL_DTYPE),
        grid=(m_pad // tm,),
        in_specs=[pl.BlockSpec((4, rows_blk, pack * k), lambda i: (0, i, 0)),
                  pl.BlockSpec((pack * k, 128), lambda i: (0, 0)),   # resident weights
                  pl.BlockSpec((1, 128), lambda i: (0, 0))],         # resident bias
        out_specs=pl.BlockSpec((rows_blk, 128), lambda i: (i, 0)),
        compiler_params=_COMPILER_PARAMS,
    )(patches, wblk, bpk)

    out = out.reshape(m_pad, cout)        # contiguous un-grouping (free)
    if m_pad != m:
        out = out[:m]
    return out.reshape(n, ho, wo, cout)   # NHWC, bf16


# --------------------------------------------------------------------------
# Linear layer (bf16 activations in, f32 logits out)
# --------------------------------------------------------------------------
def linear(x, w_kf, b, *, tn_max=256):
    # x: (N, K) bf16 (straight from the conv kernel, no cast), w_kf: (K, F).
    n, kdim = x.shape
    out_f = w_kf.shape[1]
    tn = min(_round_up(tn_max, 16), max(16, _round_up(pl.cdiv(n, 2), 16)))
    n_pad = _round_up(n, tn)
    if n_pad != n:
        x = jnp.pad(x, ((0, n_pad - n), (0, 0)))
    out = pl.pallas_call(
        _linear_kernel,
        out_shape=jax.ShapeDtypeStruct((n_pad, out_f), jnp.float32),
        grid=(n_pad // tn,),
        in_specs=[pl.BlockSpec((tn, kdim), lambda i: (i, 0)),
                  pl.BlockSpec((kdim, out_f), lambda i: (0, 0)),
                  pl.BlockSpec((1, out_f), lambda i: (0, 0))],
        out_specs=pl.BlockSpec((tn, out_f), lambda i: (i, 0)),
        compiler_params=_COMPILER_PARAMS,
    )(x.astype(MATMUL_DTYPE), w_kf.astype(MATMUL_DTYPE),
      b.reshape(1, out_f).astype(jnp.float32))
    return out[:n] if n_pad != n else out


# --------------------------------------------------------------------------
# Params + forward
# --------------------------------------------------------------------------
def init_params(key):
    ks = jax.random.split(key, 6)

    def u(k, shape, fan_in):  # PyTorch-style U(-1/sqrt(fan_in), 1/sqrt(fan_in))
        bound = 1.0 / jnp.sqrt(float(fan_in))
        return jax.random.uniform(k, shape, jnp.float32, -bound, bound)

    return {
        "w1": u(ks[0], (16, 1, 5, 5), 1 * 25),
        "b1": u(ks[1], (16,), 1 * 25),
        "w2": u(ks[2], (32, 16, 5, 5), 16 * 25),
        "b2": u(ks[3], (32,), 16 * 25),
        "w3": u(ks[4], (10, 32 * 7 * 7), 32 * 7 * 7),
        "b3": u(ks[5], (10,), 32 * 7 * 7),
    }


@jax.jit
def cnn_forward(params, x):
    x = jnp.transpose(x, (0, 2, 3, 1))                        # NCHW -> NHWC once
    a1 = conv_relu_pool_nhwc(x, params["w1"], params["b1"])   # (N,14,14,16) bf16
    a2 = conv_relu_pool_nhwc(a1, params["w2"], params["b2"])  # (N, 7, 7,32) bf16
    n = a2.shape[0]
    feats = a2.reshape(n, -1)                                 # NHWC flatten (h,w,c), free
    # Permute w3's columns (PyTorch flatten is (c,h,w)) to the NHWC (h,w,c) order
    # and pre-transpose to (K, 10).  Tiny one-time op under jit.
    w3 = params["w3"].reshape(10, 32, 7, 7).transpose(0, 2, 3, 1).reshape(10, -1).T
    return linear(feats, w3, params["b3"])                    # (N, 10) f32


# --------------------------------------------------------------------------
# f32 XLA reference (PyTorch semantics) for validation
# --------------------------------------------------------------------------
def cnn_reference(params, x):
    dn = ("NCHW", "OIHW", "NCHW")
    y = lax.conv_general_dilated(x, params["w1"], (1, 1), [(2, 2), (2, 2)],
                                 dimension_numbers=dn)
    y = jnp.maximum(y + params["b1"][None, :, None, None], 0.0)
    y = lax.reduce_window(y, -jnp.inf, lax.max, (1, 1, 2, 2), (1, 1, 2, 2), "VALID")
    y = lax.conv_general_dilated(y, params["w2"], (1, 1), [(2, 2), (2, 2)],
                                 dimension_numbers=dn)
    y = jnp.maximum(y + params["b2"][None, :, None, None], 0.0)
    y = lax.reduce_window(y, -jnp.inf, lax.max, (1, 1, 2, 2), (1, 1, 2, 2), "VALID")
    y = y.reshape(y.shape[0], -1)
    return y @ params["w3"].T + params["b3"]


if __name__ == "__main__":
    key = jax.random.PRNGKey(0)
    pkey, xkey = jax.random.split(key)
    params = init_params(pkey)
    # Linear(32*7*7, 10) implies 28x28 spatial, 1 input channel (MNIST-shaped).
    x = jax.random.normal(xkey, (2, 1, 28, 28), jnp.float32)

    out = jax.block_until_ready(cnn_forward(params, x))
    ref = cnn_reference(params, x)
    assert out.shape == (2, 10)
    err = float(jnp.max(jnp.abs(out - ref)))
    # bf16 matmul operands / bf16 inter-layer activations vs pure-f32 reference.
    assert jnp.allclose(out, ref, atol=2e-2, rtol=2e-2), f"max abs err {err}"
    print("KERNEL_OK")
</pallas_src>

<mosaic_0001>
module attributes {stable_mosaic.version = 11 : i64} {
  func.func @_conv_relu_pool_kernel(%arg0: i32, %arg1: memref<4x32x200xbf16, #tpu.memory_space<vmem>>, %arg2: memref<200x128xbf16, #tpu.memory_space<vmem>>, %arg3: memref<1x128xf32, #tpu.memory_space<vmem>>, %arg4: memref<32x128xbf16, #tpu.memory_space<vmem>>) attributes {dimension_semantics = [#tpu.dimension_semantics<parallel>], iteration_bounds = array<i64: 2>, scalar_prefetch = 0 : i64, scratch_operands = 0 : i64, tpu.core_type = #tpu.core_type<tc>, window_params = [{transform_indices = @transform_0, window_bounds = array<i64: 4, 32, 200>}, {pipeline_mode = #tpu.pipeline_mode<synchronous>, transform_indices = @transform_1, window_bounds = array<i64: 200, 128>}, {pipeline_mode = #tpu.pipeline_mode<synchronous>, transform_indices = @transform_2, window_bounds = array<i64: 1, 128>}, {transform_indices = @transform_3, window_bounds = array<i64: 32, 128>}]} {
    %c0 = arith.constant 0 : index
    %c0_0 = arith.constant 0 : index
    %0 = vector.load %arg2[%c0, %c0_0] : memref<200x128xbf16, #tpu.memory_space<vmem>>, vector<200x128xbf16>
    %c0_1 = arith.constant 0 : index
    %c0_2 = arith.constant 0 : index
    %c0_3 = arith.constant 0 : index
    %1 = vector.load %arg1[%c0_1, %c0_2, %c0_3] : memref<4x32x200xbf16, #tpu.memory_space<vmem>>, vector<1x32x200xbf16>
    %2 = vector.shape_cast %1 : vector<1x32x200xbf16> to vector<32x200xbf16>
    %cst = arith.constant dense<0.000000e+00> : vector<32x128xf32>
    %3 = tpu.matmul %2, %0, %cst {dimension_numbers = #tpu.dot_dimension_numbers<[1], [0], [0], [1], [0, 0, 1, 1], [], []>} : vector<32x200xbf16>, vector<200x128xbf16>, vector<32x128xf32> -> vector<32x128xf32>
    %c1 = arith.constant 1 : index
    %c0_4 = arith.constant 0 : index
    %c0_5 = arith.constant 0 : index
    %4 = vector.load %arg1[%c1, %c0_4, %c0_5] : memref<4x32x200xbf16, #tpu.memory_space<vmem>>, vector<1x32x200xbf16>
    %5 = vector.shape_cast %4 : vector<1x32x200xbf16> to vector<32x200xbf16>
    %cst_6 = arith.constant dense<0.000000e+00> : vector<32x128xf32>
    %6 = tpu.matmul %5, %0, %cst_6 {dimension_numbers = #tpu.dot_dimension_numbers<[1], [0], [0], [1], [0, 0, 1, 1], [], []>} : vector<32x200xbf16>, vector<200x128xbf16>, vector<32x128xf32> -> vector<32x128xf32>
    %7 = arith.maximumf %3, %6 : vector<32x128xf32>
    %c2 = arith.constant 2 : index
    %c0_7 = arith.constant 0 : index
    %c0_8 = arith.constant 0 : index
    %8 = vector.load %arg1[%c2, %c0_7, %c0_8] : memref<4x32x200xbf16, #tpu.memory_space<vmem>>, vector<1x32x200xbf16>
    %9 = vector.shape_cast %8 : vector<1x32x200xbf16> to vector<32x200xbf16>
    %cst_9 = arith.constant dense<0.000000e+00> : vector<32x128xf32>
    %10 = tpu.matmul %9, %0, %cst_9 {dimension_numbers = #tpu.dot_dimension_numbers<[1], [0], [0], [1], [0, 0, 1, 1], [], []>} : vector<32x200xbf16>, vector<200x128xbf16>, vector<32x128xf32> -> vector<32x128xf32>
    %11 = arith.maximumf %7, %10 : vector<32x128xf32>
    %c3 = arith.constant 3 : index
    %c0_10 = arith.constant 0 : index
    %c0_11 = arith.constant 0 : index
    %12 = vector.load %arg1[%c3, %c0_10, %c0_11] : memref<4x32x200xbf16, #tpu.memory_space<vmem>>, vector<1x32x200xbf16>
    %13 = vector.shape_cast %12 : vector<1x32x200xbf16> to vector<32x200xbf16>
    %cst_12 = arith.constant dense<0.000000e+00> : vector<32x128xf32>
    %14 = tpu.matmul %13, %0, %cst_12 {dimension_numbers = #tpu.dot_dimension_numbers<[1], [0], [0], [1], [0, 0, 1, 1], [], []>} : vector<32x200xbf16>, vector<200x128xbf16>, vector<32x128xf32> -> vector<32x128xf32>
    %15 = arith.maximumf %11, %14 : vector<32x128xf32>
    %c0_13 = arith.constant 0 : index
    %c0_14 = arith.constant 0 : index
    %16 = vector.load %arg3[%c0_13, %c0_14] : memref<1x128xf32, #tpu.memory_space<vmem>>, vector<1x128xf32>
    %17 = vector.broadcast %16 : vector<1x128xf32> to vector<32x128xf32>
    %18 = arith.addf %15, %17 : vector<32x128xf32>
    %cst_15 = arith.constant 0.000000e+00 : f32
    %19 = vector.broadcast %cst_15 : f32 to vector<32x128xf32>
    %20 = arith.maximumf %18, %19 : vector<32x128xf32>
    %21 = arith.truncf %20 : vector<32x128xf32> to vector<32x128xbf16>
    %c0_16 = arith.constant 0 : index
    %c0_17 = arith.constant 0 : index
    %22 = vector.load %arg4[%c0_16, %c0_17] : memref<32x128xbf16, #tpu.memory_space<vmem>>, vector<32x128xbf16>
    tpu.vector_store %arg4[%c0_16, %c0_17], %21 {strides = array<i32>} : memref<32x128xbf16, #tpu.memory_space<vmem>>, vector<32x128xbf16>,
    return
  }
  func.func @transform_0(%arg0: i32) -> (i32, i32, i32) {
    %c0_i32 = arith.constant 0 : i32
    %c0_i32_0 = arith.constant 0 : i32
    %c0_i32_1 = arith.constant 0 : i32
    return %c0_i32, %arg0, %c0_i32_0 : i32, i32, i32
  }
  func.func @transform_1(%arg0: i32) -> (i32, i32) {
    %c0_i32 = arith.constant 0 : i32
    %c0_i32_0 = arith.constant 0 : i32
    %c0_i32_1 = arith.constant 0 : i32
    return %c0_i32, %c0_i32_0 : i32, i32
  }
  func.func @transform_2(%arg0: i32) -> (i32, i32) {
    %c0_i32 = arith.constant 0 : i32
    %c0_i32_0 = arith.constant 0 : i32
    %c0_i32_1 = arith.constant 0 : i32
    return %c0_i32, %c0_i32_0 : i32, i32
  }
  func.func @transform_3(%arg0: i32) -> (i32, i32) {
    %c0_i32 = arith.constant 0 : i32
    %c0_i32_0 = arith.constant 0 : i32
    return %arg0, %c0_i32 : i32, i32
  }
}

module attributes {stable_mosaic.version = 11 : i64} {
  func.func @_conv_relu_pool_kernel(%arg0: i32, %arg1: memref<4x16x1600xbf16, #tpu.memory_space<vmem>>, %arg2: memref<1600x128xbf16, #tpu.memory_space<vmem>>, %arg3: memref<1x128xf32, #tpu.memory_space<vmem>>, %arg4: memref<16x128xbf16, #tpu.memory_space<vmem>>) attributes {dimension_semantics = [#tpu.dimension_semantics<parallel>], iteration_bounds = array<i64: 2>, scalar_prefetch = 0 : i64, scratch_operands = 0 : i64, tpu.core_type = #tpu.core_type<tc>, window_params = [{transform_indices = @transform_0, window_bounds = array<i64: 4, 16, 1600>}, {pipeline_mode = #tpu.pipeline_mode<synchronous>, transform_indices = @transform_1, window_bounds = array<i64: 1600, 128>}, {pipeline_mode = #tpu.pipeline_mode<synchronous>, transform_indices = @transform_2, window_bounds = array<i64: 1, 128>}, {transform_indices = @transform_3, window_bounds = array<i64: 16, 128>}]} {
    %c0 = arith.constant 0 : index
    %c0_0 = arith.constant 0 : index
    %0 = vector.load %arg2[%c0, %c0_0] : memref<1600x128xbf16, #tpu.memory_space<vmem>>, vector<1600x128xbf16>
    %c0_1 = arith.constant 0 : index
    %c0_2 = arith.constant 0 : index
    %c0_3 = arith.constant 0 : index
    %1 = vector.load %arg1[%c0_1, %c0_2, %c0_3] : memref<4x16x1600xbf16, #tpu.memory_space<vmem>>, vector<1x16x1600xbf16>
    %2 = vector.shape_cast %1 : vector<1x16x1600xbf16> to vector<16x1600xbf16>
    %cst = arith.constant dense<0.000000e+00> : vector<16x128xf32>
    %3 = tpu.matmul %2, %0, %cst {dimension_numbers = #tpu.dot_dimension_numbers<[1], [0], [0], [1], [0, 0, 1, 1], [], []>} : vector<16x1600xbf16>, vector<1600x128xbf16>, vector<16x128xf32> -> vector<16x128xf32>
    %c1 = arith.constant 1 : index
    %c0_4 = arith.constant 0 : index
    %c0_5 = arith.constant 0 : index
    %4 = vector.load %arg1[%c1, %c0_4, %c0_5] : memref<4x16x1600xbf16, #tpu.memory_space<vmem>>, vector<1x16x1600xbf16>
    %5 = vector.shape_cast %4 : vector<1x16x1600xbf16> to vector<16x1600xbf16>
    %cst_6 = arith.constant dense<0.000000e+00> : vector<16x128xf32>
    %6 = tpu.matmul %5, %0, %cst_6 {dimension_numbers = #tpu.dot_dimension_numbers<[1], [0], [0], [1], [0, 0, 1, 1], [], []>} : vector<16x1600xbf16>, vector<1600x128xbf16>, vector<16x128xf32> -> vector<16x128xf32>
    %7 = arith.maximumf %3, %6 : vector<16x128xf32>
    %c2 = arith.constant 2 : index
    %c0_7 = arith.constant 0 : index
    %c0_8 = arith.constant 0 : index
    %8 = vector.load %arg1[%c2, %c0_7, %c0_8] : memref<4x16x1600xbf16, #tpu.memory_space<vmem>>, vector<1x16x1600xbf16>
    %9 = vector.shape_cast %8 : vector<1x16x1600xbf16> to vector<16x1600xbf16>
    %cst_9 = arith.constant dense<0.000000e+00> : vector<16x128xf32>
    %10 = tpu.matmul %9, %0, %cst_9 {dimension_numbers = #tpu.dot_dimension_numbers<[1], [0], [0], [1], [0, 0, 1, 1], [], []>} : vector<16x1600xbf16>, vector<1600x128xbf16>, vector<16x128xf32> -> vector<16x128xf32>
    %11 = arith.maximumf %7, %10 : vector<16x128xf32>
    %c3 = arith.constant 3 : index
    %c0_10 = arith.constant 0 : index
    %c0_11 = arith.constant 0 : index
    %12 = vector.load %arg1[%c3, %c0_10, %c0_11] : memref<4x16x1600xbf16, #tpu.memory_space<vmem>>, vector<1x16x1600xbf16>
    %13 = vector.shape_cast %12 : vector<1x16x1600xbf16> to vector<16x1600xbf16>
    %cst_12 = arith.constant dense<0.000000e+00> : vector<16x128xf32>
    %14 = tpu.matmul %13, %0, %cst_12 {dimension_numbers = #tpu.dot_dimension_numbers<[1], [0], [0], [1], [0, 0, 1, 1], [], []>} : vector<16x1600xbf16>, vector<1600x128xbf16>, vector<16x128xf32> -> vector<16x128xf32>
    %15 = arith.maximumf %11, %14 : vector<16x128xf32>
    %c0_13 = arith.constant 0 : index
    %c0_14 = arith.constant 0 : index
    %16 = vector.load %arg3[%c0_13, %c0_14] : memref<1x128xf32, #tpu.memory_space<vmem>>, vector<1x128xf32>
    %17 = vector.broadcast %16 : vector<1x128xf32> to vector<16x128xf32>
    %18 = arith.addf %15, %17 : vector<16x128xf32>
    %cst_15 = arith.constant 0.000000e+00 : f32
    %19 = vector.broadcast %cst_15 : f32 to vector<16x128xf32>
    %20 = arith.maximumf %18, %19 : vector<16x128xf32>
    %21 = arith.truncf %20 : vector<16x128xf32> to vector<16x128xbf16>
    %c0_16 = arith.constant 0 : index
    %c0_17 = arith.constant 0 : index
    %22 = vector.load %arg4[%c0_16, %c0_17] : memref<16x128xbf16, #tpu.memory_space<vmem>>, vector<16x128xbf16>
    tpu.vector_store %arg4[%c0_16, %c0_17], %21 {strides = array<i32>} : memref<16x128xbf16, #tpu.memory_space<vmem>>, vector<16x128xbf16>,
    return
  }
  func.func @transform_0(%arg0: i32) -> (i32, i32, i32) {
    %c0_i32 = arith.constant 0 : i32
    %c0_i32_0 = arith.constant 0 : i32
    %c0_i32_1 = arith.constant 0 : i32
    return %c0_i32, %arg0, %c0_i32_0 : i32, i32, i32
  }
  func.func @transform_1(%arg0: i32) -> (i32, i32) {
    %c0_i32 = arith.constant 0 : i32
    %c0_i32_0 = arith.constant 0 : i32
    %c0_i32_1 = arith.constant 0 : i32
    return %c0_i32, %c0_i32_0 : i32, i32
  }
  func.func @transform_2(%arg0: i32) -> (i32, i32) {
    %c0_i32 = arith.constant 0 : i32
    %c0_i32_0 = arith.constant 0 : i32
    %c0_i32_1 = arith.constant 0 : i32
    return %c0_i32, %c0_i32_0 : i32, i32
  }
  func.func @transform_3(%arg0: i32) -> (i32, i32) {
    %c0_i32 = arith.constant 0 : i32
    %c0_i32_0 = arith.constant 0 : i32
    return %arg0, %c0_i32 : i32, i32
  }
}

module attributes {stable_mosaic.version = 11 : i64} {
  func.func @_linear_kernel(%arg0: i32, %arg1: memref<16x1568xbf16, #tpu.memory_space<vmem>>, %arg2: memref<1568x10xbf16, #tpu.memory_space<vmem>>, %arg3: memref<1x10xf32, #tpu.memory_space<vmem>>, %arg4: memref<16x10xf32, #tpu.memory_space<vmem>>) attributes {dimension_semantics = [#tpu.dimension_semantics<parallel>], iteration_bounds = array<i64: 1>, scalar_prefetch = 0 : i64, scratch_operands = 0 : i64, tpu.core_type = #tpu.core_type<tc>, window_params = [{transform_indices = @transform_0, window_bounds = array<i64: 16, 1568>}, {pipeline_mode = #tpu.pipeline_mode<synchronous>, transform_indices = @transform_1, window_bounds = array<i64: 1568, 10>}, {pipeline_mode = #tpu.pipeline_mode<synchronous>, transform_indices = @transform_2, window_bounds = array<i64: 1, 10>}, {transform_indices = @transform_3, window_bounds = array<i64: 16, 10>}]} {
    %c0 = arith.constant 0 : index
    %c0_0 = arith.constant 0 : index
    %0 = vector.load %arg1[%c0, %c0_0] : memref<16x1568xbf16, #tpu.memory_space<vmem>>, vector<16x1568xbf16>
    %c0_1 = arith.constant 0 : index
    %c0_2 = arith.constant 0 : index
    %1 = vector.load %arg2[%c0_1, %c0_2] : memref<1568x10xbf16, #tpu.memory_space<vmem>>, vector<1568x10xbf16>
    %cst = arith.constant dense<0.000000e+00> : vector<16x10xf32>
    %2 = tpu.matmul %0, %1, %cst {dimension_numbers = #tpu.dot_dimension_numbers<[1], [0], [0], [1], [0, 0, 1, 1], [], []>} : vector<16x1568xbf16>, vector<1568x10xbf16>, vector<16x10xf32> -> vector<16x10xf32>
    %c0_3 = arith.constant 0 : index
    %c0_4 = arith.constant 0 : index
    %3 = vector.load %arg3[%c0_3, %c0_4] : memref<1x10xf32, #tpu.memory_space<vmem>>, vector<1x10xf32>
    %4 = vector.broadcast %3 : vector<1x10xf32> to vector<16x10xf32>
    %5 = arith.addf %2, %4 : vector<16x10xf32>
    %c0_5 = arith.constant 0 : index
    %c0_6 = arith.constant 0 : index
    %6 = vector.load %arg4[%c0_5, %c0_6] : memref<16x10xf32, #tpu.memory_space<vmem>>, vector<16x10xf32>
    tpu.vector_store %arg4[%c0_5, %c0_6], %5 {strides = array<i32>} : memref<16x10xf32, #tpu.memory_space<vmem>>, vector<16x10xf32>,
    return
  }
  func.func @transform_0(%arg0: i32) -> (i32, i32) {
    %c0_i32 = arith.constant 0 : i32
    %c0_i32_0 = arith.constant 0 : i32
    return %arg0, %c0_i32 : i32, i32
  }
  func.func @transform_1(%arg0: i32) -> (i32, i32) {
    %c0_i32 = arith.constant 0 : i32
    %c0_i32_0 = arith.constant 0 : i32
    %c0_i32_1 = arith.constant 0 : i32
    return %c0_i32, %c0_i32_0 : i32, i32
  }
  func.func @transform_2(%arg0: i32) -> (i32, i32) {
    %c0_i32 = arith.constant 0 : i32
    %c0_i32_0 = arith.constant 0 : i32
    %c0_i32_1 = arith.constant 0 : i32
    return %c0_i32, %c0_i32_0 : i32, i32
  }
  func.func @transform_3(%arg0: i32) -> (i32, i32) {
    %c0_i32 = arith.constant 0 : i32
    %c0_i32_0 = arith.constant 0 : i32
    return %arg0, %c0_i32 : i32, i32
  }
}

</mosaic_0001>

<bundles_post_ra>
// kernel: cnn_forward.3
= control target key start
LH: loop header
LB: loop body
LE: loop exit
PB: predicated region body
PF: predicated region fallthrough
CT: control target
= control target key end

     0   :  { %s993_s12 = smov 0   ;;  %s995_s13 = smov 0   ;;  %s1213_s0 = inlined_call_operand.vmem [shape: bf16[4,64,200], index: 0, kind: input, shape index: {}]   ;;  %s1214_s1 = inlined_call_operand.vmem [shape: bf16[200,128], index: 1, kind: input, shape index: {}]   ;;  %s1215_s2 = inlined_call_operand.vmem [shape: f32[1,128], index: 2, kind: input, shape index: {}]   ;;  %s1216_s3 = inlined_call_operand.vmem [shape: bf16[64,128], index: 3, kind: output, shape index: {}]  }
   0x1   :  { %s997_s14 = smov 0  }
   0x2 LB: > { %s737_s15 = sadd.s32 4294967295, %s971_s14   ;;  %s1010_s16 = sadd.s32 1, %s971_s14   ;;  %s971_s14 = sphi %s997_s14, %s1219_s14   ;;  %s967_s13 = sphi %s995_s13, %s1218_s13   ;;  %s963_s12 = sphi %s993_s12, %s1217_s12  }
   0x3   : > { %s17_s17 = ssub.s32 %s971_s14, %s1010_s16  ;;  %s20_s18 = sadd.s32 1, %s967_s13 }
   0x4   : > { %p18_p0 = scmp.eq.s32.totalorder %s17_s17, 0  ;;  %p27_p1 = scmp.ne.s32.totalorder %s967_s13, %s963_s12 }
   0x5   : > { %p28_p2 = scmp.eq.s32.totalorder %s971_s14, 0  ;;  %p740_p4 = scmp.ge.s32.totalorder %s971_s14, 2 }
   0x6   : > { %s1019_s19 = scalar_select %p18_p0, %s967_s13, %s20_s18  }
   0x7   : > { %p29_p3 = por %p28_p2, %p27_p1  ;;  %127 = sbr.rel (%p740_p4) target bundleno = 32 (0x20), region = 24 }
   0xc   : > { %130 = sbr.rel (!%p29_p3) target bundleno = 32 (0x20), region = 28  ;;  %s132_s20 = sand.u32 (%p29_p3), 1, %s967_s13  }
   0xd   : > { %s884_s21 = sshll.u32 (%p29_p3), %s971_s14, 5  ;;  %s741_s22 = sshll.u32 (%p29_p3), %s132_s20, 7 }
   0xe   : > { %s1027_s25 = scalar_lea.vmem (%p29_p3), %s1213_s0, %s884_s21  ;;  %s134_s26 = scalar_lea.vmem (%p29_p3), [#allocation2], %s741_s22 }
   0xf   : > { %v197_v0 = vld [vmem:[%s1027_s25] sm:$0xff] (%p29_p3)  ;;  %v199_v1 = vld [vmem:[%s1027_s25 + $0x8] sm:$0xff] (%p29_p3)  ;;  %v201_v2 = vld [vmem:[%s1027_s25 + $0x10] sm:$0xff] (%p29_p3) }
  0x10   : > { %198 = vst [vmem:[%s134_s26] sm:$0xff] (%p29_p3), %v197_v0  ;;  %v203_v3 = vld [vmem:[%s1027_s25 + $0x18] sm:$0xff] (%p29_p3)  ;;  %v205_v4 = vld [vmem:[%s1027_s25 + $0x40] sm:$0xff] (%p29_p3)  ;;  %v207_v5 = vld [vmem:[%s1027_s25 + $0x48] sm:$0xff] (%p29_p3) }
  0x11   : > { %200 = vst [vmem:[%s134_s26 + $0x8] sm:$0xff] %v199_v1  ;;  %v209_v6 = vld [vmem:[%s1027_s25 + $0x50] sm:$0xff]  ;;  %v211_v7 = vld [vmem:[%s1027_s25 + $0x58] sm:$0xff]  ;;  %v213_v8 = vld [vmem:[%s1027_s25 + $0x80] sm:$0xff] }
  0x12   : > { %202 = vst [vmem:[%s134_s26 + $0x10] sm:$0xff] %v201_v2  ;;  %v215_v9 = vld [vmem:[%s1027_s25 + $0x88] sm:$0xff]  ;;  %v217_v10 = vld [vmem:[%s1027_s25 + $0x90] sm:$0xff]  ;;  %v219_v11 = vld [vmem:[%s1027_s25 + $0x98] sm:$0xff] }
  0x13   : > { %204 = vst [vmem:[%s134_s26 + $0x18] sm:$0xff] %v203_v3  ;;  %v221_v12 = vld [vmem:[%s1027_s25 + $0xc0] sm:$0xff]  ;;  %v223_v13 = vld [vmem:[%s1027_s25 + $0xc8] sm:$0xff]  ;;  %v225_v14 = vld [vmem:[%s1027_s25 + $0xd0] sm:$0xff] }
  0x14   : > { %206 = vst [vmem:[%s134_s26 + $0x20] sm:$0xff] %v205_v4  ;;  %v227_v15 = vld [vmem:[%s1027_s25 + $0xd8] sm:$0xff] }
  0x15   : > { %208 = vst [vmem:[%s134_s26 + $0x28] sm:$0xff] %v207_v5 }
  0x16   : > { %210 = vst [vmem:[%s134_s26 + $0x30] sm:$0xff] %v209_v6 }
  0x17   : > { %212 = vst [vmem:[%s134_s26 + $0x38] sm:$0xff] %v211_v7 }
  0x18   : > { %214 = vst [vmem:[%s134_s26 + $0x40] sm:$0xff] %v213_v8 }
  0x19   : > { %216 = vst [vmem:[%s134_s26 + $0x48] sm:$0xff] %v215_v9 }
  0x1a   : > { %218 = vst [vmem:[%s134_s26 + $0x50] sm:$0xff] %v217_v10 }
  0x1b   : > { %220 = vst [vmem:[%s134_s26 + $0x58] sm:$0xff] %v219_v11 }
  0x1c   : > { %222 = vst [vmem:[%s134_s26 + $0x60] sm:$0xff] %v221_v12 }
  0x1d   : > { %224 = vst [vmem:[%s134_s26 + $0x68] sm:$0xff] %v223_v13 }
  0x1e   : > { %226 = vst [vmem:[%s134_s26 + $0x70] sm:$0xff] %v225_v14 }
  0x1f   : > { %228 = vst [vmem:[%s134_s26 + $0x78] sm:$0xff] %v227_v15 }
  0x20 PF: > { %p745_p5 = scmp.ge.s32.totalorder %s971_s14, 1  ;;  %p233_p6 = scmp.lt.s32.totalorder %s971_s14, 3 }
  0x22   : > { %p234_p7 = pnand %p745_p5, %p233_p6 }
  0x23   : > { %s240_s10 = sand.u32 (!%p234_p7), 1, %s963_s12   ;;  %s747_s7 = sshll.u32 (!%p234_p7), %s737_s15, 2 }
  0x24   : > { %237 = sbr.rel (%p234_p7) target bundleno = 276 (0x114), region = 66  ;;  %s746_s21 = sshll.u32 (!%p234_p7), %s240_s10, 7 }
  0x25   : > { %s1115_s29 = scalar_lea.vmem (!%p234_p7), [#allocation2], %s746_s21  ;;  %p265_p8 = scmp.lt.s32.totalorder (!%p234_p7), %s747_s7, 7 }
  0x29   : > { %v1050_v16 = vld [vmem:[%s1214_s1 + $0x38] sm:$0xff]  ;;  %v295_v17 = vld [vmem:[%s1214_s1 + $0x60] sm:$0xf]  ;;  %vm400_vm0 = vcmask 1043456   ;;  %v1060_v19 = vld [vmem:[%s1214_s1 + $0x30] sm:$0xff]  ;;  %vm393_vm1 = vcmask 588800  }
  0x2a   : > { %v367_v18 = vunpack.c.l.b16 %v295_v17  ;;  %404 = vmatpush.bf16.msra.mxu0 %v1050_v16  ;;  %471 = vmatpush.bf16.msra.mxu2 %v1050_v16  ;;  %v1066_v22 = vld [vmem:[%s1214_s1 + $0x58] sm:$0xff]  ;;  %v1071_v23 = vld [vmem:[%s1214_s1 + $0x28] sm:$0xff]  ;;  %v1080_v24 = vld [vmem:[%s1214_s1 + $0x50] sm:$0xff]  ;;  %s1221_s7 = smov (!%p265_p8, %s747_s7), 7 }
  0x2b   : > { %v1085_v25 = vld [vmem:[%s1214_s1 + $0x20] sm:$0xff]  ;;  %v1094_v26 = vld [vmem:[%s1214_s1 + $0x48] sm:$0xff]  ;;  %v1099_v27 = vld [vmem:[%s1214_s1 + $0x18] sm:$0xff]  ;;  %s748_s14 = sshll.u32 %s1221_s7, 2 }
  0x2c   : > { %v380_v20 = vpack.c.b16 %v367_v18, %v367_v18  ;;  %v1106_v28 = vld [vmem:[%s1214_s1 + $0x40] sm:$0xff]  ;;  %v1113_v29 = vld [vmem:[%s1214_s1 + $0x10] sm:$0xff]  ;;  %v823_v31 = vld [vmem:[%s1115_s29 + $0x28] sm:$0xf0]  ;;  %s268_s11 = scalar_lea.vmem %s1216_s3, %s748_s14 }
  0x2d   : > { %v901_v30 = vld [vmem:[%s1115_s29 + $0x24] sm:$0xf]  ;;  %v753_v33 = vld [vmem:[%s1115_s29 + $0x8] sm:$0xf0]  ;;  %v751_v38 = vld [vmem:[%s1115_s29] sm:$0xf] }
  0x2e   : > { %v402_v21 = vsel %vm400_vm0, %v380_v20, 0  ;;  %405 = vmatpush.bf16.msra.mxu0 %v1060_v19  ;;  %472 = vmatpush.bf16.msra.mxu2 %v1060_v19  ;;  %v897_v32 = vld [vmem:[%s1115_s29 + $0x4] sm:$0xf]  ;;  %v826_v34 = vor.u32 %v901_v30, %v823_v31  ;;  %v1128_v35 = vld [vmem:[%s1214_s1 + $0x8] sm:$0xff]  ;;  %v821_v40 = vld [vmem:[%s1115_s29 + $0x20] sm:$0xf] }
  0x2f   : > { %493 = vmatpush.bf16.msra.mxu3 %v402_v21  ;;  %426 = vmatpush.bf16.msra.mxu1 %v402_v21  ;;  %v756_v36 = vor.u32 %v897_v32, %v753_v33  ;;  %v885_v37 = vld [vmem:[%s1214_s1] sm:$0xff]  ;;  %v898_v39 = vld [vmem:[%s1115_s29 + $0x4] sm:$0xf0]  ;;  %v903_v44 = vld [vmem:[%s1115_s29 + $0x34] sm:$0xf] }
  0x30   : > { %v902_v41 = vld [vmem:[%s1115_s29 + $0x24] sm:$0xf0]  ;;  %v752_v42 = vor.u32 %v898_v39, %v751_v38  ;;  %v831_v45 = vld [vmem:[%s1115_s29 + $0x38] sm:$0xf0]  ;;  %v899_v46 = vld [vmem:[%s1115_s29 + $0x14] sm:$0xf] }
  0x31   : > { %v822_v43 = vor.u32 %v902_v41, %v821_v40  ;;  %v761_v47 = vld [vmem:[%s1115_s29 + $0x18] sm:$0xf0]  ;;  %v834_v48 = vor.u32 %v903_v44, %v831_v45  ;;  %v759_v50 = vld [vmem:[%s1115_s29 + $0x10] sm:$0xf]  ;;  %v900_v51 = vld [vmem:[%s1115_s29 + $0x14] sm:$0xf0] }
  0x32   : > { %406 = vmatpush.bf16.msra.mxu0 %v1071_v23  ;;  %473 = vmatpush.bf16.msra.mxu2 %v1071_v23  ;;  %v764_v49 = vor.u32 %v899_v46, %v761_v47  ;;  %v829_v52 = vld [vmem:[%s1115_s29 + $0x30] sm:$0xf]  ;;  %v904_v53 = vld [vmem:[%s1115_s29 + $0x34] sm:$0xf0]  ;;  %v760_v54 = vor.u32 %v900_v51, %v759_v50  ;;  %v905_v56 = vld [vmem:[%s1115_s29 + $0x44] sm:$0xf] }
  0x33   : > { %494 = vmatpush.bf16.msra.mxu3 %v1066_v22  ;;  %427 = vmatpush.bf16.msra.mxu1 %v1066_v22  ;;  %v830_v55 = vor.u32 %v904_v53, %v829_v52  ;;  %v845_v57 = vld [vmem:[%s1115_s29 + $0x48] sm:$0xf0]  ;;  %v843_v58 = vld [vmem:[%s1115_s29 + $0x40] sm:$0xf]  ;;  %v906_v59 = vld [vmem:[%s1115_s29 + $0x44] sm:$0xf0] }
  0x34   : > { %v848_v60 = vor.u32 %v905_v56, %v845_v57  ;;  %v844_v61 = vor.u32 %v906_v59, %v843_v58  ;;  %v865_v62 = vld [vmem:[%s1115_s29 + $0x60] sm:$0xf]  ;;  %v910_v63 = vld [vmem:[%s1115_s29 + $0x64] sm:$0xf0]  ;;  %v909_v0 = vld [vmem:[%s1115_s29 + $0x64] sm:$0xf] }
  0x35   : > { %v867_v1 = vld [vmem:[%s1115_s29 + $0x68] sm:$0xf0]  ;;  %v866_v2 = vor.u32 %v910_v63, %v865_v62  ;;  %v907_v4 = vld [vmem:[%s1115_s29 + $0x54] sm:$0xf]  ;;  %v853_v5 = vld [vmem:[%s1115_s29 + $0x58] sm:$0xf0] }
  0x36   : > { %407 = vmatpush.bf16.msra.mxu0 %v1085_v25  ;;  %474 = vmatpush.bf16.msra.mxu2 %v1085_v25  ;;  %v870_v3 = vor.u32 %v909_v0, %v867_v1  ;;  %v851_v6 = vld [vmem:[%s1115_s29 + $0x50] sm:$0xf]  ;;  %v908_v7 = vld [vmem:[%s1115_s29 + $0x54] sm:$0xf0]  ;;  %v856_v8 = vor.u32 %v907_v4, %v853_v5  ;;  %v911_v12 = vld [vmem:[%s1115_s29 + $0x74] sm:$0xf] }
  0x37   : > { %495 = vmatpush.bf16.msra.mxu3 %v1080_v24  ;;  %428 = vmatpush.bf16.msra.mxu1 %v1080_v24  ;;  %v852_v9 = vor.u32 %v908_v7, %v851_v6  ;;  %v873_v10 = vld [vmem:[%s1115_s29 + $0x70] sm:$0xf]  ;;  %v912_v11 = vld [vmem:[%s1115_s29 + $0x74] sm:$0xf0]  ;;  %v875_v13 = vld [vmem:[%s1115_s29 + $0x78] sm:$0xf0] }
  0x38   : > { %v874_v14 = vor.u32 %v912_v11, %v873_v10  ;;  %v878_v15 = vor.u32 %v911_v12, %v875_v13  ;;  %v948_v50 = vld [vmem:[%s1215_s2] ss:$0 sm:$0xff] }
  0x3a   : > { %408 = vmatpush.bf16.msra.mxu0 %v1099_v27  ;;  %475 = vmatpush.bf16.msra.mxu2 %v1099_v27 }
  0x3b   : > { %496 = vmatpush.bf16.msra.mxu3 %v1094_v26  ;;  %429 = vmatpush.bf16.msra.mxu1 %v1094_v26 }
  0x3e   : > { %409 = vmatpush.bf16.msra.mxu0 %v1113_v29  ;;  %476 = vmatpush.bf16.msra.mxu2 %v1113_v29 }
  0x3f   : > { %497 = vmatpush.bf16.msra.mxu3 %v1106_v28  ;;  %430 = vmatpush.bf16.msra.mxu1 %v1106_v28 }
  0x42   : > { %835 = vmatmul.msk.bf16.vlgmr.msra.gmra.mxu3 %vm393_vm1, %v826_v34  ;;  %410 = vmatpush.bf16.msra.mxu0 %v1128_v35 }
  0x43   : > { %542 = vmatpush.bf16.msrb.mxu1 %v1050_v16  ;;  %564 = vmatpush.bf16.msrb.mxu3 %v402_v21 }
  0x44   : > { %813 = vmatmul.msk.bf16.vlgmr.msra.gmra.mxu1 %vm393_vm1, %v756_v36  ;;  %477 = vmatpush.bf16.msra.mxu2 %v1128_v35 }
  0x46   : > { %411 = vmatpush.bf16.msra.mxu0 %v885_v37 }
  0x47   : > { %543 = vmatpush.bf16.msrb.mxu1 %v1060_v19  ;;  %565 = vmatpush.bf16.msrb.mxu3 %v1066_v22 }
  0x48   : > { %478 = vmatpush.bf16.msra.mxu2 %v885_v37 }
  0x49   : > { %412 = vmatmul.bf16.vlgmr.msra.gmra.mxu0 %v752_v42 }
  0x4a   : > { %613 = vmatpush.bf16.msrb.mxu0 %v1050_v16 }
  0x4b   : > { %544 = vmatpush.bf16.msrb.mxu1 %v1071_v23  ;;  %566 = vmatpush.bf16.msrb.mxu3 %v1080_v24 }
  0x4c   : > { %635 = vmatpush.bf16.msrb.mxu2 %v402_v21 }
  0x4d   : > { %479 = vmatmul.bf16.vlgmr.msra.gmra.mxu2 %v822_v43 }
  0x4e   : > { %614 = vmatpush.bf16.msrb.mxu0 %v1060_v19 }
  0x4f   : > { %545 = vmatpush.bf16.msrb.mxu1 %v1085_v25  ;;  %567 = vmatpush.bf16.msrb.mxu3 %v1094_v26 }
  0x50   : > { %636 = vmatpush.bf16.msrb.mxu2 %v1066_v22 }
  0x52   : > { %615 = vmatpush.bf16.msrb.mxu0 %v1071_v23  ;;  %836 = vmatmul.msk.bf16.gmra.mxu3 %vm393_vm1, %v834_v48 }
  0x53   : > { %546 = vmatpush.bf16.msrb.mxu1 %v1099_v27  ;;  %568 = vmatpush.bf16.msrb.mxu3 %v1106_v28 }
  0x54   : > { %637 = vmatpush.bf16.msrb.mxu2 %v1080_v24  ;;  %814 = vmatmul.msk.bf16.gmra.mxu1 %vm393_vm1, %v764_v49 }
  0x56   : > { %616 = vmatpush.bf16.msrb.mxu0 %v1085_v25 }
  0x57   : > { %547 = vmatpush.bf16.msrb.mxu1 %v1113_v29 }
  0x58   : > { %638 = vmatpush.bf16.msrb.mxu2 %v1094_v26 }
  0x59   : > { %417 = vmatmul.bf16.gmra.mxu0 %v760_v54 }
  0x5a   : > { %617 = vmatpush.bf16.msrb.mxu0 %v1099_v27 }
  0x5b   : > { %548 = vmatpush.bf16.msrb.mxu1 %v1128_v35 }
  0x5c   : > { %639 = vmatpush.bf16.msrb.mxu2 %v1106_v28 }
  0x5d   : > { %484 = vmatmul.bf16.gmra.mxu2 %v830_v55 }
  0x5e   : > { %618 = vmatpush.bf16.msrb.mxu0 %v1113_v29 }
  0x5f   : > { %549 = vmatpush.bf16.msrb.mxu1 %v885_v37 }
  0x62   : > { %619 = vmatpush.bf16.msrb.mxu0 %v1128_v35  ;;  %857 = vmatmul.msk.bf16.vlgmr.msrb.gmra.mxu3 %vm393_vm1, %v848_v60 }
  0x64   : > { %550 = vmatmul.bf16.vlgmr.msrb.gmra.mxu1 %v844_v61 }
  0x66   : > { %620 = vmatpush.bf16.msrb.mxu0 %v885_v37 }
  0x69   : > { %621 = vmatmul.bf16.vlgmr.msrb.gmra.mxu0 %v866_v2 }
  0x6d   : > { %879 = vmatmul.msk.bf16.vlgmr.msrb.gmra.mxu2 %vm393_vm1, %v870_v3 }
  0x72   : > { %858 = vmatmul.msk.bf16.gmra.mxu3 %vm393_vm1, %v856_v8 }
  0x74   : > { %555 = vmatmul.bf16.gmra.mxu1 %v852_v9 }
  0x79   : > { %626 = vmatmul.bf16.gmra.mxu0 %v874_v14 }
  0x7d   : > { %880 = vmatmul.msk.bf16.gmra.mxu2 %vm393_vm1, %v878_v15 }
  0xc1   : > { %v432_v16 = vpop.f32.mrf.mxu1 }
  0xc5   : > { %v499_v17 = vpop.f32.mrf.mxu3 }
  0xc6   : > { %v413_v18 = vpop.f32.mrf.mxu0 }
  0xc7   : > { %v433_v39 = vadd.f32 %v432_v16, %v413_v18 }
  0xc9   : > { %v434_v19 = vpop.f32.mrf.mxu1 }
  0xcd   : > { %v501_v20 = vpop.f32.mrf.mxu3 }
  0xce   : > { %v415_v22 = vpop.f32.mrf.mxu0 }
  0xcf   : > { %v435_v45 = vadd.f32 %v434_v19, %v415_v22 }
  0xd0   : > { %v480_v21 = vpop.f32.mrf.mxu2 }
  0xd1   : > { %v437_v23 = vpop.f32.mrf.mxu1  ;;  %v500_v35 = vadd.f32 %v499_v17, %v480_v21 }
  0xd3   : > { %v509_v41 = vmax.f32 %v433_v39, %v500_v35 }
  0xd5   : > { %v504_v24 = vpop.f32.mrf.mxu3 }
  0xd6   : > { %v418_v26 = vpop.f32.mrf.mxu0 }
  0xd7   : > { %v438_v0 = vadd.f32 %v437_v23, %v418_v26 }
  0xd8   : > { %v482_v25 = vpop.f32.mrf.mxu2 }
  0xd9   : > { %v439_v27 = vpop.f32.mrf.mxu1  ;;  %v502_v42 = vadd.f32 %v501_v20, %v482_v25 }
  0xdb   : > { %v510_v48 = vmax.f32 %v435_v45, %v502_v42 }
  0xdd   : > { %v506_v28 = vpop.f32.mrf.mxu3 }
  0xde   : > { %v420_v30 = vpop.f32.mrf.mxu0 }
  0xdf   : > { %v440_v8 = vadd.f32 %v439_v27, %v420_v30 }
  0xe0   : > { %v485_v29 = vpop.f32.mrf.mxu2 }
  0xe1   : > { %v551_v31 = vpop.f32.mrf.mxu1  ;;  %v505_v60 = vadd.f32 %v504_v24, %v485_v29 }
  0xe3   : > { %v511_v4 = vmax.f32 %v438_v0, %v505_v60 }
  0xe5   : > { %v570_v32 = vpop.f32.mrf.mxu3 }
  0xe6   : > { %v622_v34 = vpop.f32.mrf.mxu0  ;;  %v571_v40 = vadd.f32 %v570_v32, %v551_v31 }
  0xe8   : > { %v487_v33 = vpop.f32.mrf.mxu2  ;;  %v580_v46 = vmax.f32 %v509_v41, %v571_v40 }
  0xe9   : > { %v553_v37 = vpop.f32.mrf.mxu1  ;;  %v507_v5 = vadd.f32 %v506_v28, %v487_v33 }
  0xeb   : > { %v512_v11 = vmax.f32 %v440_v8, %v507_v5 }
  0xed   : > { %v572_v36 = vpop.f32.mrf.mxu3 }
  0xee   : > { %v624_v44 = vpop.f32.mrf.mxu0  ;;  %v573_v47 = vadd.f32 %v572_v36, %v553_v37 }
  0xf0   : > { %v641_v38 = vpop.f32.mrf.mxu2  ;;  %v581_v53 = vmax.f32 %v510_v48, %v573_v47 }
  0xf1   : > { %v642_v43 = vadd.f32 %v641_v38, %v622_v34  ;;  %v556_v55 = vpop.f32.mrf.mxu1 }
  0xf3   : > { %v651_v49 = vmax.f32 %v580_v46, %v642_v43 }
  0xf5   : > { %v575_v51 = vpop.f32.mrf.mxu3  ;;  %v659_v56 = vadd.f32 %v948_v50, %v651_v49 }
  0xf6   : > { %v627_v59 = vpop.f32.mrf.mxu0  ;;  %v576_v1 = vadd.f32 %v575_v51, %v556_v55 }
  0xf7   : > { %v663_v61 = vmax.f32 %v659_v56, 0.0 }
  0xf8   : > { %v643_v52 = vpop.f32.mrf.mxu2  ;;  %v582_v9 = vmax.f32 %v511_v4, %v576_v1 }
  0xf9   : > { %v644_v54 = vadd.f32 %v643_v52, %v624_v44  ;;  %v558_v7 = vpop.f32.mrf.mxu1 }
  0xfb   : > { %v652_v57 = vmax.f32 %v581_v53, %v644_v54 }
  0xfd   : > { %v660_v58 = vadd.f32 %v948_v50, %v652_v57  ;;  %v577_v3 = vpop.f32.mrf.mxu3 }
  0xfe   : > { %v578_v10 = vadd.f32 %v577_v3, %v558_v7  ;;  %v629_v13 = vpop.f32.mrf.mxu0 }
  0xff   : > { %v664_v62 = vmax.f32 %v660_v58, 0.0 }
 0x100   : > { %v646_v63 = vpop.f32.mrf.mxu2  ;;  %v583_v15 = vmax.f32 %v512_v11, %v578_v10 }
 0x101   : > { %v916_v2 = vpack.c.bf16 %v664_v62, %v663_v61  ;;  %v647_v6 = vadd.f32 %v646_v63, %v627_v59 }
 0x103   : > { %917 = vst [vmem:[%s268_s11] sm:$0xff] %v916_v2   ;;  %v653_v12 = vmax.f32 %v582_v9, %v647_v6 }
 0x105   : > { %v661_v17 = vadd.f32 %v948_v50, %v653_v12 }
 0x107   : > { %v665_v20 = vmax.f32 %v661_v17, 0.0 }
 0x108   : > { %v648_v14 = vpop.f32.mrf.mxu2 }
 0x109   : > { %v649_v16 = vadd.f32 %v648_v14, %v629_v13 }
 0x10b   : > { %v654_v18 = vmax.f32 %v583_v15, %v649_v16 }
 0x10d   : > { %v662_v19 = vadd.f32 %v948_v50, %v654_v18 }
 0x10f   : > { %v666_v21 = vmax.f32 %v662_v19, 0.0 }
 0x111   : > { %v921_v22 = vpack.c.bf16 %v666_v21, %v665_v20 }
 0x113   : > { %923 = vst [vmem:[%s268_s11 + $0x8] sm:$0xff] %v921_v22  }
 0x114 PF: > { %p10_p9 = scmp.ge.s32.totalorder %s1010_s16, 4   ;;  %s1217_s12 = smov %s967_s13 }
 0x115   : > { %s1218_s13 = smov %s1019_s19  ;;  %s1219_s14 = smov %s1010_s16 }
 0x116   :  { %12 = sbr.rel (!%p10_p9) target bundleno = 2 (0x2), region = 108 }

// kernel: cnn_forward.4
= control target key start
LH: loop header
LB: loop body
LE: loop exit
PB: predicated region body
PF: predicated region fallthrough
CT: control target
= control target key end

     0   :  { %s3270_s12 = smov 0   ;;  %s3272_s13 = smov 0   ;;  %s4672_s0 = inlined_call_operand.vmem [shape: bf16[4,32,1600], index: 0, kind: input, shape index: {}]   ;;  %s4673_s1 = inlined_call_operand.vmem [shape: bf16[1600,128], index: 1, kind: input, shape index: {}]   ;;  %s4674_s2 = inlined_call_operand.vmem [shape: f32[1,128], index: 2, kind: input, shape index: {}]   ;;  %s4675_s3 = inlined_call_operand.vmem [shape: bf16[32,128], index: 3, kind: output, shape index: {}]  }
   0x1   :  { %s3274_s14 = smov 0  }
   0x2 LB: > { %s2259_s15 = sadd.s32 4294967295, %s3248_s14   ;;  %s3287_s16 = sadd.s32 1, %s3248_s14   ;;  %s3248_s14 = sphi %s3274_s14, %s4921_s14   ;;  %s3244_s13 = sphi %s3272_s13, %s4920_s13   ;;  %s3240_s12 = sphi %s3270_s12, %s4919_s12  }
   0x3   : > { %s17_s17 = ssub.s32 %s3248_s14, %s3287_s16  ;;  %s20_s18 = sadd.s32 1, %s3244_s13 }
   0x4   : > { %p18_p0 = scmp.eq.s32.totalorder %s17_s17, 0  ;;  %p27_p1 = scmp.ne.s32.totalorder %s3244_s13, %s3240_s12 }
   0x5   : > { %p28_p2 = scmp.eq.s32.totalorder %s3248_s14, 0  ;;  %p2262_p4 = scmp.ge.s32.totalorder %s3248_s14, 2 }
   0x6   : > { %s3296_s19 = scalar_select %p18_p0, %s3244_s13, %s20_s18  }
   0x7   : > { %p29_p3 = por %p28_p2, %p27_p1  ;;  %127 = sbr.rel (%p2262_p4) target bundleno = 73 (0x49), region = 24 }
   0xc   : > { %130 = sbr.rel (!%p29_p3) target bundleno = 73 (0x49), region = 28  ;;  %s132_s20 = sand.u32 (%p29_p3), 1, %s3244_s13  }
   0xd   : > { %s3099_s21 = smul.u32 (%p29_p3), 104, %s3248_s14 }
   0xe   : > { %s3098_s22 = smul.u32 (%p29_p3), 416, %s132_s20 }
   0xf   : > { %s3304_s25 = scalar_lea.vmem (%p29_p3), %s4672_s0, %s3099_s21 }
  0x10   : > { %v153_v0 = vld [vmem:[%s3304_s25] sm:$0xff] (%p29_p3)  ;;  %v155_v1 = vld [vmem:[%s3304_s25 + $0x8] sm:$0xff] (%p29_p3)  ;;  %v157_v2 = vld [vmem:[%s3304_s25 + $0x10] sm:$0xff] (%p29_p3)  ;;  %s3309_s26 = scalar_lea.vmem (%p29_p3), [#allocation2], %s3098_s22 }
  0x11   : > { %154 = vst [vmem:[%s3309_s26] sm:$0xff] %v153_v0  ;;  %v159_v3 = vld [vmem:[%s3304_s25 + $0x18] sm:$0xff]  ;;  %v161_v4 = vld [vmem:[%s3304_s25 + $0x20] sm:$0xff]  ;;  %v163_v5 = vld [vmem:[%s3304_s25 + $0x28] sm:$0xff] }
  0x12   : > { %156 = vst [vmem:[%s3309_s26 + $0x8] sm:$0xff] %v155_v1  ;;  %v165_v6 = vld [vmem:[%s3304_s25 + $0x34] sm:$0xff]  ;;  %v167_v7 = vld [vmem:[%s3304_s25 + $0x3c] sm:$0xff]  ;;  %v169_v8 = vld [vmem:[%s3304_s25 + $0x44] sm:$0xff] }
  0x13   : > { %158 = vst [vmem:[%s3309_s26 + $0x10] sm:$0xff] %v157_v2  ;;  %v171_v9 = vld [vmem:[%s3304_s25 + $0x4c] sm:$0xff]  ;;  %v173_v10 = vld [vmem:[%s3304_s25 + $0x54] sm:$0xff]  ;;  %v175_v11 = vld [vmem:[%s3304_s25 + $0x5c] sm:$0xff] }
  0x14   : > { %160 = vst [vmem:[%s3309_s26 + $0x18] sm:$0xff] %v159_v3  ;;  %v177_v12 = vld [vmem:[%s3304_s25 + $0xd0] sm:$0xff]  ;;  %v179_v13 = vld [vmem:[%s3304_s25 + $0xd8] sm:$0xff]  ;;  %v181_v14 = vld [vmem:[%s3304_s25 + $0xe0] sm:$0xff] }
  0x15   : > { %162 = vst [vmem:[%s3309_s26 + $0x20] sm:$0xff] %v161_v4  ;;  %v183_v15 = vld [vmem:[%s3304_s25 + $0xe8] sm:$0xff]  ;;  %v185_v16 = vld [vmem:[%s3304_s25 + $0xf0] sm:$0xff]  ;;  %v187_v17 = vld [vmem:[%s3304_s25 + $0xf8] sm:$0xff] }
  0x16   : > { %164 = vst [vmem:[%s3309_s26 + $0x28] sm:$0xff] %v163_v5  ;;  %v189_v18 = vld [vmem:[%s3304_s25 + $0x104] sm:$0xff]  ;;  %v191_v19 = vld [vmem:[%s3304_s25 + $0x10c] sm:$0xff]  ;;  %v193_v20 = vld [vmem:[%s3304_s25 + $0x114] sm:$0xff] }
  0x17   : > { %166 = vst [vmem:[%s3309_s26 + $0x34] sm:$0xff] %v165_v6  ;;  %v195_v21 = vld [vmem:[%s3304_s25 + $0x11c] sm:$0xff]  ;;  %v197_v22 = vld [vmem:[%s3304_s25 + $0x124] sm:$0xff]  ;;  %v199_v23 = vld [vmem:[%s3304_s25 + $0x12c] sm:$0xff] }
  0x18   : > { %168 = vst [vmem:[%s3309_s26 + $0x3c] sm:$0xff] %v167_v7  ;;  %v201_v24 = vld [vmem:[%s3304_s25 + $0x1a0] sm:$0xff]  ;;  %v203_v25 = vld [vmem:[%s3304_s25 + $0x1a8] sm:$0xff]  ;;  %v205_v26 = vld [vmem:[%s3304_s25 + $0x1b0] sm:$0xff] }
  0x19   : > { %170 = vst [vmem:[%s3309_s26 + $0x44] sm:$0xff] %v169_v8  ;;  %v207_v27 = vld [vmem:[%s3304_s25 + $0x1b8] sm:$0xff]  ;;  %v209_v28 = vld [vmem:[%s3304_s25 + $0x1c0] sm:$0xff]  ;;  %v211_v29 = vld [vmem:[%s3304_s25 + $0x1c8] sm:$0xff] }
  0x1a   : > { %172 = vst [vmem:[%s3309_s26 + $0x4c] sm:$0xff] %v171_v9  ;;  %v213_v30 = vld [vmem:[%s3304_s25 + $0x1d4] sm:$0xff]  ;;  %v215_v31 = vld [vmem:[%s3304_s25 + $0x1dc] sm:$0xff]  ;;  %v217_v32 = vld [vmem:[%s3304_s25 + $0x1e4] sm:$0xff] }
  0x1b   : > { %174 = vst [vmem:[%s3309_s26 + $0x54] sm:$0xff] %v173_v10  ;;  %v219_v33 = vld [vmem:[%s3304_s25 + $0x1ec] sm:$0xff]  ;;  %v221_v34 = vld [vmem:[%s3304_s25 + $0x1f4] sm:$0xff]  ;;  %v223_v35 = vld [vmem:[%s3304_s25 + $0x1fc] sm:$0xff] }
  0x1c   : > { %176 = vst [vmem:[%s3309_s26 + $0x5c] sm:$0xff] %v175_v11  ;;  %v225_v36 = vld [vmem:[%s3304_s25 + $0x270] sm:$0xff]  ;;  %v227_v37 = vld [vmem:[%s3304_s25 + $0x278] sm:$0xff]  ;;  %v229_v38 = vld [vmem:[%s3304_s25 + $0x280] sm:$0xff] }
  0x1d   : > { %178 = vst [vmem:[%s3309_s26 + $0x68] sm:$0xff] %v177_v12  ;;  %v231_v39 = vld [vmem:[%s3304_s25 + $0x288] sm:$0xff]  ;;  %v233_v40 = vld [vmem:[%s3304_s25 + $0x290] sm:$0xff]  ;;  %v235_v41 = vld [vmem:[%s3304_s25 + $0x298] sm:$0xff] }
  0x1e   : > { %180 = vst [vmem:[%s3309_s26 + $0x70] sm:$0xff] %v179_v13  ;;  %v237_v42 = vld [vmem:[%s3304_s25 + $0x2a4] sm:$0xff]  ;;  %v239_v43 = vld [vmem:[%s3304_s25 + $0x2ac] sm:$0xff]  ;;  %v241_v44 = vld [vmem:[%s3304_s25 + $0x2b4] sm:$0xff] }
  0x1f   : > { %182 = vst [vmem:[%s3309_s26 + $0x78] sm:$0xff] %v181_v14  ;;  %v243_v45 = vld [vmem:[%s3304_s25 + $0x2bc] sm:$0xff]  ;;  %v245_v46 = vld [vmem:[%s3304_s25 + $0x2c4] sm:$0xff]  ;;  %v247_v47 = vld [vmem:[%s3304_s25 + $0x2cc] sm:$0xff] }
  0x20   : > { %184 = vst [vmem:[%s3309_s26 + $0x80] sm:$0xff] %v183_v15  ;;  %v2266_v48 = vld [vmem:[%s3304_s25 + $0x30] sm:$0xf]  ;;  %v2268_v49 = vld [vmem:[%s3304_s25 + $0x64] sm:$0xf] }
  0x21   : > { %186 = vst [vmem:[%s3309_s26 + $0x88] sm:$0xff] %v185_v16  ;;  %v2270_v50 = vld [vmem:[%s3304_s25 + $0x100] sm:$0xf]  ;;  %v2272_v51 = vld [vmem:[%s3304_s25 + $0x134] sm:$0xf] }
  0x22   : > { %188 = vst [vmem:[%s3309_s26 + $0x90] sm:$0xff] %v187_v17  ;;  %v2274_v52 = vld [vmem:[%s3304_s25 + $0x1d0] sm:$0xf]  ;;  %v2276_v53 = vld [vmem:[%s3304_s25 + $0x204] sm:$0xf] }
  0x23   : > { %190 = vst [vmem:[%s3309_s26 + $0x9c] sm:$0xff] %v189_v18  ;;  %v2278_v54 = vld [vmem:[%s3304_s25 + $0x2a0] sm:$0xf]  ;;  %v2280_v55 = vld [vmem:[%s3304_s25 + $0x2d4] sm:$0xf] }
  0x24   : > { %192 = vst [vmem:[%s3309_s26 + $0xa4] sm:$0xff] %v191_v19 }
  0x25   : > { %194 = vst [vmem:[%s3309_s26 + $0xac] sm:$0xff] %v193_v20 }
  0x26   : > { %196 = vst [vmem:[%s3309_s26 + $0xb4] sm:$0xff] %v195_v21 }
  0x27   : > { %198 = vst [vmem:[%s3309_s26 + $0xbc] sm:$0xff] %v197_v22 }
  0x28   : > { %200 = vst [vmem:[%s3309_s26 + $0xc4] sm:$0xff] %v199_v23 }
  0x29   : > { %202 = vst [vmem:[%s3309_s26 + $0xd0] sm:$0xff] %v201_v24 }
  0x2a   : > { %204 = vst [vmem:[%s3309_s26 + $0xd8] sm:$0xff] %v203_v25 }
  0x2b   : > { %206 = vst [vmem:[%s3309_s26 + $0xe0] sm:$0xff] %v205_v26 }
  0x2c   : > { %208 = vst [vmem:[%s3309_s26 + $0xe8] sm:$0xff] %v207_v27 }
  0x2d   : > { %210 = vst [vmem:[%s3309_s26 + $0xf0] sm:$0xff] %v209_v28 }
  0x2e   : > { %212 = vst [vmem:[%s3309_s26 + $0xf8] sm:$0xff] %v211_v29 }
  0x2f   : > { %214 = vst [vmem:[%s3309_s26 + $0x104] sm:$0xff] %v213_v30 }
  0x30   : > { %216 = vst [vmem:[%s3309_s26 + $0x10c] sm:$0xff] %v215_v31 }
  0x31   : > { %218 = vst [vmem:[%s3309_s26 + $0x114] sm:$0xff] %v217_v32 }
  0x32   : > { %220 = vst [vmem:[%s3309_s26 + $0x11c] sm:$0xff] %v219_v33 }
  0x33   : > { %222 = vst [vmem:[%s3309_s26 + $0x124] sm:$0xff] %v221_v34 }
  0x34   : > { %224 = vst [vmem:[%s3309_s26 + $0x12c] sm:$0xff] %v223_v35 }
  0x35   : > { %226 = vst [vmem:[%s3309_s26 + $0x138] sm:$0xff] %v225_v36 }
  0x36   : > { %228 = vst [vmem:[%s3309_s26 + $0x140] sm:$0xff] %v227_v37 }
  0x37   : > { %230 = vst [vmem:[%s3309_s26 + $0x148] sm:$0xff] %v229_v38 }
  0x38   : > { %232 = vst [vmem:[%s3309_s26 + $0x150] sm:$0xff] %v231_v39 }
  0x39   : > { %234 = vst [vmem:[%s3309_s26 + $0x158] sm:$0xff] %v233_v40 }
  0x3a   : > { %236 = vst [vmem:[%s3309_s26 + $0x160] sm:$0xff] %v235_v41 }
  0x3b   : > { %238 = vst [vmem:[%s3309_s26 + $0x16c] sm:$0xff] %v237_v42 }
  0x3c   : > { %240 = vst [vmem:[%s3309_s26 + $0x174] sm:$0xff] %v239_v43 }
  0x3d   : > { %242 = vst [vmem:[%s3309_s26 + $0x17c] sm:$0xff] %v241_v44 }
  0x3e   : > { %244 = vst [vmem:[%s3309_s26 + $0x184] sm:$0xff] %v243_v45 }
  0x3f   : > { %246 = vst [vmem:[%s3309_s26 + $0x18c] sm:$0xff] %v245_v46 }
  0x40   : > { %248 = vst [vmem:[%s3309_s26 + $0x194] sm:$0xff] %v247_v47 }
  0x41   : > { %2267 = vst [vmem:[%s3309_s26 + $0x30] sm:$0xf] %v2266_v48 }
  0x42   : > { %2269 = vst [vmem:[%s3309_s26 + $0x64] sm:$0xf] %v2268_v49 }
  0x43   : > { %2271 = vst [vmem:[%s3309_s26 + $0x98] sm:$0xf] %v2270_v50 }
  0x44   : > { %2273 = vst [vmem:[%s3309_s26 + $0xcc] sm:$0xf] %v2272_v51 }
  0x45   : > { %2275 = vst [vmem:[%s3309_s26 + $0x100] sm:$0xf] %v2274_v52 }
  0x46   : > { %2277 = vst [vmem:[%s3309_s26 + $0x134] sm:$0xf] %v2276_v53 }
  0x47   : > { %2279 = vst [vmem:[%s3309_s26 + $0x168] sm:$0xf] %v2278_v54 }
  0x48   : > { %2281 = vst [vmem:[%s3309_s26 + $0x19c] sm:$0xf] %v2280_v55 }
  0x49 PF: > { %p2282_p5 = scmp.ge.s32.totalorder %s3248_s14, 1  ;;  %p277_p6 = scmp.lt.s32.totalorder %s3248_s14, 3 }
  0x4b   : > { %p278_p7 = pnand %p2282_p5, %p277_p6 }
  0x4d   : > { %281 = sbr.rel (%p278_p7) target bundleno = 637 (0x27d), region = 54 }
  0x52   : > { %v3425_v56 = vld [vmem:[%s4673_s1 + $0x38] sm:$0xff]  ;;  %v3447_v60 = vld [vmem:[%s4673_s1 + $0x30] sm:$0xff]  ;;  %v3471_v0 = vld [vmem:[%s4673_s1 + $0x28] sm:$0xff]  ;;  %s284_s25 = sand.u32 1, %s3240_s12   ;;  %vm1194_vm0 = vcmask 523264  }
  0x53   : > { %v3430_v57 = vld [vmem:[%s4673_s1 + $0x78] sm:$0xff]  ;;  %1198 = vmatpush.bf16.msra.mxu0 %v3425_v56  ;;  %v3452_v61 = vld [vmem:[%s4673_s1 + $0x70] sm:$0xff]  ;;  %v3476_v1 = vld [vmem:[%s4673_s1 + $0x68] sm:$0xff]  ;;  %s3100_s6 = smul.u32 416, %s284_s25 }
  0x54   : > { %v3435_v58 = vld [vmem:[%s4673_s1 + $0xb8] sm:$0xff]  ;;  %1212 = vmatpush.bf16.msra.mxu1 %v3430_v57  ;;  %v3459_v62 = vld [vmem:[%s4673_s1 + $0xb0] sm:$0xff]  ;;  %v3483_v2 = vld [vmem:[%s4673_s1 + $0xa8] sm:$0xff] }
  0x55   : > { %v3440_v59 = vld [vmem:[%s4673_s1 + $0xf8] sm:$0xff]  ;;  %1226 = vmatpush.bf16.msra.mxu2 %v3435_v58  ;;  %v3464_v63 = vld [vmem:[%s4673_s1 + $0xf0] sm:$0xff]  ;;  %v3488_v3 = vld [vmem:[%s4673_s1 + $0xe8] sm:$0xff]  ;;  %s3619_s5 = scalar_lea.vmem [#allocation2], %s3100_s6 }
  0x56   : > { %1240 = vmatpush.bf16.msra.mxu3 %v3440_v59  ;;  %v3495_v4 = vld [vmem:[%s4673_s1 + $0x20] sm:$0xff]  ;;  %v3519_v8 = vld [vmem:[%s4673_s1 + $0x18] sm:$0xff]  ;;  %v3544_v12 = vld [vmem:[%s4673_s1 + $0x10] sm:$0xff] }
  0x57   : > { %1199 = vmatpush.bf16.msra.mxu0 %v3447_v60  ;;  %v3500_v5 = vld [vmem:[%s4673_s1 + $0x60] sm:$0xff]  ;;  %v3524_v9 = vld [vmem:[%s4673_s1 + $0x58] sm:$0xff]  ;;  %v3549_v13 = vld [vmem:[%s4673_s1 + $0x50] sm:$0xff] }
  0x58   : > { %1213 = vmatpush.bf16.msra.mxu1 %v3452_v61  ;;  %v3507_v6 = vld [vmem:[%s4673_s1 + $0xa0] sm:$0xff]  ;;  %v3531_v10 = vld [vmem:[%s4673_s1 + $0x98] sm:$0xff]  ;;  %v3556_v14 = vld [vmem:[%s4673_s1 + $0x90] sm:$0xff] }
  0x59   : > { %1227 = vmatpush.bf16.msra.mxu2 %v3459_v62  ;;  %v3512_v7 = vld [vmem:[%s4673_s1 + $0xe0] sm:$0xff]  ;;  %v3536_v11 = vld [vmem:[%s4673_s1 + $0xd8] sm:$0xff]  ;;  %v3561_v15 = vld [vmem:[%s4673_s1 + $0xd0] sm:$0xff] }
  0x5a   : > { %1241 = vmatpush.bf16.msra.mxu3 %v3464_v63  ;;  %v3568_v16 = vld [vmem:[%s4673_s1 + $0x8] sm:$0xff]  ;;  %v3590_v20 = vld [vmem:[%s4673_s1] sm:$0xff]  ;;  %v3612_v24 = vld [vmem:[%s4673_s1 + $0x138] sm:$0xff] }
  0x5b   : > { %1200 = vmatpush.bf16.msra.mxu0 %v3471_v0  ;;  %v3573_v17 = vld [vmem:[%s4673_s1 + $0x48] sm:$0xff]  ;;  %v3595_v21 = vld [vmem:[%s4673_s1 + $0x40] sm:$0xff]  ;;  %v3617_v25 = vld [vmem:[%s4673_s1 + $0x178] sm:$0xff] }
  0x5c   : > { %1214 = vmatpush.bf16.msra.mxu1 %v3476_v1  ;;  %v3580_v18 = vld [vmem:[%s4673_s1 + $0x88] sm:$0xff]  ;;  %v3600_v22 = vld [vmem:[%s4673_s1 + $0x80] sm:$0xff]  ;;  %v3047_v27 = vld [vmem:[%s3619_s5 + $0x30] sm:$0xf0] }
  0x5d   : > { %1228 = vmatpush.bf16.msra.mxu2 %v3483_v2  ;;  %v3585_v19 = vld [vmem:[%s4673_s1 + $0xc8] sm:$0xff]  ;;  %v3605_v23 = vld [vmem:[%s4673_s1 + $0xc0] sm:$0xff]  ;;  %v3048_v29 = vld [vmem:[%s3619_s5 + $0x38] sm:$0xf0] }
  0x5e   : > { %1242 = vmatpush.bf16.msra.mxu3 %v3488_v3  ;;  %v2287_v26 = vld [vmem:[%s3619_s5] sm:$0xf]  ;;  %v2295_v28 = vld [vmem:[%s3619_s5 + $0x8] sm:$0xf]  ;;  %v3041_v30 = vld [vmem:[%s3619_s5 + $0x4] sm:$0xf] }
  0x5f   : > { %1201 = vmatpush.bf16.msra.mxu0 %v3495_v4  ;;  %v2289_v31 = vld [vmem:[%s3619_s5 + $0x34] sm:$0xf0]  ;;  %v3042_v32 = vld [vmem:[%s3619_s5 + $0xc] sm:$0xf]  ;;  %v2297_v33 = vld [vmem:[%s3619_s5 + $0x3c] sm:$0xf0]  ;;  %v2288_v36 = vor.u32 %v3047_v27, %v2287_v26  ;;  %v2296_v37 = vor.u32 %v3048_v29, %v2295_v28 }
  0x60   : > { %1215 = vmatpush.bf16.msra.mxu1 %v3500_v5  ;;  %v3634_v34 = vld [vmem:[%s4673_s1 + $0x1b8] sm:$0xff]  ;;  %v2292_v38 = vor.u32 %v3041_v30, %v2289_v31  ;;  %v2300_v39 = vor.u32 %v3042_v32, %v2297_v33  ;;  %v3650_v40 = vld [vmem:[%s4673_s1 + $0x130] sm:$0xff]  ;;  %v3674_v44 = vld [vmem:[%s4673_s1 + $0x128] sm:$0xff] }
  0x61   : > { %1229 = vmatpush.bf16.msra.mxu2 %v3507_v6  ;;  %4774 = vst [vmem:[#allocation3_spill] sm:$0xff] %v3634_v34  ;;  %v3639_v35 = vld [vmem:[%s4673_s1 + $0x1f8] sm:$0xff]  ;;  %v3655_v41 = vld [vmem:[%s4673_s1 + $0x170] sm:$0xff]  ;;  %v3679_v45 = vld [vmem:[%s4673_s1 + $0x168] sm:$0xff] }
  0x62   : > { %1243 = vmatpush.bf16.msra.mxu3 %v3512_v7  ;;  %4775 = vst [vmem:[#allocation4_spill] sm:$0xff] %v3639_v35  ;;  %v3662_v42 = vld [vmem:[%s4673_s1 + $0x1b0] sm:$0xff]  ;;  %v3686_v46 = vld [vmem:[%s4673_s1 + $0x1a8] sm:$0xff]  ;;  %v3698_v48 = vld [vmem:[%s4673_s1 + $0x120] sm:$0xff] }
  0x63   : > { %1202 = vmatpush.bf16.msra.mxu0 %v3519_v8  ;;  %4776 = vst [vmem:[#allocation5_spill] sm:$0xff] %v3662_v42  ;;  %v3667_v43 = vld [vmem:[%s4673_s1 + $0x1f0] sm:$0xff]  ;;  %v3691_v47 = vld [vmem:[%s4673_s1 + $0x1e8] sm:$0xff]  ;;  %v3703_v49 = vld [vmem:[%s4673_s1 + $0x160] sm:$0xff] }
  0x64   : > { %1216 = vmatpush.bf16.msra.mxu1 %v3524_v9  ;;  %4777 = vst [vmem:[#allocation6_spill] sm:$0xff] %v3667_v43  ;;  %v3710_v50 = vld [vmem:[%s4673_s1 + $0x1a0] sm:$0xff]  ;;  %v3722_v52 = vld [vmem:[%s4673_s1 + $0x118] sm:$0xff]  ;;  %v3746_v26 = vld [vmem:[%s4673_s1 + $0x110] sm:$0xff] }
  0x65   : > { %1230 = vmatpush.bf16.msra.mxu2 %v3531_v10  ;;  %4778 = vst [vmem:[#allocation7_spill] sm:$0xff] %v3686_v46  ;;  %v3715_v51 = vld [vmem:[%s4673_s1 + $0x1e0] sm:$0xff]  ;;  %v3727_v53 = vld [vmem:[%s4673_s1 + $0x158] sm:$0xff]  ;;  %v3751_v27 = vld [vmem:[%s4673_s1 + $0x150] sm:$0xff] }
  0x66   : > { %1244 = vmatpush.bf16.msra.mxu3 %v3536_v11  ;;  %4779 = vst [vmem:[#allocation8_spill] sm:$0xff] %v3691_v47  ;;  %v3734_v54 = vld [vmem:[%s4673_s1 + $0x198] sm:$0xff]  ;;  %v3758_v28 = vld [vmem:[%s4673_s1 + $0x190] sm:$0xff]  ;;  %v3770_v30 = vld [vmem:[%s4673_s1 + $0x108] sm:$0xff] }
  0x67   : > { %1203 = vmatpush.bf16.msra.mxu0 %v3544_v12  ;;  %4780 = vst [vmem:[#allocation9_spill] sm:$0xff] %v3710_v50  ;;  %v3739_v55 = vld [vmem:[%s4673_s1 + $0x1d8] sm:$0xff]  ;;  %v3763_v29 = vld [vmem:[%s4673_s1 + $0x1d0] sm:$0xff]  ;;  %v3775_v31 = vld [vmem:[%s4673_s1 + $0x148] sm:$0xff] }
  0x68   : > { %1217 = vmatpush.bf16.msra.mxu1 %v3549_v13  ;;  %4781 = vst [vmem:[#allocation10_spill] sm:$0xff] %v3715_v51  ;;  %v3782_v32 = vld [vmem:[%s4673_s1 + $0x188] sm:$0xff] }
  0x69   : > { %1231 = vmatpush.bf16.msra.mxu2 %v3556_v14  ;;  %4782 = vst [vmem:[#allocation11_spill] sm:$0xff] %v3722_v52  ;;  %v3787_v33 = vld [vmem:[%s4673_s1 + $0x1c8] sm:$0xff] }
  0x6a   : > { %1245 = vmatpush.bf16.msra.mxu3 %v3561_v15  ;;  %4783 = vst [vmem:[#allocation12_spill] sm:$0xff] %v3727_v53 }
  0x6b   : > { %1204 = vmatpush.bf16.msra.mxu0 %v3568_v16  ;;  %4784 = vst [vmem:[#allocation13_spill] sm:$0xff] %v3734_v54 }
  0x6c   : > { %1218 = vmatpush.bf16.msra.mxu1 %v3573_v17  ;;  %4785 = vst [vmem:[#allocation14_spill] sm:$0xff] %v3739_v55 }
  0x6d   : > { %1232 = vmatpush.bf16.msra.mxu2 %v3580_v18  ;;  %4786 = vst [vmem:[#allocation15_spill] sm:$0xff] %v3746_v26 }
  0x6e   : > { %1246 = vmatpush.bf16.msra.mxu3 %v3585_v19  ;;  %4787 = vst [vmem:[#allocation16_spill] sm:$0xff] %v3751_v27 }
  0x6f   : > { %1205 = vmatpush.bf16.msra.mxu0 %v3590_v20  ;;  %4788 = vst [vmem:[#allocation17_spill] sm:$0xff] %v3758_v28 }
  0x70   : > { %1219 = vmatpush.bf16.msra.mxu1 %v3595_v21  ;;  %4789 = vst [vmem:[#allocation18_spill] sm:$0xff] %v3763_v29 }
  0x71   : > { %1233 = vmatpush.bf16.msra.mxu2 %v3600_v22  ;;  %4790 = vst [vmem:[#allocation19_spill] sm:$0xff] %v3770_v30 }
  0x72   : > { %1247 = vmatpush.bf16.msra.mxu3 %v3605_v23  ;;  %1206 = vmatmul.bf16.vlgmr.msra.gmra.mxu0 %v2288_v36  ;;  %4791 = vst [vmem:[#allocation20_spill] sm:$0xff] %v3775_v31  ;;  %v3792_v36 = vld [vmem:[%s4673_s1 + $0x100] sm:$0xff] }
  0x73   : > { %1254 = vmatpush.bf16.msrb.mxu0 %v3612_v24  ;;  %1220 = vmatmul.bf16.vlgmr.msra.gmra.mxu1 %v2292_v38  ;;  %4792 = vst [vmem:[#allocation21_spill] sm:$0xff] %v3782_v32  ;;  %v3802_v38 = vld [vmem:[%s4673_s1 + $0x180] sm:$0xff] }
  0x74   : > { %1268 = vmatpush.bf16.msrb.mxu1 %v3617_v25  ;;  %1234 = vmatmul.bf16.vlgmr.msra.gmra.mxu2 %v2296_v37  ;;  %4793 = vst [vmem:[#allocation22_spill] sm:$0xff] %v3787_v33  ;;  %v3797_v37 = vld [vmem:[%s4673_s1 + $0x140] sm:$0xff] }
  0x75   : > { %1282 = vmatpush.bf16.msrb.mxu2 %v3634_v34  ;;  %1248 = vmatmul.bf16.vlgmr.msra.gmra.mxu3 %v2300_v39  ;;  %4794 = vst [vmem:[#allocation23_spill] sm:$0xff] %v3797_v37  ;;  %v3807_v39 = vld [vmem:[%s4673_s1 + $0x1c0] sm:$0xff] }
  0x76   : > { %1296 = vmatpush.bf16.msrb.mxu3 %v3639_v35  ;;  %4795 = vst [vmem:[#allocation24_spill] sm:$0xff] %v3802_v38 }
  0x77   : > { %1255 = vmatpush.bf16.msrb.mxu0 %v3650_v40  ;;  %4796 = vst [vmem:[#allocation25_spill] sm:$0xff] %v3807_v39 }
  0x78   : > { %1269 = vmatpush.bf16.msrb.mxu1 %v3655_v41 }
  0x79   : > { %1283 = vmatpush.bf16.msrb.mxu2 %v3662_v42 }
  0x7a   : > { %1297 = vmatpush.bf16.msrb.mxu3 %v3667_v43  ;;  %v2313_v43 = vld [vmem:[%s3619_s5 + $0x4c] sm:$0xf0] }
  0x7b   : > { %1256 = vmatpush.bf16.msrb.mxu0 %v3674_v44 }
  0x7c   : > { %1270 = vmatpush.bf16.msrb.mxu1 %v3679_v45 }
  0x7d   : > { %1284 = vmatpush.bf16.msrb.mxu2 %v3686_v46 }
  0x7e   : > { %1298 = vmatpush.bf16.msrb.mxu3 %v3691_v47  ;;  %v3049_v47 = vld [vmem:[%s3619_s5 + $0x40] sm:$0xf0] }
  0x7f   : > { %1257 = vmatpush.bf16.msrb.mxu0 %v3698_v48 }
  0x80   : > { %1271 = vmatpush.bf16.msrb.mxu1 %v3703_v49 }
  0x81   : > { %1285 = vmatpush.bf16.msrb.mxu2 %v3710_v50  ;;  %v3850_v50 = vld [vmem:[%s4673_s1 + $0x230] sm:$0xff] }
  0x82   : > { %1299 = vmatpush.bf16.msrb.mxu3 %v3715_v51  ;;  %v2303_v51 = vld [vmem:[%s3619_s5 + $0x10] sm:$0xf]  ;;  %4801 = vst [vmem:[#allocation30_spill] sm:$0xff] %v3850_v50 }
  0x83   : > { %1258 = vmatpush.bf16.msrb.mxu0 %v3722_v52 }
  0x84   : > { %1272 = vmatpush.bf16.msrb.mxu1 %v3727_v53  ;;  %v3839_v53 = vld [vmem:[%s4673_s1 + $0x2f8] sm:$0xff] }
  0x85   : > { %1286 = vmatpush.bf16.msrb.mxu2 %v3734_v54  ;;  %v3834_v54 = vld [vmem:[%s4673_s1 + $0x2b8] sm:$0xff]  ;;  %4800 = vst [vmem:[#allocation29_spill] sm:$0xff] %v3839_v53 }
  0x86   : > { %1300 = vmatpush.bf16.msrb.mxu3 %v3739_v55  ;;  %v3819_v55 = vld [vmem:[%s4673_s1 + $0x278] sm:$0xff]  ;;  %4799 = vst [vmem:[#allocation28_spill] sm:$0xff] %v3834_v54 }
  0x87   : > { %1259 = vmatpush.bf16.msrb.mxu0 %v3746_v26  ;;  %4798 = vst [vmem:[#allocation27_spill] sm:$0xff] %v3819_v55  ;;  %v3044_v26 = vld [vmem:[%s3619_s5 + $0x1c] sm:$0xf] }
  0x88   : > { %1273 = vmatpush.bf16.msrb.mxu1 %v3751_v27  ;;  %v3043_v27 = vld [vmem:[%s3619_s5 + $0x14] sm:$0xf]  ;;  %v2316_v35 = vor.u32 %v3044_v26, %v2313_v43  ;;  %v3874_v26 = vld [vmem:[%s4673_s1 + $0x228] sm:$0xff] }
  0x89   : > { %1287 = vmatpush.bf16.msrb.mxu2 %v3758_v28  ;;  %v2311_v28 = vld [vmem:[%s3619_s5 + $0x18] sm:$0xf]  ;;  %v3862_v43 = vld [vmem:[%s4673_s1 + $0x2b0] sm:$0xff]  ;;  %4805 = vst [vmem:[#allocation34_spill] sm:$0xff] %v3874_v26 }
  0x8a   : > { %1301 = vmatpush.bf16.msrb.mxu3 %v3763_v29  ;;  %v3814_v29 = vld [vmem:[%s4673_s1 + $0x238] sm:$0xff]  ;;  %4803 = vst [vmem:[#allocation32_spill] sm:$0xff] %v3862_v43 }
  0x8b   : > { %1260 = vmatpush.bf16.msrb.mxu0 %v3770_v30  ;;  %4797 = vst [vmem:[#allocation26_spill] sm:$0xff] %v3814_v29  ;;  %v3050_v30 = vld [vmem:[%s3619_s5 + $0x48] sm:$0xf0] }
  0x8c   : > { %1274 = vmatpush.bf16.msrb.mxu1 %v3775_v31  ;;  %v2305_v31 = vld [vmem:[%s3619_s5 + $0x44] sm:$0xf0] }
  0x8d   : > { %1288 = vmatpush.bf16.msrb.mxu2 %v3782_v32  ;;  %v2312_v32 = vor.u32 %v3050_v30, %v2311_v28  ;;  %v2308_v52 = vor.u32 %v3043_v27, %v2305_v31  ;;  %v3879_v27 = vld [vmem:[%s4673_s1 + $0x268] sm:$0xff]  ;;  %v3898_v28 = vld [vmem:[%s4673_s1 + $0x220] sm:$0xff] }
  0x8e   : > { %1302 = vmatpush.bf16.msrb.mxu3 %v3787_v33  ;;  %v2304_v33 = vor.u32 %v3049_v47, %v2303_v51  ;;  %v3855_v47 = vld [vmem:[%s4673_s1 + $0x270] sm:$0xff]  ;;  %4806 = vst [vmem:[#allocation35_spill] sm:$0xff] %v3879_v27  ;;  %v3903_v30 = vld [vmem:[%s4673_s1 + $0x260] sm:$0xff] }
  0x8f   : > { %1261 = vmatpush.bf16.msrb.mxu0 %v3792_v36  ;;  %4802 = vst [vmem:[#allocation31_spill] sm:$0xff] %v3855_v47  ;;  %v3867_v51 = vld [vmem:[%s4673_s1 + $0x2f0] sm:$0xff]  ;;  %v3910_v31 = vld [vmem:[%s4673_s1 + $0x2a0] sm:$0xff] }
  0x90   : > { %1275 = vmatpush.bf16.msrb.mxu1 %v3797_v37  ;;  %4804 = vst [vmem:[#allocation33_spill] sm:$0xff] %v3867_v51 }
  0x91   : > { %1289 = vmatpush.bf16.msrb.mxu2 %v3802_v38  ;;  %4809 = vst [vmem:[#allocation38_spill] sm:$0xff] %v3898_v28 }
  0x92   : > { %1303 = vmatpush.bf16.msrb.mxu3 %v3807_v39  ;;  %1262 = vmatmul.bf16.vlgmr.msrb.gmra.mxu0 %v2304_v33  ;;  %4810 = vst [vmem:[#allocation39_spill] sm:$0xff] %v3903_v30  ;;  %v3922_v33 = vld [vmem:[%s4673_s1 + $0x218] sm:$0xff] }
  0x93   : > { %1310 = vmatpush.bf16.msra.mxu0 %v3814_v29  ;;  %1276 = vmatmul.bf16.vlgmr.msrb.gmra.mxu1 %v2308_v52  ;;  %v3891_v52 = vld [vmem:[%s4673_s1 + $0x2e8] sm:$0xff]  ;;  %4811 = vst [vmem:[#allocation40_spill] sm:$0xff] %v3910_v31  ;;  %v4014_v39 = vld [vmem:[%s4673_s1 + $0x318] sm:$0xff] }
  0x94   : > { %1324 = vmatpush.bf16.msra.mxu1 %v3819_v55  ;;  %1290 = vmatmul.bf16.vlgmr.msrb.gmra.mxu2 %v2312_v32  ;;  %4808 = vst [vmem:[#allocation37_spill] sm:$0xff] %v3891_v52  ;;  %v3915_v32 = vld [vmem:[%s4673_s1 + $0x2e0] sm:$0xff] }
  0x95   : > { %1338 = vmatpush.bf16.msra.mxu2 %v3834_v54  ;;  %1304 = vmatmul.bf16.vlgmr.msrb.gmra.mxu3 %v2316_v35  ;;  %v3886_v35 = vld [vmem:[%s4673_s1 + $0x2a8] sm:$0xff]  ;;  %4812 = vst [vmem:[#allocation41_spill] sm:$0xff] %v3915_v32  ;;  %v2329_v55 = vld [vmem:[%s3619_s5 + $0x5c] sm:$0xf0] }
  0x96   : > { %1352 = vmatpush.bf16.msra.mxu3 %v3839_v53  ;;  %4807 = vst [vmem:[#allocation36_spill] sm:$0xff] %v3886_v35  ;;  %v3939_v53 = vld [vmem:[%s4673_s1 + $0x2d8] sm:$0xff]  ;;  %v3046_v54 = vld [vmem:[%s3619_s5 + $0x2c] sm:$0xf] }
  0x97   : > { %1311 = vmatpush.bf16.msra.mxu0 %v3850_v50  ;;  %4813 = vst [vmem:[#allocation42_spill] sm:$0xff] %v3922_v33  ;;  %v2321_v50 = vld [vmem:[%s3619_s5 + $0x54] sm:$0xf0] }
  0x98   : > { %1325 = vmatpush.bf16.msra.mxu1 %v3855_v47  ;;  %4816 = vst [vmem:[#allocation45_spill] sm:$0xff] %v3939_v53  ;;  %v3045_v47 = vld [vmem:[%s3619_s5 + $0x24] sm:$0xf] }
  0x99   : > { %1339 = vmatpush.bf16.msra.mxu2 %v3862_v43  ;;  %v3052_v43 = vld [vmem:[%s3619_s5 + $0x58] sm:$0xf0]  ;;  %v2324_v29 = vor.u32 %v3045_v47, %v2321_v50  ;;  %v4044_v50 = vld [vmem:[%s4673_s1 + $0x308] sm:$0xff] }
  0x9a   : > { %1353 = vmatpush.bf16.msra.mxu3 %v3867_v51  ;;  %v3934_v51 = vld [vmem:[%s4673_s1 + $0x298] sm:$0xff]  ;;  %v2754_v47 = vld [vmem:[%s3619_s5 + $0x68] sm:$0xf] }
  0x9b   : > { %1312 = vmatpush.bf16.msra.mxu0 %v3874_v26  ;;  %4815 = vst [vmem:[#allocation44_spill] sm:$0xff] %v3934_v51  ;;  %v2327_v26 = vld [vmem:[%s3619_s5 + $0x28] sm:$0xf] }
  0x9c   : > { %1326 = vmatpush.bf16.msra.mxu1 %v3879_v27  ;;  %v3051_v27 = vld [vmem:[%s3619_s5 + $0x50] sm:$0xf0] }
  0x9d   : > { %1340 = vmatpush.bf16.msra.mxu2 %v3886_v35  ;;  %v2319_v35 = vld [vmem:[%s3619_s5 + $0x20] sm:$0xf] }
  0x9e   : > { %1354 = vmatpush.bf16.msra.mxu3 %v3891_v52  ;;  %v3927_v52 = vld [vmem:[%s4673_s1 + $0x258] sm:$0xff] }
  0x9f   : > { %1313 = vmatpush.bf16.msra.mxu0 %v3898_v28  ;;  %4814 = vst [vmem:[#allocation43_spill] sm:$0xff] %v3927_v52  ;;  %v4007_v28 = vld [vmem:[%s4673_s1 + $0x2c0] sm:$0xff] }
  0xa0   : > { %1327 = vmatpush.bf16.msra.mxu1 %v3903_v30  ;;  %v4002_v30 = vld [vmem:[%s4673_s1 + $0x280] sm:$0xff] }
  0xa1   : > { %1341 = vmatpush.bf16.msra.mxu2 %v3910_v31  ;;  %v3946_v31 = vld [vmem:[%s4673_s1 + $0x210] sm:$0xff]  ;;  %4825 = vst [vmem:[#allocation54_spill] sm:$0xff] %v4002_v30 }
  0xa2   : > { %1355 = vmatpush.bf16.msra.mxu3 %v3915_v32  ;;  %4817 = vst [vmem:[#allocation46_spill] sm:$0xff] %v3946_v31  ;;  %v3951_v32 = vld [vmem:[%s4673_s1 + $0x250] sm:$0xff] }
  0xa3   : > { %1314 = vmatpush.bf16.msra.mxu0 %v3922_v33  ;;  %4818 = vst [vmem:[#allocation47_spill] sm:$0xff] %v3951_v32  ;;  %v3958_v33 = vld [vmem:[%s4673_s1 + $0x290] sm:$0xff] }
  0xa4   : > { %1328 = vmatpush.bf16.msra.mxu1 %v3927_v52  ;;  %4819 = vst [vmem:[#allocation48_spill] sm:$0xff] %v3958_v33  ;;  %v3963_v52 = vld [vmem:[%s4673_s1 + $0x2d0] sm:$0xff] }
  0xa5   : > { %1342 = vmatpush.bf16.msra.mxu2 %v3934_v51  ;;  %4820 = vst [vmem:[#allocation49_spill] sm:$0xff] %v3963_v52  ;;  %v3975_v51 = vld [vmem:[%s4673_s1 + $0x248] sm:$0xff] }
  0xa6   : > { %1356 = vmatpush.bf16.msra.mxu3 %v3939_v53  ;;  %v3970_v53 = vld [vmem:[%s4673_s1 + $0x208] sm:$0xff]  ;;  %4822 = vst [vmem:[#allocation51_spill] sm:$0xff] %v3975_v51 }
  0xa7   : > { %1315 = vmatpush.bf16.msra.mxu0 %v3946_v31  ;;  %4821 = vst [vmem:[#allocation50_spill] sm:$0xff] %v3970_v53  ;;  %v3987_v31 = vld [vmem:[%s4673_s1 + $0x2c8] sm:$0xff] }
  0xa8   : > { %1329 = vmatpush.bf16.msra.mxu1 %v3951_v32  ;;  %v3982_v32 = vld [vmem:[%s4673_s1 + $0x288] sm:$0xff]  ;;  %4824 = vst [vmem:[#allocation53_spill] sm:$0xff] %v3987_v31 }
  0xa9   : > { %1343 = vmatpush.bf16.msra.mxu2 %v3958_v33  ;;  %4823 = vst [vmem:[#allocation52_spill] sm:$0xff] %v3982_v32  ;;  %v3992_v33 = vld [vmem:[%s4673_s1 + $0x200] sm:$0xff] }
  0xaa   : > { %1357 = vmatpush.bf16.msra.mxu3 %v3963_v52  ;;  %v3997_v52 = vld [vmem:[%s4673_s1 + $0x240] sm:$0xff] }
  0xab   : > { %1316 = vmatpush.bf16.msra.mxu0 %v3970_v53  ;;  %v2328_v53 = vor.u32 %v3052_v43, %v2327_v26  ;;  %v3060_v43 = vld [vmem:[%s3619_s5 + $0x98] sm:$0xf0]  ;;  %v2756_v26 = vld [vmem:[%s3619_s5 + $0x9c] sm:$0xf0] }
  0xac   : > { %1330 = vmatpush.bf16.msra.mxu1 %v3975_v51  ;;  %v2320_v51 = vor.u32 %v3051_v27, %v2319_v35  ;;  %v2762_v27 = vld [vmem:[%s3619_s5 + $0x70] sm:$0xf]  ;;  %v3061_v35 = vld [vmem:[%s3619_s5 + $0xa0] sm:$0xf0] }
  0xad   : > { %1344 = vmatpush.bf16.msra.mxu2 %v3982_v32  ;;  %v2332_v32 = vor.u32 %v3046_v54, %v2329_v55  ;;  %v2335_v54 = vld [vmem:[%s3619_s5 + $0x30] sm:$0xf]  ;;  %v3053_v55 = vld [vmem:[%s3619_s5 + $0x60] sm:$0xf0] }
  0xae   : > { %1358 = vmatpush.bf16.msra.mxu3 %v3987_v31  ;;  %v4035_v31 = vld [vmem:[%s4673_s1 + $0x310] sm:$0xff] }
  0xaf   : > { %1317 = vmatpush.bf16.msra.mxu0 %v3992_v33 }
  0xb0   : > { %1331 = vmatpush.bf16.msra.mxu1 %v3997_v52 }
  0xb1   : > { %1345 = vmatpush.bf16.msra.mxu2 %v4002_v30 }
  0xb2   : > { %1359 = vmatpush.bf16.msra.mxu3 %v4007_v28  ;;  %1318 = vmatmul.bf16.vlgmr.msra.gmra.mxu0 %v2320_v51  ;;  %v3054_v51 = vld [vmem:[%s3619_s5 + $0x6c] sm:$0xf] }
  0xb3   : > { %1370 = vmatpush.bf16.msrb.mxu0 %v4014_v39  ;;  %1332 = vmatmul.bf16.vlgmr.msra.gmra.mxu1 %v2324_v29  ;;  %v2336_v29 = vor.u32 %v3053_v55, %v2335_v54  ;;  %v2759_v54 = vor.u32 %v3054_v51, %v2756_v26  ;;  %v2763_v55 = vor.u32 %v3061_v35, %v2762_v27  ;;  %v4826_v51 = vld [vmem:[#allocation9_spill] sm:$0xff]  ;;  %v4827_v26 = vld [vmem:[#allocation4_spill] sm:$0xff]  ;;  %v4828_v27 = vld [vmem:[#allocation11_spill] sm:$0xff] }
  0xb4   : > { %1463 = vmatpush.bf16.msrb.mxu1 %v3425_v56  ;;  %1346 = vmatmul.bf16.vlgmr.msra.gmra.mxu2 %v2328_v53  ;;  %v4053_v53 = vld [vmem:[%s4673_s1 + $0x300] sm:$0xff]  ;;  %v4829_v35 = vld [vmem:[#allocation12_spill] sm:$0xff] }
  0xb5   : > { %1477 = vmatpush.bf16.msrb.mxu2 %v3430_v57  ;;  %1360 = vmatmul.bf16.vlgmr.msra.gmra.mxu3 %v2332_v32  ;;  %v2755_v32 = vor.u32 %v3060_v43, %v2754_v47  ;;  %v2764_v47 = vld [vmem:[%s3619_s5 + $0xa4] sm:$0xf0] }
  0xb6   : > { %1491 = vmatpush.bf16.msrb.mxu3 %v3435_v58 }
  0xb7   : > { %1371 = vmatpush.bf16.msrb.mxu0 %v4035_v31 }
  0xb8   : > { %1464 = vmatpush.bf16.msrb.mxu1 %v3447_v60 }
  0xb9   : > { %1478 = vmatpush.bf16.msrb.mxu2 %v3452_v61 }
  0xba   : > { %1492 = vmatpush.bf16.msrb.mxu3 %v3459_v62 }
  0xbb   : > { %1372 = vmatpush.bf16.msrb.mxu0 %v4044_v50 }
  0xbc   : > { %1465 = vmatpush.bf16.msrb.mxu1 %v3471_v0 }
  0xbd   : > { %1479 = vmatpush.bf16.msrb.mxu2 %v3476_v1 }
  0xbe   : > { %1493 = vmatpush.bf16.msrb.mxu3 %v3483_v2 }
  0xbf   : > { %1373 = vmatpush.bf16.msrb.mxu0 %v4053_v53 }
  0xc0   : > { %1466 = vmatpush.bf16.msrb.mxu1 %v3495_v4 }
  0xc1   : > { %1480 = vmatpush.bf16.msrb.mxu2 %v3500_v5 }
  0xc2   : > { %1494 = vmatpush.bf16.msrb.mxu3 %v3507_v6  ;;  %2737 = vmatmul.msk.bf16.vlgmr.msrb.gmra.mxu0 %vm1194_vm0, %v2336_v29  ;;  %v3055_v29 = vld [vmem:[%s3619_s5 + $0x74] sm:$0xf] }
  0xc3   : > { %1505 = vmatpush.bf16.msra.mxu0 %v3440_v59  ;;  %v2767_v43 = vor.u32 %v3055_v29, %v2764_v47  ;;  %v4833_v29 = vld [vmem:[#allocation16_spill] sm:$0xff]  ;;  %v4834_v47 = vld [vmem:[#allocation17_spill] sm:$0xff] }
  0xc4   : > { %1467 = vmatpush.bf16.msrb.mxu1 %v3519_v8 }
  0xc5   : > { %1481 = vmatpush.bf16.msrb.mxu2 %v3524_v9 }
  0xc6   : > { %1495 = vmatpush.bf16.msrb.mxu3 %v3531_v10 }
  0xc7   : > { %1506 = vmatpush.bf16.msra.mxu0 %v3464_v63 }
  0xc8   : > { %1468 = vmatpush.bf16.msrb.mxu1 %v3544_v12 }
  0xc9   : > { %1482 = vmatpush.bf16.msrb.mxu2 %v3549_v13 }
  0xca   : > { %1496 = vmatpush.bf16.msrb.mxu3 %v3556_v14 }
  0xcb   : > { %1507 = vmatpush.bf16.msra.mxu0 %v3488_v3 }
  0xcc   : > { %1469 = vmatpush.bf16.msrb.mxu1 %v3568_v16 }
  0xcd   : > { %1483 = vmatpush.bf16.msrb.mxu2 %v3573_v17 }
  0xce   : > { %1497 = vmatpush.bf16.msrb.mxu3 %v3580_v18 }
  0xcf   : > { %1508 = vmatpush.bf16.msra.mxu0 %v3512_v7 }
  0xd0   : > { %1470 = vmatpush.bf16.msrb.mxu1 %v3590_v20 }
  0xd1   : > { %1484 = vmatpush.bf16.msrb.mxu2 %v3595_v21 }
  0xd2   : > { %1498 = vmatpush.bf16.msrb.mxu3 %v3600_v22 }
  0xd3   : > { %1509 = vmatpush.bf16.msra.mxu0 %v3536_v11  ;;  %1471 = vmatmul.bf16.vlgmr.msrb.gmra.mxu1 %v2755_v32  ;;  %v4830_v32 = vld [vmem:[#allocation13_spill] sm:$0xff] }
  0xd4   : > { %1519 = vmatpush.bf16.msra.mxu1 %v3612_v24  ;;  %1485 = vmatmul.bf16.vlgmr.msrb.gmra.mxu2 %v2759_v54  ;;  %v4831_v54 = vld [vmem:[#allocation6_spill] sm:$0xff] }
  0xd5   : > { %1533 = vmatpush.bf16.msra.mxu2 %v3617_v25  ;;  %1499 = vmatmul.bf16.vlgmr.msrb.gmra.mxu3 %v2763_v55  ;;  %v4832_v55 = vld [vmem:[#allocation15_spill] sm:$0xff] }
  0xd6   : > { %1547 = vmatpush.bf16.msra.mxu3 %v3634_v34  ;;  %v4839_v34 = vld [vmem:[#allocation10_spill] sm:$0xff] }
  0xd7   : > { %1510 = vmatpush.bf16.msra.mxu0 %v3561_v15 }
  0xd8   : > { %1520 = vmatpush.bf16.msra.mxu1 %v3650_v40 }
  0xd9   : > { %1534 = vmatpush.bf16.msra.mxu2 %v3655_v41 }
  0xda   : > { %1548 = vmatpush.bf16.msra.mxu3 %v3662_v42  ;;  %v4837_v42 = vld [vmem:[#allocation20_spill] sm:$0xff] }
  0xdb   : > { %1511 = vmatpush.bf16.msra.mxu0 %v3585_v19 }
  0xdc   : > { %1521 = vmatpush.bf16.msra.mxu1 %v3674_v44 }
  0xdd   : > { %1535 = vmatpush.bf16.msra.mxu2 %v3679_v45 }
  0xde   : > { %1549 = vmatpush.bf16.msra.mxu3 %v3686_v46  ;;  %v4836_v46 = vld [vmem:[#allocation19_spill] sm:$0xff] }
  0xdf   : > { %1512 = vmatpush.bf16.msra.mxu0 %v3605_v23 }
  0xe0   : > { %1522 = vmatpush.bf16.msra.mxu1 %v3698_v48 }
  0xe1   : > { %1536 = vmatpush.bf16.msra.mxu2 %v3703_v49 }
  0xe2   : > { %1550 = vmatpush.bf16.msra.mxu3 %v4826_v51  ;;  %1513 = vmatmul.bf16.vlgmr.msra.gmra.mxu0 %v2767_v43  ;;  %v4835_v51 = vld [vmem:[#allocation8_spill] sm:$0xff]  ;;  %v2770_v43 = vld [vmem:[%s3619_s5 + $0x78] sm:$0xf] }
  0xe3   : > { %1561 = vmatpush.bf16.msrb.mxu0 %v4827_v26  ;;  %v3056_v26 = vld [vmem:[%s3619_s5 + $0x7c] sm:$0xf] }
  0xe4   : > { %1523 = vmatpush.bf16.msra.mxu1 %v4828_v27  ;;  %v4838_v27 = vld [vmem:[#allocation21_spill] sm:$0xff] }
  0xe5   : > { %1537 = vmatpush.bf16.msra.mxu2 %v4829_v35  ;;  %v3062_v35 = vld [vmem:[%s3619_s5 + $0xa8] sm:$0xf0] }
  0xe6   : > { %1551 = vmatpush.bf16.msra.mxu3 %v4830_v32  ;;  %v2772_v32 = vld [vmem:[%s3619_s5 + $0xac] sm:$0xf0] }
  0xe7   : > { %1562 = vmatpush.bf16.msrb.mxu0 %v4831_v54  ;;  %v2778_v54 = vld [vmem:[%s3619_s5 + $0x80] sm:$0xf] }
  0xe8   : > { %1524 = vmatpush.bf16.msra.mxu1 %v4832_v55  ;;  %v3063_v55 = vld [vmem:[%s3619_s5 + $0xb0] sm:$0xf0] }
  0xe9   : > { %1538 = vmatpush.bf16.msra.mxu2 %v4833_v29  ;;  %v2771_v29 = vor.u32 %v3062_v35, %v2770_v43  ;;  %v4844_v35 = vld [vmem:[#allocation18_spill] sm:$0xff]  ;;  %v4847_v43 = vld [vmem:[#allocation32_spill] sm:$0xff] }
  0xea   : > { %1552 = vmatpush.bf16.msra.mxu3 %v4834_v47  ;;  %v2775_v47 = vor.u32 %v3056_v26, %v2772_v32  ;;  %v4845_v26 = vld [vmem:[#allocation30_spill] sm:$0xff]  ;;  %v4846_v32 = vld [vmem:[#allocation31_spill] sm:$0xff] }
  0xeb   : > { %1563 = vmatpush.bf16.msrb.mxu0 %v4835_v51  ;;  %v4842_v51 = vld [vmem:[#allocation27_spill] sm:$0xff] }
  0xec   : > { %1525 = vmatpush.bf16.msra.mxu1 %v4836_v46  ;;  %v4840_v46 = vld [vmem:[#allocation14_spill] sm:$0xff] }
  0xed   : > { %1539 = vmatpush.bf16.msra.mxu2 %v4837_v42  ;;  %v2779_v42 = vor.u32 %v3063_v55, %v2778_v54  ;;  %v4848_v54 = vld [vmem:[#allocation22_spill] sm:$0xff] }
  0xee   : > { %1553 = vmatpush.bf16.msra.mxu3 %v4838_v27  ;;  %v4841_v27 = vld [vmem:[#allocation26_spill] sm:$0xff] }
  0xef   : > { %1564 = vmatpush.bf16.msrb.mxu0 %v4839_v34  ;;  %v4843_v34 = vld [vmem:[#allocation28_spill] sm:$0xff]  ;;  %v4849_v55 = vld [vmem:[#allocation34_spill] sm:$0xff] }
  0xf0   : > { %1526 = vmatpush.bf16.msra.mxu1 %v3792_v36 }
  0xf1   : > { %1540 = vmatpush.bf16.msra.mxu2 %v3797_v37 }
  0xf2   : > { %1554 = vmatpush.bf16.msra.mxu3 %v3802_v38  ;;  %v3057_v38 = vld [vmem:[%s3619_s5 + $0x84] sm:$0xf] }
  0xf3   : > { %1565 = vmatpush.bf16.msrb.mxu0 %v4840_v46  ;;  %1527 = vmatmul.bf16.vlgmr.msra.gmra.mxu1 %v2771_v29  ;;  %v1221_v46 = vpop.f32.mrf.mxu1  ;;  %v4851_v29 = vld [vmem:[#allocation36_spill] sm:$0xff] }
  0xf4   : > { %1575 = vmatpush.bf16.msrb.mxu1 %v4841_v27  ;;  %1541 = vmatmul.bf16.vlgmr.msra.gmra.mxu2 %v2775_v47  ;;  %v2780_v27 = vld [vmem:[%s3619_s5 + $0xb4] sm:$0xf0] }
  0xf5   : > { %1589 = vmatpush.bf16.msrb.mxu2 %v4842_v51  ;;  %1555 = vmatmul.bf16.vlgmr.msra.gmra.mxu3 %v2779_v42  ;;  %v1207_v51 = vpop.f32.mrf.mxu0  ;;  %v2783_v47 = vor.u32 %v3057_v38, %v2780_v27  ;;  %v4858_v38 = vld [vmem:[#allocation43_spill] sm:$0xff]  ;;  %v4860_v27 = vld [vmem:[#allocation33_spill] sm:$0xff] }
  0xf6   : > { %1603 = vmatpush.bf16.msrb.mxu3 %v4843_v34  ;;  %v4850_v34 = vld [vmem:[#allocation35_spill] sm:$0xff]  ;;  %v1222_v42 = vadd.f32 %v1221_v46, %v1207_v51  ;;  %v4859_v51 = vld [vmem:[#allocation44_spill] sm:$0xff] }
  0xf7   : > { %1566 = vmatpush.bf16.msrb.mxu0 %v4844_v35  ;;  %v4852_v35 = vld [vmem:[#allocation25_spill] sm:$0xff] }
  0xf8   : > { %1576 = vmatpush.bf16.msrb.mxu1 %v4845_v26  ;;  %v4853_v26 = vld [vmem:[#allocation38_spill] sm:$0xff] }
  0xf9   : > { %1590 = vmatpush.bf16.msrb.mxu2 %v4846_v32  ;;  %v4854_v32 = vld [vmem:[#allocation39_spill] sm:$0xff] }
  0xfa   : > { %1604 = vmatpush.bf16.msrb.mxu3 %v4847_v43  ;;  %v4855_v43 = vld [vmem:[#allocation40_spill] sm:$0xff] }
  0xfb   : > { %1567 = vmatpush.bf16.msrb.mxu0 %v4848_v54  ;;  %v4856_v54 = vld [vmem:[#allocation29_spill] sm:$0xff] }
  0xfc   : > { %1577 = vmatpush.bf16.msrb.mxu1 %v4849_v55  ;;  %v1235_v55 = vpop.f32.mrf.mxu2 }
  0xfd   : > { %1591 = vmatpush.bf16.msrb.mxu2 %v4850_v34  ;;  %v1236_v37 = vadd.f32 %v1235_v55, %v1222_v42  ;;  %v1249_v34 = vpop.f32.mrf.mxu3  ;;  %v4863_v55 = vld [vmem:[#allocation48_spill] sm:$0xff]  ;;  %v4864_v42 = vld [vmem:[#allocation37_spill] sm:$0xff] }
  0xfe   : > { %1605 = vmatpush.bf16.msrb.mxu3 %v4851_v29  ;;  %v4857_v29 = vld [vmem:[#allocation42_spill] sm:$0xff] }
  0xff   : > { %1568 = vmatpush.bf16.msrb.mxu0 %v4852_v35  ;;  %v1250_v46 = vadd.f32 %v1249_v34, %v1236_v37  ;;  %v4866_v34 = vld [vmem:[#allocation51_spill] sm:$0xff]  ;;  %v4867_v37 = vld [vmem:[#allocation52_spill] sm:$0xff]  ;;  %v1209_v35 = vpop.f32.mrf.mxu0 }
 0x100   : > { %1578 = vmatpush.bf16.msrb.mxu1 %v4853_v26  ;;  %v4868_v26 = vld [vmem:[#allocation41_spill] sm:$0xff] }
 0x101   : > { %1592 = vmatpush.bf16.msrb.mxu2 %v4854_v32  ;;  %v3058_v32 = vld [vmem:[%s3619_s5 + $0x8c] sm:$0xf] }
 0x102   : > { %1606 = vmatpush.bf16.msrb.mxu3 %v4855_v43  ;;  %1569 = vmatmul.bf16.vlgmr.msrb.gmra.mxu0 %v2783_v47  ;;  %v4861_v43 = vld [vmem:[#allocation46_spill] sm:$0xff] }
 0x103   : > { %1617 = vmatpush.bf16.msra.mxu0 %v4856_v54  ;;  %v4862_v54 = vld [vmem:[#allocation47_spill] sm:$0xff]  ;;  %v4865_v47 = vld [vmem:[#allocation50_spill] sm:$0xff] }
 0x104   : > { %1579 = vmatpush.bf16.msrb.mxu1 %v4857_v29  ;;  %v2786_v29 = vld [vmem:[%s3619_s5 + $0x88] sm:$0xf] }
 0x105   : > { %1593 = vmatpush.bf16.msrb.mxu2 %v4858_v38  ;;  %v3064_v38 = vld [vmem:[%s3619_s5 + $0xb8] sm:$0xf0] }
 0x106   : > { %1607 = vmatpush.bf16.msrb.mxu3 %v4859_v51  ;;  %v2788_v51 = vld [vmem:[%s3619_s5 + $0xbc] sm:$0xf0] }
 0x107   : > { %1618 = vmatpush.bf16.msra.mxu0 %v4860_v27  ;;  %v2794_v27 = vld [vmem:[%s3619_s5 + $0x90] sm:$0xf] }
 0x108   : > { %1580 = vmatpush.bf16.msrb.mxu1 %v4861_v43  ;;  %v3065_v43 = vld [vmem:[%s3619_s5 + $0xc0] sm:$0xf0] }
 0x109   : > { %1594 = vmatpush.bf16.msrb.mxu2 %v4862_v54  ;;  %v2791_v54 = vor.u32 %v3058_v32, %v2788_v51  ;;  %v1237_v32 = vpop.f32.mrf.mxu2 }
 0x10a   : > { %1608 = vmatpush.bf16.msrb.mxu3 %v4863_v55  ;;  %v2787_v55 = vor.u32 %v3064_v38, %v2786_v29  ;;  %v4870_v29 = vld [vmem:[#allocation49_spill] sm:$0xff]  ;;  %v1251_v38 = vpop.f32.mrf.mxu3 }
 0x10b   : > { %1619 = vmatpush.bf16.msra.mxu0 %v4864_v42  ;;  %v1223_v42 = vpop.f32.mrf.mxu1 }
 0x10c   : > { %1581 = vmatpush.bf16.msrb.mxu1 %v4865_v47  ;;  %v4869_v47 = vld [vmem:[#allocation45_spill] sm:$0xff] }
 0x10d   : > { %1595 = vmatpush.bf16.msrb.mxu2 %v4866_v34  ;;  %v2795_v34 = vor.u32 %v3065_v43, %v2794_v27  ;;  %v1224_v43 = vadd.f32 %v1223_v42, %v1209_v35  ;;  %v3059_v27 = vld [vmem:[%s3619_s5 + $0x94] sm:$0xf]  ;;  %v3066_v35 = vld [vmem:[%s3619_s5 + $0xc8] sm:$0xf0] }
 0x10e   : > { %1609 = vmatpush.bf16.msrb.mxu3 %v4867_v37 }
 0x10f   : > { %1620 = vmatpush.bf16.msra.mxu0 %v4868_v26 }
 0x110   : > { %1582 = vmatpush.bf16.msrb.mxu1 %v3992_v33 }
 0x111   : > { %1596 = vmatpush.bf16.msrb.mxu2 %v3997_v52 }
 0x112   : > { %1610 = vmatpush.bf16.msrb.mxu3 %v4002_v30 }
 0x113   : > { %1621 = vmatpush.bf16.msra.mxu0 %v4869_v47  ;;  %1583 = vmatmul.bf16.vlgmr.msrb.gmra.mxu1 %v2787_v55  ;;  %v1277_v51 = vpop.f32.mrf.mxu1  ;;  %v2796_v55 = vld [vmem:[%s3619_s5 + $0xc4] sm:$0xf0] }
 0x114   : > { %1635 = vmatpush.bf16.msra.mxu1 %v4014_v39  ;;  %1597 = vmatmul.bf16.vlgmr.msrb.gmra.mxu2 %v2791_v54  ;;  %v2799_v30 = vor.u32 %v3059_v27, %v2796_v55  ;;  %v4879_v27 = vld [vmem:[#allocation16_spill] sm:$0xff] }
 0x115   : > { %1730 = vmatpush.bf16.msra.mxu2 %v3425_v56  ;;  %1611 = vmatmul.bf16.vlgmr.msrb.gmra.mxu3 %v2795_v34  ;;  %v1263_v56 = vpop.f32.mrf.mxu0  ;;  %v1238_v34 = vadd.f32 %v1237_v32, %v1224_v43 }
 0x116   : > { %1744 = vmatpush.bf16.msra.mxu3 %v3430_v57  ;;  %v4871_v57 = vld [vmem:[#allocation53_spill] sm:$0xff]  ;;  %v1264_v54 = vadd.f32 %v1263_v56, %v1250_v46 }
 0x117   : > { %1622 = vmatpush.bf16.msra.mxu0 %v4870_v29  ;;  %v1291_v46 = vpop.f32.mrf.mxu2  ;;  %v1252_v42 = vadd.f32 %v1251_v38, %v1238_v34  ;;  %v4878_v38 = vld [vmem:[#allocation15_spill] sm:$0xff] }
 0x118   : > { %1636 = vmatpush.bf16.msra.mxu1 %v4035_v31  ;;  %v4880_v34 = vld [vmem:[#allocation7_spill] sm:$0xff] }
 0x119   : > { %1731 = vmatpush.bf16.msra.mxu2 %v3447_v60  ;;  %v1278_v60 = vadd.f32 %v1277_v51, %v1264_v54 }
 0x11a   : > { %1745 = vmatpush.bf16.msra.mxu3 %v3452_v61  ;;  %v2802_v61 = vld [vmem:[%s3619_s5 + $0x98] sm:$0xf] }
 0x11b   : > { %1623 = vmatpush.bf16.msra.mxu0 %v4871_v57  ;;  %v2803_v32 = vor.u32 %v3066_v35, %v2802_v61  ;;  %v1279_v51 = vpop.f32.mrf.mxu1 }
 0x11c   : > { %1637 = vmatpush.bf16.msra.mxu1 %v4044_v50 }
 0x11d   : > { %1732 = vmatpush.bf16.msra.mxu2 %v3471_v0  ;;  %v1292_v0 = vadd.f32 %v1291_v46, %v1278_v60  ;;  %v1265_v43 = vpop.f32.mrf.mxu0  ;;  %v4881_v60 = vld [vmem:[#allocation8_spill] sm:$0xff] }
 0x11e   : > { %1746 = vmatpush.bf16.msra.mxu3 %v3476_v1  ;;  %v1305_v1 = vpop.f32.mrf.mxu3  ;;  %v1266_v56 = vadd.f32 %v1265_v43, %v1252_v42 }
 0x11f   : > { %1624 = vmatpush.bf16.msra.mxu0 %v4007_v28  ;;  %v1306_v54 = vadd.f32 %v1305_v1, %v1292_v0  ;;  %v2837_v0 = vld [vmem:[%s3619_s5 + $0xe0] sm:$0xf] }
 0x120   : > { %1638 = vmatpush.bf16.msra.mxu1 %v4053_v53  ;;  %v4882_v1 = vld [vmem:[#allocation19_spill] sm:$0xff] }
 0x121   : > { %1733 = vmatpush.bf16.msra.mxu2 %v3495_v4 }
 0x122   : > { %1747 = vmatpush.bf16.msra.mxu3 %v3500_v5  ;;  %1625 = vmatmul.bf16.vlgmr.msra.gmra.mxu0 %v2799_v30  ;;  %v2823_v30 = vld [vmem:[%s3619_s5 + $0x104] sm:$0xf0] }
 0x123   : > { %1758 = vmatpush.bf16.msrb.mxu0 %v3435_v58  ;;  %v1280_v58 = vadd.f32 %v1279_v51, %v1266_v56  ;;  %2804 = vmatmul.msk.bf16.vlgmr.msra.gmra.mxu1 %vm1194_vm0, %v2803_v32  ;;  %v4883_v32 = vld [vmem:[#allocation20_spill] sm:$0xff]  ;;  %v3075_v56 = vld [vmem:[%s3619_s5 + $0x110] sm:$0xf0]  ;;  %v2839_v51 = vld [vmem:[%s3619_s5 + $0x114] sm:$0xf0] }
 0x124   : > { %1772 = vmatpush.bf16.msrb.mxu1 %v3440_v59  ;;  %v1293_v59 = vpop.f32.mrf.mxu2 }
 0x125   : > { %1734 = vmatpush.bf16.msra.mxu2 %v3519_v8  ;;  %v1294_v4 = vadd.f32 %v1293_v59, %v1280_v58  ;;  %v4884_v58 = vld [vmem:[#allocation9_spill] sm:$0xff]  ;;  %v4885_v59 = vld [vmem:[#allocation10_spill] sm:$0xff] }
 0x126   : > { %1748 = vmatpush.bf16.msra.mxu3 %v3524_v9  ;;  %v1307_v5 = vpop.f32.mrf.mxu3  ;;  %v3067_v9 = vld [vmem:[%s3619_s5 + $0xd4] sm:$0xf] }
 0x127   : > { %1759 = vmatpush.bf16.msrb.mxu0 %v3459_v62  ;;  %v1308_v8 = vadd.f32 %v1307_v5, %v1294_v4  ;;  %v2821_v62 = vld [vmem:[%s3619_s5 + $0xd0] sm:$0xf]  ;;  %v2838_v4 = vor.u32 %v3075_v56, %v2837_v0 }
 0x128   : > { %1773 = vmatpush.bf16.msrb.mxu1 %v3464_v63  ;;  %v3073_v63 = vld [vmem:[%s3619_s5 + $0x100] sm:$0xf0] }
 0x129   : > { %1735 = vmatpush.bf16.msra.mxu2 %v3544_v12  ;;  %v2822_v12 = vor.u32 %v3073_v63, %v2821_v62  ;;  %v4887_v62 = vld [vmem:[#allocation13_spill] sm:$0xff]  ;;  %v4888_v63 = vld [vmem:[#allocation14_spill] sm:$0xff] }
 0x12a   : > { %1749 = vmatpush.bf16.msra.mxu3 %v3549_v13  ;;  %v3068_v13 = vld [vmem:[%s3619_s5 + $0xdc] sm:$0xf] }
 0x12b   : > { %1760 = vmatpush.bf16.msrb.mxu0 %v3483_v2  ;;  %v2826_v2 = vor.u32 %v3067_v9, %v2823_v30  ;;  %v4889_v9 = vld [vmem:[#allocation26_spill] sm:$0xff]  ;;  %v4890_v30 = vld [vmem:[#allocation27_spill] sm:$0xff] }
 0x12c   : > { %1774 = vmatpush.bf16.msrb.mxu1 %v3488_v3 }
 0x12d   : > { %1736 = vmatpush.bf16.msra.mxu2 %v3568_v16  ;;  %v2831_v16 = vld [vmem:[%s3619_s5 + $0x10c] sm:$0xf0] }
 0x12e   : > { %1750 = vmatpush.bf16.msra.mxu3 %v3573_v17  ;;  %v2834_v17 = vor.u32 %v3068_v13, %v2831_v16  ;;  %v4896_v13 = vld [vmem:[#allocation22_spill] sm:$0xff] }
 0x12f   : > { %1761 = vmatpush.bf16.msrb.mxu0 %v3507_v6  ;;  %v1319_v3 = vpop.f32.mrf.mxu0  ;;  %v2829_v6 = vld [vmem:[%s3619_s5 + $0xd8] sm:$0xf]  ;;  %v3076_v16 = vld [vmem:[%s3619_s5 + $0x118] sm:$0xf0] }
 0x130   : > { %1775 = vmatpush.bf16.msrb.mxu1 %v3512_v7  ;;  %v1320_v7 = vadd.f32 %v1319_v3, %v1306_v54  ;;  %v3069_v54 = vld [vmem:[%s3619_s5 + $0xe4] sm:$0xf]  ;;  %v4891_v3 = vld [vmem:[#allocation17_spill] sm:$0xff] }
 0x131   : > { %1737 = vmatpush.bf16.msra.mxu2 %v3590_v20  ;;  %v4873_v20 = vld [vmem:[#allocation4_spill] sm:$0xff]  ;;  %v2842_v5 = vor.u32 %v3069_v54, %v2839_v51  ;;  %v2853_v51 = vld [vmem:[%s3619_s5 + $0xf0] sm:$0xf] }
 0x132   : > { %1751 = vmatpush.bf16.msra.mxu3 %v3595_v21 }
 0x133   : > { %1762 = vmatpush.bf16.msrb.mxu0 %v3531_v10  ;;  %v1333_v10 = vpop.f32.mrf.mxu1 }
 0x134   : > { %1776 = vmatpush.bf16.msrb.mxu1 %v3536_v11  ;;  %1738 = vmatmul.bf16.vlgmr.msra.gmra.mxu2 %v2822_v12  ;;  %v3074_v11 = vld [vmem:[%s3619_s5 + $0x108] sm:$0xf0] }
 0x135   : > { %1786 = vmatpush.bf16.msrb.mxu2 %v3612_v24  ;;  %1752 = vmatmul.bf16.vlgmr.msra.gmra.mxu3 %v2826_v2 }
 0x136   : > { %1800 = vmatpush.bf16.msrb.mxu3 %v3617_v25 }
 0x137   : > { %1763 = vmatpush.bf16.msrb.mxu0 %v3556_v14  ;;  %v1334_v14 = vadd.f32 %v1333_v10, %v1320_v7  ;;  %v1321_v25 = vpop.f32.mrf.mxu0  ;;  %v4894_v7 = vld [vmem:[#allocation31_spill] sm:$0xff]  ;;  %v2845_v10 = vld [vmem:[%s3619_s5 + $0xe8] sm:$0xf] }
 0x138   : > { %1777 = vmatpush.bf16.msrb.mxu1 %v3561_v15  ;;  %v2830_v15 = vor.u32 %v3074_v11, %v2829_v6  ;;  %v1361_v24 = vpop.f32.mrf.mxu3  ;;  %v4893_v6 = vld [vmem:[#allocation30_spill] sm:$0xff]  ;;  %v4895_v11 = vld [vmem:[#allocation21_spill] sm:$0xff] }
 0x139   : > { %1787 = vmatpush.bf16.msrb.mxu2 %v3650_v40  ;;  %v1322_v40 = vadd.f32 %v1321_v25, %v1308_v8  ;;  %v4886_v8 = vld [vmem:[#allocation23_spill] sm:$0xff]  ;;  %v4900_v25 = vld [vmem:[#allocation25_spill] sm:$0xff] }
 0x13a   : > { %1801 = vmatpush.bf16.msrb.mxu3 %v3655_v41 }
 0x13b   : > { %1764 = vmatpush.bf16.msrb.mxu0 %v3580_v18  ;;  %v1347_v18 = vpop.f32.mrf.mxu2 }
 0x13c   : > { %1778 = vmatpush.bf16.msrb.mxu1 %v3585_v19  ;;  %v4872_v19 = vld [vmem:[#allocation3_spill] sm:$0xff]  ;;  %v1348_v21 = vadd.f32 %v1347_v18, %v1334_v14  ;;  %v3070_v14 = vld [vmem:[%s3619_s5 + $0xec] sm:$0xf] }
 0x13d   : > { %1788 = vmatpush.bf16.msrb.mxu2 %v3674_v44  ;;  %v4874_v44 = vld [vmem:[#allocation11_spill] sm:$0xff] }
 0x13e   : > { %1802 = vmatpush.bf16.msrb.mxu3 %v3679_v45  ;;  %v1362_v41 = vadd.f32 %v1361_v24, %v1348_v21  ;;  %v4876_v45 = vld [vmem:[#allocation5_spill] sm:$0xff]  ;;  %v4898_v18 = vld [vmem:[#allocation35_spill] sm:$0xff]  ;;  %v4899_v24 = vld [vmem:[#allocation24_spill] sm:$0xff] }
 0x13f   : > { %1765 = vmatpush.bf16.msrb.mxu0 %v3600_v22  ;;  %v1335_v22 = vpop.f32.mrf.mxu1  ;;  %v1375_v42 = vpop.f32.mrf.mxu0 }
 0x140   : > { %1779 = vmatpush.bf16.msrb.mxu1 %v3605_v23  ;;  %v4875_v23 = vld [vmem:[#allocation12_spill] sm:$0xff]  ;;  %v1363_v35 = vpop.f32.mrf.mxu3  ;;  %v4240_v43 = vadd.f32 %v1375_v42, %v1362_v41  ;;  %v4902_v41 = vld [vmem:[#allocation39_spill] sm:$0xff] }
 0x141   : > { %1789 = vmatpush.bf16.msrb.mxu2 %v3698_v48  ;;  %v4877_v48 = vld [vmem:[#allocation6_spill] sm:$0xff] }
 0x142   : > { %1803 = vmatpush.bf16.msrb.mxu3 %v3703_v49  ;;  %1766 = vmatmul.bf16.vlgmr.msrb.gmra.mxu0 %v2830_v15  ;;  %v1336_v49 = vadd.f32 %v1335_v22, %v1322_v40  ;;  %v2847_v15 = vld [vmem:[%s3619_s5 + $0x11c] sm:$0xf0]  ;;  %v4901_v40 = vld [vmem:[#allocation38_spill] sm:$0xff] }
 0x143   : > { %1814 = vmatpush.bf16.msra.mxu0 %v4872_v19  ;;  %1780 = vmatmul.bf16.vlgmr.msrb.gmra.mxu1 %v2834_v17  ;;  %v1349_v55 = vpop.f32.mrf.mxu2  ;;  %v4897_v17 = vld [vmem:[#allocation34_spill] sm:$0xff]  ;;  %v2846_v19 = vor.u32 %v3076_v16, %v2845_v10  ;;  %v2863_v10 = vld [vmem:[%s3619_s5 + $0x12c] sm:$0xf0]  ;;  %v2869_v16 = vld [vmem:[%s3619_s5 + $0x100] sm:$0xf] }
 0x144   : > { %1828 = vmatpush.bf16.msra.mxu1 %v4873_v20  ;;  %v1350_v61 = vadd.f32 %v1349_v55, %v1336_v49  ;;  %v2850_v20 = vor.u32 %v3070_v14, %v2847_v15  ;;  %v4907_v55 = vld [vmem:[#allocation32_spill] sm:$0xff]  ;;  %v3079_v14 = vld [vmem:[%s3619_s5 + $0x130] sm:$0xf0]  ;;  %v3130_v15 = vld [vmem:[%s4673_s1 + $0x78] sm:$0xff] }
 0x145   : > { %1790 = vmatpush.bf16.msrb.mxu2 %v4874_v44  ;;  %v4903_v44 = vld [vmem:[#allocation28_spill] sm:$0xff] }
 0x146   : > { %1804 = vmatpush.bf16.msrb.mxu3 %v4875_v23  ;;  %v1364_v46 = vadd.f32 %v1363_v35, %v1350_v61  ;;  %v4904_v23 = vld [vmem:[#allocation29_spill] sm:$0xff]  ;;  %v4909_v61 = vld [vmem:[#allocation46_spill] sm:$0xff]  ;;  %v4910_v35 = vld [vmem:[#allocation47_spill] sm:$0xff] }
 0x147   : > { %1815 = vmatpush.bf16.msra.mxu0 %v4876_v45  ;;  %v1377_v12 = vpop.f32.mrf.mxu0 }
 0x148   : > { %1829 = vmatpush.bf16.msra.mxu1 %v4877_v48  ;;  %v4253_v2 = vadd.f32 %v1377_v12, %v1364_v46 }
 0x149   : > { %1791 = vmatpush.bf16.msrb.mxu2 %v4878_v38  ;;  %v4905_v38 = vld [vmem:[#allocation42_spill] sm:$0xff] }
 0x14a   : > { %1805 = vmatpush.bf16.msrb.mxu3 %v4879_v27  ;;  %v4906_v27 = vld [vmem:[#allocation43_spill] sm:$0xff] }
 0x14b   : > { %1816 = vmatpush.bf16.msra.mxu0 %v4880_v34  ;;  %v4908_v34 = vld [vmem:[#allocation33_spill] sm:$0xff] }
 0x14c   : > { %1830 = vmatpush.bf16.msra.mxu1 %v4881_v60 }
 0x14d   : > { %1792 = vmatpush.bf16.msrb.mxu2 %v4882_v1  ;;  %v4911_v1 = vld [vmem:[#allocation36_spill] sm:$0xff] }
 0x14e   : > { %1806 = vmatpush.bf16.msrb.mxu3 %v4883_v32  ;;  %v4912_v32 = vld [vmem:[#allocation37_spill] sm:$0xff] }
 0x14f   : > { %1817 = vmatpush.bf16.msra.mxu0 %v4884_v58 }
 0x150   : > { %1831 = vmatpush.bf16.msra.mxu1 %v4885_v59  ;;  %v1472_v21 = vpop.f32.mrf.mxu1  ;;  %v4913_v59 = vld [vmem:[#allocation50_spill] sm:$0xff] }
 0x151   : > { %1793 = vmatpush.bf16.msrb.mxu2 %v3792_v36  ;;  %v4892_v36 = vld [vmem:[#allocation18_spill] sm:$0xff] }
 0x152   : > { %1807 = vmatpush.bf16.msrb.mxu3 %v4886_v8  ;;  %v3071_v8 = vld [vmem:[%s3619_s5 + $0xf4] sm:$0xf] }
 0x153   : > { %1818 = vmatpush.bf16.msra.mxu0 %v4887_v62  ;;  %v2855_v62 = vld [vmem:[%s3619_s5 + $0x124] sm:$0xf0] }
 0x154   : > { %1832 = vmatpush.bf16.msra.mxu1 %v4888_v63  ;;  %1794 = vmatmul.bf16.vlgmr.msrb.gmra.mxu2 %v2838_v4  ;;  %v4914_v4 = vld [vmem:[#allocation51_spill] sm:$0xff]  ;;  %v4915_v63 = vld [vmem:[#allocation40_spill] sm:$0xff] }
 0x155   : > { %1842 = vmatpush.bf16.msra.mxu2 %v4889_v9  ;;  %1808 = vmatmul.bf16.vlgmr.msrb.gmra.mxu3 %v2842_v5  ;;  %v3077_v5 = vld [vmem:[%s3619_s5 + $0x120] sm:$0xf0] }
 0x156   : > { %1856 = vmatpush.bf16.msra.mxu3 %v4890_v30  ;;  %v2854_v9 = vor.u32 %v3077_v5, %v2853_v51  ;;  %v2858_v30 = vor.u32 %v3071_v8, %v2855_v62  ;;  %v3149_v5 = vld [vmem:[%s4673_s1 + $0x138] sm:$0xff]  ;;  %v3150_v8 = vld [vmem:[%s4673_s1 + $0x50] sm:$0xff] }
 0x157   : > { %1819 = vmatpush.bf16.msra.mxu0 %v4891_v3  ;;  %v1486_v22 = vpop.f32.mrf.mxu2  ;;  %v3151_v62 = vld [vmem:[%s4673_s1 + $0x90] sm:$0xff] }
 0x158   : > { %1833 = vmatpush.bf16.msra.mxu1 %v4892_v36  ;;  %v1487_v45 = vadd.f32 %v1486_v22, %v1472_v21  ;;  %v1500_v48 = vpop.f32.mrf.mxu3  ;;  %v1474_v46 = vpop.f32.mrf.mxu1  ;;  %v4916_v36 = vld [vmem:[#allocation44_spill] sm:$0xff]  ;;  %v3136_v22 = vld [vmem:[%s4673_s1 + $0xf0] sm:$0xff] }
 0x159   : > { %1843 = vmatpush.bf16.msra.mxu2 %v4893_v6  ;;  %v2861_v6 = vld [vmem:[%s3619_s5 + $0xf8] sm:$0xf] }
 0x15a   : > { %1857 = vmatpush.bf16.msra.mxu3 %v4894_v7  ;;  %v1501_v49 = vadd.f32 %v1500_v48, %v1487_v45  ;;  %v3078_v7 = vld [vmem:[%s3619_s5 + $0x128] sm:$0xf0] }
 0x15b   : > { %1820 = vmatpush.bf16.msra.mxu0 %v4895_v11  ;;  %v2862_v11 = vor.u32 %v3078_v7, %v2861_v6  ;;  %v2898_v6 = vld [vmem:[%s3619_s5 + $0x174] sm:$0xf0]  ;;  %v2896_v7 = vld [vmem:[%s3619_s5 + $0x140] sm:$0xf] }
 0x15c   : > { %1834 = vmatpush.bf16.msra.mxu1 %v4896_v13  ;;  %v4918_v13 = vld [vmem:[#allocation54_spill] sm:$0xff] }
 0x15d   : > { %1844 = vmatpush.bf16.msra.mxu2 %v4897_v17 }
 0x15e   : > { %1858 = vmatpush.bf16.msra.mxu3 %v4898_v18  ;;  %v3132_v18 = vld [vmem:[%s4673_s1 + $0xf8] sm:$0xff] }
 0x15f   : > { %1821 = vmatpush.bf16.msra.mxu0 %v4899_v24  ;;  %v1514_v60 = vpop.f32.mrf.mxu0  ;;  %v1488_v0 = vpop.f32.mrf.mxu2 }
 0x160   : > { %1835 = vmatpush.bf16.msra.mxu1 %v4900_v25  ;;  %v1515_v42 = vadd.f32 %v1514_v60, %v1501_v49  ;;  %v1489_v56 = vadd.f32 %v1488_v0, %v1474_v46  ;;  %v1502_v54 = vpop.f32.mrf.mxu3  ;;  %v3133_v25 = vld [vmem:[%s4673_s1 + $0x18] sm:$0xff]  ;;  %v3138_v49 = vld [vmem:[%s4673_s1 + $0x68] sm:$0xff]  ;;  %v3143_v0 = vld [vmem:[%s4673_s1 + $0xa0] sm:$0xff] }
 0x161   : > { %1845 = vmatpush.bf16.msra.mxu2 %v4901_v40  ;;  %v3134_v40 = vld [vmem:[%s4673_s1 + $0x70] sm:$0xff]  ;;  %v3086_v46 = vld [vmem:[%s3619_s5 + $0x168] sm:$0xf0] }
 0x162   : > { %1859 = vmatpush.bf16.msra.mxu3 %v4902_v41  ;;  %1822 = vmatmul.bf16.vlgmr.msra.gmra.mxu0 %v2846_v19  ;;  %v1503_v58 = vadd.f32 %v1502_v54, %v1489_v56  ;;  %v3135_v41 = vld [vmem:[%s4673_s1 + $0xb0] sm:$0xff]  ;;  %v3145_v54 = vld [vmem:[%s4673_s1] sm:$0xff] }
 0x163   : > { %1870 = vmatpush.bf16.msrb.mxu0 %v4903_v44  ;;  %1836 = vmatmul.bf16.vlgmr.msra.gmra.mxu1 %v2850_v20  ;;  %v2870_v20 = vor.u32 %v3079_v14, %v2869_v16  ;;  %v3162_v14 = vld [vmem:[%s4673_s1 + $0x178] sm:$0xff] }
 0x164   : > { %1884 = vmatpush.bf16.msrb.mxu1 %v4904_v23  ;;  %v3137_v23 = vld [vmem:[%s4673_s1 + $0x10] sm:$0xff] }
 0x165   : > { %1846 = vmatpush.bf16.msra.mxu2 %v4905_v38  ;;  %v3139_v38 = vld [vmem:[%s4673_s1 + $0xa8] sm:$0xff] }
 0x166   : > { %1860 = vmatpush.bf16.msra.mxu3 %v4906_v27 }
 0x167   : > { %1871 = vmatpush.bf16.msrb.mxu0 %v4907_v55  ;;  %v1516_v12 = vpop.f32.mrf.mxu0 }
 0x168   : > { %1885 = vmatpush.bf16.msrb.mxu1 %v4908_v34  ;;  %v1517_v3 = vadd.f32 %v1516_v12, %v1503_v58  ;;  %v3140_v34 = vld [vmem:[%s4673_s1 + $0xe8] sm:$0xff]  ;;  %v3146_v58 = vld [vmem:[%s4673_s1 + $0x58] sm:$0xff] }
 0x169   : > { %1847 = vmatpush.bf16.msra.mxu2 %v4909_v61  ;;  %v3141_v61 = vld [vmem:[%s4673_s1 + $0x8] sm:$0xff] }
 0x16a   : > { %1861 = vmatpush.bf16.msra.mxu3 %v4910_v35  ;;  %v2888_v35 = vld [vmem:[%s3619_s5 + $0x138] sm:$0xf]  ;;  %v3154_v12 = vld [vmem:[%s4673_s1 + $0x48] sm:$0xff] }
 0x16b   : > { %1872 = vmatpush.bf16.msrb.mxu0 %v4911_v1  ;;  %v3144_v1 = vld [vmem:[%s4673_s1 + $0xe0] sm:$0xff]  ;;  %v2889_v56 = vor.u32 %v3086_v46, %v2888_v35  ;;  %v2904_v35 = vld [vmem:[%s3619_s5 + $0x148] sm:$0xf]  ;;  %v3088_v46 = vld [vmem:[%s3619_s5 + $0x178] sm:$0xf0] }
 0x16c   : > { %1886 = vmatpush.bf16.msrb.mxu1 %v4912_v32 }
 0x16d   : > { %1848 = vmatpush.bf16.msra.mxu2 %v4913_v59  ;;  %v3147_v59 = vld [vmem:[%s4673_s1 + $0x98] sm:$0xff] }
 0x16e   : > { %1862 = vmatpush.bf16.msra.mxu3 %v4914_v4  ;;  %v3148_v4 = vld [vmem:[%s4673_s1 + $0xd8] sm:$0xff] }
 0x16f   : > { %1873 = vmatpush.bf16.msrb.mxu0 %v4915_v63  ;;  %v3152_v63 = vld [vmem:[%s4673_s1 + $0xd0] sm:$0xff] }
 0x170   : > { %1887 = vmatpush.bf16.msrb.mxu1 %v4868_v26  ;;  %v3126_v26 = vld [vmem:[%s4673_s1 + $0x38] sm:$0xff] }
 0x171   : > { %1849 = vmatpush.bf16.msra.mxu2 %v3992_v33  ;;  %v4917_v33 = vld [vmem:[#allocation48_spill] sm:$0xff] }
 0x172   : > { %1863 = vmatpush.bf16.msra.mxu3 %v3997_v52  ;;  %v3127_v52 = vld [vmem:[%s4673_s1 + $0x30] sm:$0xff] }
 0x173   : > { %1874 = vmatpush.bf16.msrb.mxu0 %v4916_v36 }
 0x174   : > { %1888 = vmatpush.bf16.msrb.mxu1 %v4869_v47  ;;  %1850 = vmatmul.bf16.vlgmr.msra.gmra.mxu2 %v2854_v9  ;;  %v3153_v9 = vld [vmem:[%s4673_s1 + $0x130] sm:$0xff] }
 0x175   : > { %1902 = vmatpush.bf16.msrb.mxu2 %v4014_v39  ;;  %1864 = vmatmul.bf16.vlgmr.msra.gmra.mxu3 %v2858_v30  ;;  %v1528_v39 = vpop.f32.mrf.mxu1 }
 0x176   : > { %1997 = vmatpush.bf16.msrb.mxu3 %v3126_v26  ;;  %v1529_v47 = vadd.f32 %v1528_v39, %v1515_v42  ;;  %v3142_v42 = vld [vmem:[%s4673_s1 + $0x60] sm:$0xff]  ;;  %v3156_v39 = vld [vmem:[%s4673_s1 + $0xc8] sm:$0xff] }
 0x177   : > { %1875 = vmatpush.bf16.msrb.mxu0 %v4917_v33  ;;  %v3081_v26 = vld [vmem:[%s3619_s5 + $0x144] sm:$0xf]  ;;  %v3080_v33 = vld [vmem:[%s3619_s5 + $0x13c] sm:$0xf] }
 0x178   : > { %1889 = vmatpush.bf16.msrb.mxu1 %v4870_v29  ;;  %v3072_v29 = vld [vmem:[%s3619_s5 + $0xfc] sm:$0xf] }
 0x179   : > { %1903 = vmatpush.bf16.msrb.mxu2 %v4035_v31  ;;  %v3128_v31 = vld [vmem:[%s4673_s1 + $0x28] sm:$0xff] }
 0x17a   : > { %1998 = vmatpush.bf16.msrb.mxu3 %v3127_v52  ;;  %v2890_v52 = vld [vmem:[%s3619_s5 + $0x16c] sm:$0xf0] }
 0x17b   : > { %1876 = vmatpush.bf16.msrb.mxu0 %v4867_v37  ;;  %v2866_v37 = vor.u32 %v3072_v29, %v2863_v10  ;;  %v2893_v29 = vor.u32 %v3080_v33, %v2890_v52  ;;  %v3158_v10 = vld [vmem:[%s4673_s1 + $0x40] sm:$0xff]  ;;  %v3187_v33 = vld [vmem:[%s4673_s1 + $0x188] sm:$0xff] }
 0x17c   : > { %1890 = vmatpush.bf16.msrb.mxu1 %v4871_v57  ;;  %v3129_v57 = vld [vmem:[%s4673_s1 + $0x20] sm:$0xff]  ;;  %v3082_v52 = vld [vmem:[%s3619_s5 + $0x14c] sm:$0xf] }
 0x17d   : > { %1904 = vmatpush.bf16.msrb.mxu2 %v4044_v50  ;;  %v1542_v50 = vpop.f32.mrf.mxu2  ;;  %v1530_v19 = vpop.f32.mrf.mxu1 }
 0x17e   : > { %1999 = vmatpush.bf16.msrb.mxu3 %v3128_v31  ;;  %v1543_v17 = vadd.f32 %v1542_v50, %v1529_v47  ;;  %v1531_v21 = vadd.f32 %v1530_v19, %v1517_v3  ;;  %v3155_v3 = vld [vmem:[%s4673_s1 + $0x88] sm:$0xff]  ;;  %v3087_v31 = vld [vmem:[%s3619_s5 + $0x170] sm:$0xf0]  ;;  %v3161_v50 = vld [vmem:[%s4673_s1 + $0x120] sm:$0xff] }
 0x17f   : > { %1877 = vmatpush.bf16.msrb.mxu0 %v4918_v13  ;;  %v1570_v44 = vpop.f32.mrf.mxu0  ;;  %v3157_v47 = vld [vmem:[%s4673_s1 + $0x128] sm:$0xff]  ;;  %v2901_v13 = vor.u32 %v3081_v26, %v2898_v6 }
 0x180   : > { %1891 = vmatpush.bf16.msrb.mxu1 %v4007_v28  ;;  %v3131_v28 = vld [vmem:[%s4673_s1 + $0xb8] sm:$0xff]  ;;  %v3186_v26 = vld [vmem:[%s4673_s1 + $0x148] sm:$0xff] }
 0x181   : > { %1905 = vmatpush.bf16.msrb.mxu2 %v4053_v53  ;;  %v1556_v53 = vpop.f32.mrf.mxu3  ;;  %v3188_v6 = vld [vmem:[%s4673_s1 + $0x1c8] sm:$0xff] }
 0x182   : > { %2000 = vmatpush.bf16.msrb.mxu3 %v3129_v57  ;;  %1878 = vmatmul.bf16.vlgmr.msrb.gmra.mxu0 %v2862_v11  ;;  %v1557_v24 = vadd.f32 %v1556_v53, %v1543_v17  ;;  %v3159_v11 = vld [vmem:[%s4673_s1 + $0x80] sm:$0xff]  ;;  %v3164_v53 = vld [vmem:[%s4673_s1 + $0x1f8] sm:$0xff] }
 0x183   : > { %2011 = vmatpush.bf16.msra.mxu0 %v3130_v15  ;;  %1892 = vmatmul.bf16.vlgmr.msrb.gmra.mxu1 %v2866_v37  ;;  %v2897_v37 = vor.u32 %v3087_v31, %v2896_v7  ;;  %v3160_v57 = vld [vmem:[%s4673_s1 + $0xc0] sm:$0xff]  ;;  %v3163_v15 = vld [vmem:[%s4673_s1 + $0x1b8] sm:$0xff]  ;;  %v3189_v7 = vld [vmem:[%s4673_s1 + $0x228] sm:$0xff] }
 0x184   : > { %2025 = vmatpush.bf16.msra.mxu1 %v3131_v28  ;;  %2871 = vmatmul.msk.bf16.vlgmr.msrb.gmra.mxu2 %vm1194_vm0, %v2870_v20  ;;  %v1571_v45 = vadd.f32 %v1570_v44, %v1557_v24  ;;  %v3166_v24 = vld [vmem:[%s4673_s1 + $0x170] sm:$0xff]  ;;  %v2914_v31 = vld [vmem:[%s3619_s5 + $0x184] sm:$0xf0] }
 0x185   : > { %2039 = vmatpush.bf16.msra.mxu2 %v3132_v18  ;;  %v1544_v48 = vpop.f32.mrf.mxu2 }
 0x186   : > { %2001 = vmatpush.bf16.msrb.mxu3 %v3133_v25  ;;  %v1545_v27 = vadd.f32 %v1544_v48, %v1531_v21  ;;  %v3165_v21 = vld [vmem:[%s4673_s1 + $0x118] sm:$0xff]  ;;  %v3167_v25 = vld [vmem:[%s4673_s1 + $0x1b0] sm:$0xff]  ;;  %v3171_v48 = vld [vmem:[%s4673_s1 + $0x1a8] sm:$0xff] }
 0x187   : > { %2012 = vmatpush.bf16.msra.mxu0 %v3134_v40  ;;  %v1572_v32 = vpop.f32.mrf.mxu0  ;;  %v3168_v40 = vld [vmem:[%s4673_s1 + $0x1f0] sm:$0xff] }
 0x188   : > { %2026 = vmatpush.bf16.msra.mxu1 %v3135_v41 }
 0x189   : > { %2040 = vmatpush.bf16.msra.mxu2 %v3136_v22  ;;  %v1558_v55 = vpop.f32.mrf.mxu3  ;;  %v3169_v22 = vld [vmem:[%s4673_s1 + $0x110] sm:$0xff] }
 0x18a   : > { %2002 = vmatpush.bf16.msrb.mxu3 %v3137_v23  ;;  %v1559_v60 = vadd.f32 %v1558_v55, %v1545_v27  ;;  %v3172_v27 = vld [vmem:[%s4673_s1 + $0x1e8] sm:$0xff] }
 0x18b   : > { %2013 = vmatpush.bf16.msra.mxu0 %v3138_v49 }
 0x18c   : > { %2027 = vmatpush.bf16.msra.mxu1 %v3139_v38  ;;  %v1573_v51 = vadd.f32 %v1572_v32, %v1559_v60  ;;  %v3173_v60 = vld [vmem:[%s4673_s1 + $0x108] sm:$0xff] }
 0x18d   : > { %2041 = vmatpush.bf16.msra.mxu2 %v3140_v34 }
 0x18e   : > { %2003 = vmatpush.bf16.msrb.mxu3 %v3141_v61 }
 0x18f   : > { %2014 = vmatpush.bf16.msra.mxu0 %v3142_v42  ;;  %v3174_v42 = vld [vmem:[%s4673_s1 + $0x160] sm:$0xff] }
 0x190   : > { %2028 = vmatpush.bf16.msra.mxu1 %v3143_v0  ;;  %v1584_v30 = vpop.f32.mrf.mxu1  ;;  %v3175_v0 = vld [vmem:[%s4673_s1 + $0x1a0] sm:$0xff] }
 0x191   : > { %2042 = vmatpush.bf16.msra.mxu2 %v3144_v1  ;;  %v1585_v36 = vadd.f32 %v1584_v30, %v1571_v45  ;;  %v3170_v45 = vld [vmem:[%s4673_s1 + $0x168] sm:$0xff]  ;;  %v3176_v1 = vld [vmem:[%s4673_s1 + $0x1e0] sm:$0xff]  ;;  %v3183_v30 = vld [vmem:[%s4673_s1 + $0x190] sm:$0xff] }
 0x192   : > { %2004 = vmatpush.bf16.msrb.mxu3 %v3145_v54 }
 0x193   : > { %2015 = vmatpush.bf16.msra.mxu0 %v3146_v58 }
 0x194   : > { %2029 = vmatpush.bf16.msra.mxu1 %v3147_v59  ;;  %v3178_v59 = vld [vmem:[%s4673_s1 + $0x158] sm:$0xff] }
 0x195   : > { %2043 = vmatpush.bf16.msra.mxu2 %v3148_v4  ;;  %2005 = vmatmul.bf16.vlgmr.msrb.gmra.mxu3 %v2889_v56  ;;  %v2905_v56 = vor.u32 %v3088_v46, %v2904_v35  ;;  %v3179_v4 = vld [vmem:[%s4673_s1 + $0x198] sm:$0xff]  ;;  %v3090_v35 = vld [vmem:[%s3619_s5 + $0x188] sm:$0xf0]  ;;  %v3206_v46 = vld [vmem:[%s4673_s1 + $0x260] sm:$0xff] }
 0x196   : > { %2053 = vmatpush.bf16.msra.mxu3 %v3149_v5  ;;  %v3180_v5 = vld [vmem:[%s4673_s1 + $0x1d8] sm:$0xff] }
 0x197   : > { %2016 = vmatpush.bf16.msra.mxu0 %v3150_v8  ;;  %v1598_v16 = vpop.f32.mrf.mxu2  ;;  %v3181_v8 = vld [vmem:[%s4673_s1 + $0x238] sm:$0xff] }
 0x198   : > { %2030 = vmatpush.bf16.msra.mxu1 %v3151_v62  ;;  %v1599_v28 = vadd.f32 %v1598_v16, %v1585_v36  ;;  %v1612_v17 = vpop.f32.mrf.mxu3  ;;  %v1586_v18 = vpop.f32.mrf.mxu1  ;;  %v3192_v16 = vld [vmem:[%s4673_s1 + $0x1c0] sm:$0xff] }
 0x199   : > { %2044 = vmatpush.bf16.msra.mxu2 %v3152_v63  ;;  %v1587_v19 = vadd.f32 %v1586_v18, %v1573_v51  ;;  %v3177_v51 = vld [vmem:[%s4673_s1 + $0x100] sm:$0xff] }
 0x19a   : > { %2054 = vmatpush.bf16.msra.mxu3 %v3153_v9  ;;  %v1613_v20 = vadd.f32 %v1612_v17, %v1599_v28  ;;  %v3182_v9 = vld [vmem:[%s4673_s1 + $0x150] sm:$0xff]  ;;  %v3194_v17 = vld [vmem:[%s4673_s1 + $0x278] sm:$0xff] }
 0x19b   : > { %2017 = vmatpush.bf16.msra.mxu0 %v3154_v12  ;;  %v3184_v12 = vld [vmem:[%s4673_s1 + $0x1d0] sm:$0xff] }
 0x19c   : > { %2031 = vmatpush.bf16.msra.mxu1 %v3155_v3  ;;  %v3185_v3 = vld [vmem:[%s4673_s1 + $0x230] sm:$0xff] }
 0x19d   : > { %2045 = vmatpush.bf16.msra.mxu2 %v3156_v39  ;;  %v2906_v39 = vld [vmem:[%s3619_s5 + $0x17c] sm:$0xf0] }
 0x19e   : > { %2055 = vmatpush.bf16.msra.mxu3 %v3157_v47  ;;  %v3083_v47 = vld [vmem:[%s3619_s5 + $0x154] sm:$0xf] }
 0x19f   : > { %2018 = vmatpush.bf16.msra.mxu0 %v3158_v10  ;;  %v1626_v41 = vpop.f32.mrf.mxu0  ;;  %v1600_v23 = vpop.f32.mrf.mxu2  ;;  %v3089_v10 = vld [vmem:[%s3619_s5 + $0x180] sm:$0xf0] }
 0x1a0   : > { %2032 = vmatpush.bf16.msra.mxu1 %v3159_v11  ;;  %v1627_v44 = vadd.f32 %v1626_v41, %v1613_v20  ;;  %v1601_v49 = vadd.f32 %v1600_v23, %v1587_v19  ;;  %v1614_v38 = vpop.f32.mrf.mxu3  ;;  %v1640_v34 = vpop.f32.mrf.mxu1  ;;  %v2909_v11 = vor.u32 %v3082_v52, %v2906_v39  ;;  %v3196_v19 = vld [vmem:[%s4673_s1 + $0x2f8] sm:$0xff]  ;;  %v3219_v52 = vld [vmem:[%s4673_s1 + $0x288] sm:$0xff]  ;;  %v2922_v39 = vld [vmem:[%s3619_s5 + $0x18c] sm:$0xf0] }
 0x1a1   : > { %2046 = vmatpush.bf16.msra.mxu2 %v3160_v57  ;;  %v2917_v57 = vor.u32 %v3083_v47, %v2914_v31  ;;  %v3197_v20 = vld [vmem:[%s4673_s1 + $0x218] sm:$0xff]  ;;  %v2928_v47 = vld [vmem:[%s3619_s5 + $0x160] sm:$0xf]  ;;  %v3221_v31 = vld [vmem:[%s4673_s1 + $0x308] sm:$0xff] }
 0x1a2   : > { %2056 = vmatpush.bf16.msra.mxu3 %v3161_v50  ;;  %2019 = vmatmul.bf16.vlgmr.msra.gmra.mxu0 %v2893_v29  ;;  %v1615_v55 = vadd.f32 %v1614_v38, %v1601_v49  ;;  %v4462_v61 = vadd.f32 %v1640_v34, %v1627_v44  ;;  %v2912_v29 = vld [vmem:[%s3619_s5 + $0x150] sm:$0xf]  ;;  %v3203_v49 = vld [vmem:[%s4673_s1 + $0x2a8] sm:$0xff] }
 0x1a3   : > { %2067 = vmatpush.bf16.msrb.mxu0 %v3162_v14  ;;  %2033 = vmatmul.bf16.vlgmr.msra.gmra.mxu1 %v2897_v37  ;;  %v3191_v37 = vld [vmem:[%s4673_s1 + $0x180] sm:$0xff]  ;;  %v2913_v50 = vor.u32 %v3089_v10, %v2912_v29  ;;  %v3205_v34 = vld [vmem:[%s4673_s1 + $0x208] sm:$0xff]  ;;  %v2930_v10 = vld [vmem:[%s3619_s5 + $0x194] sm:$0xf0] }
 0x1a4   : > { %2081 = vmatpush.bf16.msrb.mxu1 %v3163_v15  ;;  %2047 = vmatmul.bf16.vlgmr.msra.gmra.mxu2 %v2901_v13  ;;  %v1645_v32 = vmax.f32 %v4240_v43, %v4462_v61  ;;  %v3190_v13 = vld [vmem:[%s4673_s1 + $0x140] sm:$0xff] }
 0x1a5   : > { %2095 = vmatpush.bf16.msrb.mxu2 %v3164_v53  ;;  %v3193_v14 = vld [vmem:[%s4673_s1 + $0x220] sm:$0xff]  ;;  %v3195_v53 = vld [vmem:[%s4673_s1 + $0x2b8] sm:$0xff] }
 0x1a6   : > { %2057 = vmatpush.bf16.msra.mxu3 %v3165_v21  ;;  %v3198_v21 = vld [vmem:[%s4673_s1 + $0x270] sm:$0xff]  ;;  %v3085_v29 = vld [vmem:[%s3619_s5 + $0x164] sm:$0xf] }
 0x1a7   : > { %2068 = vmatpush.bf16.msrb.mxu0 %v3166_v24  ;;  %v1628_v54 = vpop.f32.mrf.mxu0  ;;  %v3199_v24 = vld [vmem:[%s4673_s1 + $0x2b0] sm:$0xff] }
 0x1a8   : > { %2082 = vmatpush.bf16.msrb.mxu1 %v3167_v25  ;;  %v1629_v58 = vadd.f32 %v1628_v54, %v1615_v55  ;;  %v1642_v62 = vpop.f32.mrf.mxu1  ;;  %v3200_v25 = vld [vmem:[%s4673_s1 + $0x2f0] sm:$0xff] }
 0x1a9   : > { %2096 = vmatpush.bf16.msrb.mxu2 %v3168_v40 }
 0x1aa   : > { %2058 = vmatpush.bf16.msra.mxu3 %v3169_v22  ;;  %v4492_v63 = vadd.f32 %v1642_v62, %v1629_v58  ;;  %v3201_v22 = vld [vmem:[%s4673_s1 + $0x210] sm:$0xff] }
 0x1ab   : > { %2069 = vmatpush.bf16.msrb.mxu0 %v3170_v45 }
 0x1ac   : > { %2083 = vmatpush.bf16.msrb.mxu1 %v3171_v48  ;;  %v1646_v36 = vmax.f32 %v4253_v2, %v4492_v63  ;;  %v3202_v48 = vld [vmem:[%s4673_s1 + $0x268] sm:$0xff] }
 0x1ad   : > { %2097 = vmatpush.bf16.msrb.mxu2 %v3172_v27  ;;  %v3204_v27 = vld [vmem:[%s4673_s1 + $0x2e8] sm:$0xff] }
 0x1ae   : > { %2059 = vmatpush.bf16.msra.mxu3 %v3173_v60  ;;  %v2920_v60 = vld [vmem:[%s3619_s5 + $0x158] sm:$0xf] }
 0x1af   : > { %2070 = vmatpush.bf16.msrb.mxu0 %v3174_v42  ;;  %v3207_v42 = vld [vmem:[%s4673_s1 + $0x2a0] sm:$0xff] }
 0x1b0   : > { %2084 = vmatpush.bf16.msrb.mxu1 %v3175_v0  ;;  %v3208_v0 = vld [vmem:[%s4673_s1 + $0x2e0] sm:$0xff] }
 0x1b1   : > { %2098 = vmatpush.bf16.msrb.mxu2 %v3176_v1  ;;  %v2921_v1 = vor.u32 %v3090_v35, %v2920_v60 }
 0x1b2   : > { %2060 = vmatpush.bf16.msra.mxu3 %v3177_v51  ;;  %v3209_v51 = vld [vmem:[%s4673_s1 + $0x200] sm:$0xff] }
 0x1b3   : > { %2071 = vmatpush.bf16.msrb.mxu0 %v3178_v59  ;;  %v3210_v59 = vld [vmem:[%s4673_s1 + $0x258] sm:$0xff] }
 0x1b4   : > { %2085 = vmatpush.bf16.msrb.mxu1 %v3179_v4  ;;  %v3211_v4 = vld [vmem:[%s4673_s1 + $0x298] sm:$0xff] }
 0x1b5   : > { %2099 = vmatpush.bf16.msrb.mxu2 %v3180_v5  ;;  %2061 = vmatmul.bf16.vlgmr.msra.gmra.mxu3 %v2905_v56  ;;  %v3212_v5 = vld [vmem:[%s4673_s1 + $0x2d8] sm:$0xff] }
 0x1b6   : > { %2109 = vmatpush.bf16.msrb.mxu3 %v3181_v8  ;;  %v3213_v8 = vld [vmem:[%s4673_s1 + $0x318] sm:$0xff] }
 0x1b7   : > { %2072 = vmatpush.bf16.msrb.mxu0 %v3182_v9  ;;  %v1739_v15 = vpop.f32.mrf.mxu2  ;;  %v3214_v9 = vld [vmem:[%s4673_s1 + $0x250] sm:$0xff] }
 0x1b8   : > { %2086 = vmatpush.bf16.msrb.mxu1 %v3183_v30  ;;  %v1753_v28 = vpop.f32.mrf.mxu3  ;;  %v3215_v30 = vld [vmem:[%s4673_s1 + $0x290] sm:$0xff] }
 0x1b9   : > { %2100 = vmatpush.bf16.msrb.mxu2 %v3184_v12  ;;  %v1754_v18 = vadd.f32 %v1753_v28, %v1739_v15  ;;  %v3216_v12 = vld [vmem:[%s4673_s1 + $0x2d0] sm:$0xff]  ;;  %v3224_v15 = vld [vmem:[%s4673_s1 + $0x2c0] sm:$0xff] }
 0x1ba   : > { %2110 = vmatpush.bf16.msrb.mxu3 %v3185_v3  ;;  %v3217_v3 = vld [vmem:[%s4673_s1 + $0x310] sm:$0xff]  ;;  %v3225_v28 = vld [vmem:[%s4673_s1 + $0x300] sm:$0xff] }
 0x1bb   : > { %2073 = vmatpush.bf16.msrb.mxu0 %v3186_v26  ;;  %v3084_v26 = vld [vmem:[%s3619_s5 + $0x15c] sm:$0xf] }
 0x1bc   : > { %2087 = vmatpush.bf16.msrb.mxu1 %v3187_v33  ;;  %v3218_v33 = vld [vmem:[%s4673_s1 + $0x248] sm:$0xff] }
 0x1bd   : > { %2101 = vmatpush.bf16.msrb.mxu2 %v3188_v6  ;;  %v3091_v6 = vld [vmem:[%s3619_s5 + $0x190] sm:$0xf0] }
 0x1be   : > { %2111 = vmatpush.bf16.msrb.mxu3 %v3189_v7  ;;  %v3220_v7 = vld [vmem:[%s4673_s1 + $0x2c8] sm:$0xff] }
 0x1bf   : > { %2074 = vmatpush.bf16.msrb.mxu0 %v3190_v13  ;;  %v1767_v40 = vpop.f32.mrf.mxu0  ;;  %v1741_v23 = vpop.f32.mrf.mxu2  ;;  %v2929_v13 = vor.u32 %v3091_v6, %v2928_v47 }
 0x1c0   : > { %2088 = vmatpush.bf16.msrb.mxu1 %v3191_v37  ;;  %v1781_v41 = vpop.f32.mrf.mxu1  ;;  %v1768_v44 = vadd.f32 %v1767_v40, %v1754_v18  ;;  %v1755_v45 = vpop.f32.mrf.mxu3  ;;  %v2936_v37 = vld [vmem:[%s3619_s5 + $0x168] sm:$0xf] }
 0x1c1   : > { %2102 = vmatpush.bf16.msrb.mxu2 %v3192_v16  ;;  %v1756_v38 = vadd.f32 %v1755_v45, %v1741_v23  ;;  %v3223_v16 = vld [vmem:[%s4673_s1 + $0x280] sm:$0xff] }
 0x1c2   : > { %2112 = vmatpush.bf16.msrb.mxu3 %v3193_v14  ;;  %2075 = vmatmul.bf16.vlgmr.msrb.gmra.mxu0 %v2909_v11  ;;  %v4571_v55 = vadd.f32 %v1781_v41, %v1768_v44  ;;  %v2925_v11 = vor.u32 %v3084_v26, %v2922_v39  ;;  %v2933_v14 = vor.u32 %v3085_v29, %v2930_v10 }
 0x1c3   : > { %2123 = vmatpush.bf16.msra.mxu0 %v3194_v17  ;;  %2089 = vmatmul.bf16.vlgmr.msrb.gmra.mxu1 %v2913_v50  ;;  %v3222_v50 = vld [vmem:[%s4673_s1 + $0x240] sm:$0xff] }
 0x1c4   : > { %2137 = vmatpush.bf16.msra.mxu1 %v3195_v53  ;;  %2103 = vmatmul.bf16.vlgmr.msrb.gmra.mxu2 %v2917_v57  ;;  %v3092_v57 = vld [vmem:[%s3619_s5 + $0x198] sm:$0xf0]  ;;  %s2283_s5 = sshll.u32 %s2259_s15, 1 }
 0x1c5   : > { %2151 = vmatpush.bf16.msra.mxu2 %v3196_v19  ;;  %v2937_v19 = vor.u32 %v3092_v57, %v2936_v37  ;;  %p309_p8 = scmp.lt.s32.totalorder %s2283_s5, 3 }
 0x1c6   : > { %2113 = vmatpush.bf16.msrb.mxu3 %v3197_v20 }
 0x1c7   : > { %2124 = vmatpush.bf16.msra.mxu0 %v3198_v21  ;;  %v1769_v56 = vpop.f32.mrf.mxu0  ;;  %s4923_s5 = smov (!%p309_p8, %s2283_s5), 3 }
 0x1c8   : > { %2138 = vmatpush.bf16.msra.mxu1 %v3199_v24  ;;  %v1783_v54 = vpop.f32.mrf.mxu1  ;;  %v1770_v58 = vadd.f32 %v1769_v56, %v1756_v38  ;;  %s2284_s12 = sshll.u32 %s4923_s5, 2 }
 0x1c9   : > { %2152 = vmatpush.bf16.msra.mxu2 %v3200_v25  ;;  %s312_s4 = scalar_lea.vmem %s4675_s3, %s2284_s12 }
 0x1ca   : > { %2114 = vmatpush.bf16.msrb.mxu3 %v3201_v22  ;;  %v1784_v62 = vadd.f32 %v1783_v54, %v1770_v58 }
 0x1cb   : > { %2125 = vmatpush.bf16.msra.mxu0 %v3202_v48 }
 0x1cc   : > { %2139 = vmatpush.bf16.msra.mxu1 %v3203_v49 }
 0x1cd   : > { %2153 = vmatpush.bf16.msra.mxu2 %v3204_v27 }
 0x1ce   : > { %2115 = vmatpush.bf16.msrb.mxu3 %v3205_v34 }
 0x1cf   : > { %2126 = vmatpush.bf16.msra.mxu0 %v3206_v46 }
 0x1d0   : > { %2140 = vmatpush.bf16.msra.mxu1 %v3207_v42 }
 0x1d1   : > { %2154 = vmatpush.bf16.msra.mxu2 %v3208_v0 }
 0x1d2   : > { %2116 = vmatpush.bf16.msrb.mxu3 %v3209_v51 }
 0x1d3   : > { %2127 = vmatpush.bf16.msra.mxu0 %v3210_v59 }
 0x1d4   : > { %2141 = vmatpush.bf16.msra.mxu1 %v3211_v4 }
 0x1d5   : > { %2155 = vmatpush.bf16.msra.mxu2 %v3212_v5  ;;  %2117 = vmatmul.bf16.vlgmr.msrb.gmra.mxu3 %v2921_v1 }
 0x1d6   : > { %2169 = vmatpush.bf16.msra.mxu3 %v3213_v8 }
 0x1d7   : > { %2128 = vmatpush.bf16.msra.mxu0 %v3214_v9  ;;  %v1795_v17 = vpop.f32.mrf.mxu2 }
 0x1d8   : > { %2142 = vmatpush.bf16.msra.mxu1 %v3215_v30  ;;  %v1809_v53 = vpop.f32.mrf.mxu3  ;;  %v1796_v18 = vadd.f32 %v1795_v17, %v4571_v55 }
 0x1d9   : > { %2156 = vmatpush.bf16.msra.mxu2 %v3216_v12 }
 0x1da   : > { %2170 = vmatpush.bf16.msra.mxu3 %v3217_v3  ;;  %v1810_v20 = vadd.f32 %v1809_v53, %v1796_v18 }
 0x1db   : > { %2129 = vmatpush.bf16.msra.mxu0 %v3218_v33 }
 0x1dc   : > { %2143 = vmatpush.bf16.msra.mxu1 %v3219_v52 }
 0x1dd   : > { %2157 = vmatpush.bf16.msra.mxu2 %v3220_v7 }
 0x1de   : > { %2171 = vmatpush.bf16.msra.mxu3 %v3221_v31 }
 0x1df   : > { %2130 = vmatpush.bf16.msra.mxu0 %v3222_v50  ;;  %v1823_v21 = vpop.f32.mrf.mxu0  ;;  %v1797_v40 = vpop.f32.mrf.mxu2 }
 0x1e0   : > { %2144 = vmatpush.bf16.msra.mxu1 %v3223_v16  ;;  %v1837_v24 = vpop.f32.mrf.mxu1  ;;  %v1824_v25 = vadd.f32 %v1823_v21, %v1810_v20  ;;  %v1811_v41 = vpop.f32.mrf.mxu3  ;;  %v1798_v22 = vadd.f32 %v1797_v40, %v1784_v62 }
 0x1e1   : > { %2158 = vmatpush.bf16.msra.mxu2 %v3224_v15 }
 0x1e2   : > { %2172 = vmatpush.bf16.msra.mxu3 %v3225_v28  ;;  %2131 = vmatmul.bf16.vlgmr.msra.gmra.mxu0 %v2925_v11  ;;  %v1838_v44 = vadd.f32 %v1837_v24, %v1824_v25  ;;  %v1812_v23 = vadd.f32 %v1811_v41, %v1798_v22 }
 0x1e3   : > { %2145 = vmatmul.bf16.vlgmr.msra.gmra.mxu1 %v2929_v13 }
 0x1e4   : > { %2159 = vmatmul.bf16.vlgmr.msra.gmra.mxu2 %v2933_v14 }
 0x1e5   : > { %2938 = vmatmul.msk.bf16.vlgmr.msra.gmra.mxu3 %vm1194_vm0, %v2937_v19 }
 0x1e7   : > { %v1825_v45 = vpop.f32.mrf.mxu0 }
 0x1e8   : > { %v1839_v55 = vpop.f32.mrf.mxu1  ;;  %v1826_v35 = vadd.f32 %v1825_v45, %v1812_v23 }
 0x1ea   : > { %v1840_v42 = vadd.f32 %v1839_v55, %v1826_v35 }
 0x1f7   : > { %v1851_v48 = vpop.f32.mrf.mxu2 }
 0x1f8   : > { %v1865_v49 = vpop.f32.mrf.mxu3  ;;  %v1852_v38 = vadd.f32 %v1851_v48, %v1838_v44 }
 0x1fa   : > { %v1866_v27 = vadd.f32 %v1865_v49, %v1852_v38 }
 0x1ff   : > { %v1879_v34 = vpop.f32.mrf.mxu0  ;;  %v1853_v60 = vpop.f32.mrf.mxu2 }
 0x200   : > { %v1893_v46 = vpop.f32.mrf.mxu1  ;;  %v1880_v0 = vadd.f32 %v1879_v34, %v1866_v27  ;;  %v1854_v1 = vadd.f32 %v1853_v60, %v1840_v42  ;;  %v1867_v56 = vpop.f32.mrf.mxu3  ;;  %v3125_v42 = vld [vmem:[%s4674_s2] ss:$0 sm:$0xff] }
 0x202   : > { %v1894_v54 = vadd.f32 %v1893_v46, %v1880_v0  ;;  %v1868_v59 = vadd.f32 %v1867_v56, %v1854_v1 }
 0x207   : > { %v1881_v51 = vpop.f32.mrf.mxu0  ;;  %v1907_v58 = vpop.f32.mrf.mxu2 }
 0x208   : > { %v1908_v4 = vadd.f32 %v1907_v58, %v1894_v54  ;;  %v1882_v5 = vadd.f32 %v1881_v51, %v1868_v59  ;;  %v1895_v62 = vpop.f32.mrf.mxu1 }
 0x20a   : > { %v1912_v8 = vmax.f32 %v1645_v32, %v1908_v4  ;;  %v1896_v9 = vadd.f32 %v1895_v62, %v1882_v5 }
 0x20f   : > { %v1909_v30 = vpop.f32.mrf.mxu2 }
 0x210   : > { %v1910_v12 = vadd.f32 %v1909_v30, %v1896_v9 }
 0x212   : > { %v1913_v3 = vmax.f32 %v1646_v36, %v1910_v12 }
 0x218   : > { %v2006_v26 = vpop.f32.mrf.mxu3 }
 0x21f   : > { %v2020_v33 = vpop.f32.mrf.mxu0 }
 0x220   : > { %v2008_v52 = vpop.f32.mrf.mxu3  ;;  %v2034_v39 = vpop.f32.mrf.mxu1  ;;  %v2021_v29 = vadd.f32 %v2020_v33, %v2006_v26 }
 0x222   : > { %v2035_v43 = vadd.f32 %v2034_v39, %v2021_v29 }
 0x227   : > { %v2048_v47 = vpop.f32.mrf.mxu2  ;;  %v2022_v6 = vpop.f32.mrf.mxu0 }
 0x228   : > { %v2036_v31 = vpop.f32.mrf.mxu1  ;;  %v2049_v13 = vadd.f32 %v2048_v47, %v2035_v43  ;;  %v2023_v37 = vadd.f32 %v2022_v6, %v2008_v52 }
 0x22a   : > { %v2037_v2 = vadd.f32 %v2036_v31, %v2023_v37 }
 0x22f   : > { %v2050_v10 = vpop.f32.mrf.mxu2 }
 0x230   : > { %v2051_v15 = vadd.f32 %v2050_v10, %v2037_v2 }
 0x238   : > { %v2062_v7 = vpop.f32.mrf.mxu3 }
 0x239   : > { %v2063_v50 = vadd.f32 %v2062_v7, %v2049_v13 }
 0x23f   : > { %v2076_v61 = vpop.f32.mrf.mxu0 }
 0x240   : > { %v2064_v32 = vpop.f32.mrf.mxu3  ;;  %v2090_v11 = vpop.f32.mrf.mxu1  ;;  %v2077_v63 = vadd.f32 %v2076_v61, %v2063_v50 }
 0x241   : > { %v2065_v17 = vadd.f32 %v2064_v32, %v2051_v15 }
 0x242   : > { %v2091_v28 = vadd.f32 %v2090_v11, %v2077_v63 }
 0x247   : > { %v2104_v57 = vpop.f32.mrf.mxu2  ;;  %v2078_v36 = vpop.f32.mrf.mxu0 }
 0x248   : > { %v2092_v14 = vpop.f32.mrf.mxu1  ;;  %v2105_v53 = vadd.f32 %v2104_v57, %v2091_v28  ;;  %v2079_v19 = vadd.f32 %v2078_v36, %v2065_v17 }
 0x24a   : > { %v2093_v41 = vadd.f32 %v2092_v14, %v2079_v19 }
 0x24f   : > { %v2106_v18 = vpop.f32.mrf.mxu2 }
 0x250   : > { %v2107_v22 = vadd.f32 %v2106_v18, %v2093_v41 }
 0x258   : > { %v2118_v16 = vpop.f32.mrf.mxu3 }
 0x259   : > { %v2119_v20 = vadd.f32 %v2118_v16, %v2105_v53 }
 0x25f   : > { %v2132_v21 = vpop.f32.mrf.mxu0 }
 0x260   : > { %v2120_v24 = vpop.f32.mrf.mxu3  ;;  %v2133_v25 = vadd.f32 %v2132_v21, %v2119_v20  ;;  %v2146_v40 = vpop.f32.mrf.mxu1 }
 0x261   : > { %v2121_v45 = vadd.f32 %v2120_v24, %v2107_v22 }
 0x262   : > { %v2147_v44 = vadd.f32 %v2146_v40, %v2133_v25 }
 0x267   : > { %v2160_v23 = vpop.f32.mrf.mxu2  ;;  %v2134_v49 = vpop.f32.mrf.mxu0 }
 0x268   : > { %v2161_v48 = vadd.f32 %v2160_v23, %v2147_v44  ;;  %v2174_v38 = vpop.f32.mrf.mxu3  ;;  %v2135_v27 = vadd.f32 %v2134_v49, %v2121_v45  ;;  %v2148_v34 = vpop.f32.mrf.mxu1 }
 0x26a   : > { %v2175_v55 = vadd.f32 %v2174_v38, %v2161_v48  ;;  %v2149_v60 = vadd.f32 %v2148_v34, %v2135_v27 }
 0x26c   : > { %v2179_v46 = vmax.f32 %v1912_v8, %v2175_v55 }
 0x26e   : > { %v2185_v54 = vadd.f32 %v3125_v42, %v2179_v46 }
 0x26f   : > { %v2162_v35 = vpop.f32.mrf.mxu2 }
 0x270   : > { %v2163_v0 = vadd.f32 %v2162_v35, %v2149_v60  ;;  %v2176_v1 = vpop.f32.mrf.mxu3  ;;  %v2187_v59 = vmax.f32 %v2185_v54, 0.0 }
 0x272   : > { %v2177_v56 = vadd.f32 %v2176_v1, %v2163_v0 }
 0x274   : > { %v2180_v51 = vmax.f32 %v1913_v3, %v2177_v56 }
 0x276   : > { %v2186_v58 = vadd.f32 %v3125_v42, %v2180_v51 }
 0x278   : > { %v2188_v4 = vmax.f32 %v2186_v58, 0.0 }
 0x27a   : > { %v3096_v5 = vpack.c.bf16 %v2188_v4, %v2187_v59 }
 0x27c   : > { %3097 = vst [vmem:[%s312_s4] sm:$0xff] %v3096_v5  }
 0x27d PF: > { %p10_p9 = scmp.ge.s32.totalorder %s3287_s16, 4   ;;  %s4919_s12 = smov %s3244_s13 }
 0x27e   : > { %s4920_s13 = smov %s3296_s19  ;;  %s4921_s14 = smov %s3287_s16 }
 0x27f   :  { %12 = sbr.rel (!%p10_p9) target bundleno = 2 (0x2), region = 102 }

// kernel: cnn_forward.5
= control target key start
LH: loop header
LB: loop body
LE: loop exit
PB: predicated region body
PF: predicated region fallthrough
CT: control target
= control target key end

     0   :  { %vm882_vm0 = vcmask 261120   ;;  %vm1068_vm1 = vcmask 80896   ;;  %s2033_s1 = inlined_call_operand.vmem [shape: bf16[1568,10], index: 1, kind: input, shape index: {}]   ;;  %s2034_s2 = inlined_call_operand.vmem [shape: f32[1,10], index: 2, kind: input, shape index: {}]   ;;  %s2035_s0 = inlined_call_operand.vmem [shape: bf16[16,1568], index: 0, kind: input, shape index: {}]   ;;  %s2036_s3 = inlined_call_operand.vmem [shape: f32[16,10], index: 3, kind: output, shape index: {}]  }
   0x1   :  { %v1540_v0 = vld [vmem:[%s2033_s1 + $0x38] sm:$0xff]  ;;  %v1539_v4 = vld [vmem:[%s2033_s1 + $0x30] sm:$0xff]  ;;  %v1538_v8 = vld [vmem:[%s2033_s1 + $0x28] sm:$0xff] }
   0x2   :  { %v1556_v1 = vld [vmem:[%s2033_s1 + $0xb8] sm:$0xff]  ;;  %886 = vmatpush.bf16.msra.mxu0 %v1540_v0  ;;  %v1555_v5 = vld [vmem:[%s2033_s1 + $0xb0] sm:$0xff]  ;;  %v1554_v9 = vld [vmem:[%s2033_s1 + $0xa8] sm:$0xff] }
   0x3   :  { %v1564_v2 = vld [vmem:[%s2033_s1 + $0xf8] sm:$0xff]  ;;  %914 = vmatpush.bf16.msra.mxu2 %v1556_v1  ;;  %v1563_v6 = vld [vmem:[%s2033_s1 + $0xf0] sm:$0xff]  ;;  %v1562_v10 = vld [vmem:[%s2033_s1 + $0xe8] sm:$0xff] }
   0x4   :  { %v1548_v3 = vld [vmem:[%s2033_s1 + $0x78] sm:$0xff]  ;;  %928 = vmatpush.bf16.msra.mxu3 %v1564_v2  ;;  %v1547_v7 = vld [vmem:[%s2033_s1 + $0x70] sm:$0xff]  ;;  %v1546_v11 = vld [vmem:[%s2033_s1 + $0x68] sm:$0xff] }
   0x5   :  { %900 = vmatpush.bf16.msra.mxu1 %v1548_v3  ;;  %v1537_v12 = vld [vmem:[%s2033_s1 + $0x20] sm:$0xff]  ;;  %v1536_v16 = vld [vmem:[%s2033_s1 + $0x18] sm:$0xff]  ;;  %v1535_v20 = vld [vmem:[%s2033_s1 + $0x10] sm:$0xff] }
   0x6   :  { %887 = vmatpush.bf16.msra.mxu0 %v1539_v4  ;;  %v1553_v13 = vld [vmem:[%s2033_s1 + $0xa0] sm:$0xff]  ;;  %v1552_v17 = vld [vmem:[%s2033_s1 + $0x98] sm:$0xff]  ;;  %v1551_v21 = vld [vmem:[%s2033_s1 + $0x90] sm:$0xff] }
   0x7   :  { %915 = vmatpush.bf16.msra.mxu2 %v1555_v5  ;;  %v1561_v14 = vld [vmem:[%s2033_s1 + $0xe0] sm:$0xff]  ;;  %v1560_v18 = vld [vmem:[%s2033_s1 + $0xd8] sm:$0xff]  ;;  %v1559_v22 = vld [vmem:[%s2033_s1 + $0xd0] sm:$0xff] }
   0x8   :  { %929 = vmatpush.bf16.msra.mxu3 %v1563_v6  ;;  %v1545_v15 = vld [vmem:[%s2033_s1 + $0x60] sm:$0xff]  ;;  %v1544_v19 = vld [vmem:[%s2033_s1 + $0x58] sm:$0xff]  ;;  %v1543_v23 = vld [vmem:[%s2033_s1 + $0x50] sm:$0xff] }
   0x9   :  { %901 = vmatpush.bf16.msra.mxu1 %v1547_v7  ;;  %v1534_v24 = vld [vmem:[%s2033_s1 + $0x8] sm:$0xff]  ;;  %v1533_v28 = vld [vmem:[%s2033_s1] sm:$0xff]  ;;  %v1572_v31 = vld [vmem:[%s2033_s1 + $0x138] sm:$0xff] }
   0xa   :  { %888 = vmatpush.bf16.msra.mxu0 %v1538_v8  ;;  %v1550_v25 = vld [vmem:[%s2033_s1 + $0x88] sm:$0xff]  ;;  %v1549_v29 = vld [vmem:[%s2033_s1 + $0x80] sm:$0xff]  ;;  %v1526_v33 = vld [vmem:[%s2035_s0 + $0x30] sm:$0xf0] }
   0xb   :  { %916 = vmatpush.bf16.msra.mxu2 %v1554_v9  ;;  %v1558_v26 = vld [vmem:[%s2033_s1 + $0xc8] sm:$0xff]  ;;  %v1557_v30 = vld [vmem:[%s2033_s1 + $0xc0] sm:$0xff]  ;;  %v1588_v34 = vld [vmem:[%s2033_s1 + $0x1b8] sm:$0xff] }
   0xc   :  { %930 = vmatpush.bf16.msra.mxu3 %v1562_v10  ;;  %v1542_v27 = vld [vmem:[%s2033_s1 + $0x48] sm:$0xff]  ;;  %v1077_v32 = vld [vmem:[%s2035_s0] sm:$0xf]  ;;  %v1527_v36 = vld [vmem:[%s2035_s0 + $0x38] sm:$0xf0] }
   0xd   :  { %902 = vmatpush.bf16.msra.mxu1 %v1546_v11  ;;  %v1085_v35 = vld [vmem:[%s2035_s0 + $0x8] sm:$0xf]  ;;  %v1596_v37 = vld [vmem:[%s2033_s1 + $0x1f8] sm:$0xff]  ;;  %v1521_v38 = vld [vmem:[%s2035_s0 + $0xc] sm:$0xf]  ;;  %v1078_v41 = vor.u32 %v1526_v33, %v1077_v32 }
   0xe   :  { %889 = vmatpush.bf16.msra.mxu0 %v1537_v12  ;;  %v1087_v39 = vld [vmem:[%s2035_s0 + $0x3c] sm:$0xf0]  ;;  %v1580_v42 = vld [vmem:[%s2033_s1 + $0x178] sm:$0xff]  ;;  %v1086_v43 = vor.u32 %v1527_v36, %v1085_v35  ;;  %v1520_v44 = vld [vmem:[%s2035_s0 + $0x4] sm:$0xf] }
   0xf   :  { %917 = vmatpush.bf16.msra.mxu2 %v1553_v13  ;;  %v1541_v40 = vld [vmem:[%s2033_s1 + $0x40] sm:$0xff]  ;;  %v1079_v45 = vld [vmem:[%s2035_s0 + $0x34] sm:$0xf0]  ;;  %v1571_v46 = vld [vmem:[%s2033_s1 + $0x130] sm:$0xff]  ;;  %v1090_v47 = vor.u32 %v1521_v38, %v1087_v39 }
  0x10   :  { %931 = vmatpush.bf16.msra.mxu3 %v1561_v14  ;;  %v1587_v48 = vld [vmem:[%s2033_s1 + $0x1b0] sm:$0xff]  ;;  %v1082_v50 = vor.u32 %v1520_v44, %v1079_v45  ;;  %v1570_v52 = vld [vmem:[%s2033_s1 + $0x128] sm:$0xff]  ;;  %v1569_v56 = vld [vmem:[%s2033_s1 + $0x120] sm:$0xff] }
  0x11   :  { %903 = vmatpush.bf16.msra.mxu1 %v1545_v15  ;;  %v1595_v49 = vld [vmem:[%s2033_s1 + $0x1f0] sm:$0xff]  ;;  %v1586_v53 = vld [vmem:[%s2033_s1 + $0x1a8] sm:$0xff]  ;;  %v1585_v57 = vld [vmem:[%s2033_s1 + $0x1a0] sm:$0xff] }
  0x12   :  { %890 = vmatpush.bf16.msra.mxu0 %v1536_v16  ;;  %v1579_v51 = vld [vmem:[%s2033_s1 + $0x170] sm:$0xff]  ;;  %v1594_v54 = vld [vmem:[%s2033_s1 + $0x1e8] sm:$0xff]  ;;  %v1593_v58 = vld [vmem:[%s2033_s1 + $0x1e0] sm:$0xff] }
  0x13   :  { %918 = vmatpush.bf16.msra.mxu2 %v1552_v17  ;;  %v1578_v55 = vld [vmem:[%s2033_s1 + $0x168] sm:$0xff]  ;;  %v1577_v59 = vld [vmem:[%s2033_s1 + $0x160] sm:$0xff]  ;;  %v1568_v60 = vld [vmem:[%s2033_s1 + $0x118] sm:$0xff] }
  0x14   :  { %932 = vmatpush.bf16.msra.mxu3 %v1560_v18  ;;  %v1584_v61 = vld [vmem:[%s2033_s1 + $0x198] sm:$0xff]  ;;  %v1567_v0 = vld [vmem:[%s2033_s1 + $0x110] sm:$0xff]  ;;  %v1566_v4 = vld [vmem:[%s2033_s1 + $0x108] sm:$0xff] }
  0x15   :  { %904 = vmatpush.bf16.msra.mxu1 %v1544_v19  ;;  %v1592_v62 = vld [vmem:[%s2033_s1 + $0x1d8] sm:$0xff]  ;;  %v1583_v1 = vld [vmem:[%s2033_s1 + $0x190] sm:$0xff]  ;;  %v1582_v5 = vld [vmem:[%s2033_s1 + $0x188] sm:$0xff] }
  0x16   :  { %891 = vmatpush.bf16.msra.mxu0 %v1535_v20  ;;  %v1576_v63 = vld [vmem:[%s2033_s1 + $0x158] sm:$0xff]  ;;  %v1591_v2 = vld [vmem:[%s2033_s1 + $0x1d0] sm:$0xff]  ;;  %v1590_v6 = vld [vmem:[%s2033_s1 + $0x1c8] sm:$0xff] }
  0x17   :  { %919 = vmatpush.bf16.msra.mxu2 %v1551_v21  ;;  %v1575_v3 = vld [vmem:[%s2033_s1 + $0x150] sm:$0xff]  ;;  %v1574_v7 = vld [vmem:[%s2033_s1 + $0x148] sm:$0xff]  ;;  %v1565_v8 = vld [vmem:[%s2033_s1 + $0x100] sm:$0xff] }
  0x18   :  { %933 = vmatpush.bf16.msra.mxu3 %v1559_v22  ;;  %v1581_v9 = vld [vmem:[%s2033_s1 + $0x180] sm:$0xff]  ;;  %v1604_v11 = vld [vmem:[%s2033_s1 + $0x238] sm:$0xff]  ;;  %v1093_v13 = vld [vmem:[%s2035_s0 + $0x10] sm:$0xf] }
  0x19   :  { %905 = vmatpush.bf16.msra.mxu1 %v1543_v23  ;;  %v1589_v10 = vld [vmem:[%s2033_s1 + $0x1c0] sm:$0xff]  ;;  %v1620_v12 = vld [vmem:[%s2033_s1 + $0x2b8] sm:$0xff]  ;;  %v1529_v16 = vld [vmem:[%s2035_s0 + $0x48] sm:$0xf0] }
  0x1a   :  { %892 = vmatpush.bf16.msra.mxu0 %v1534_v24  ;;  %v1528_v14 = vld [vmem:[%s2035_s0 + $0x40] sm:$0xf0]  ;;  %v1101_v15 = vld [vmem:[%s2035_s0 + $0x18] sm:$0xf]  ;;  %v1523_v18 = vld [vmem:[%s2035_s0 + $0x1c] sm:$0xf] }
  0x1b   :  { %920 = vmatpush.bf16.msra.mxu2 %v1550_v25  ;;  %v1628_v17 = vld [vmem:[%s2033_s1 + $0x2f8] sm:$0xff]  ;;  %v1103_v19 = vld [vmem:[%s2035_s0 + $0x4c] sm:$0xf0]  ;;  %v1573_v20 = vld [vmem:[%s2033_s1 + $0x140] sm:$0xff]  ;;  %v1094_v23 = vor.u32 %v1528_v14, %v1093_v13  ;;  %v1102_v24 = vor.u32 %v1529_v16, %v1101_v15 }
  0x1c   :  { %934 = vmatpush.bf16.msra.mxu3 %v1558_v26  ;;  %v1522_v21 = vld [vmem:[%s2035_s0 + $0x14] sm:$0xf]  ;;  %v1095_v22 = vld [vmem:[%s2035_s0 + $0x44] sm:$0xf0]  ;;  %v1612_v25 = vld [vmem:[%s2033_s1 + $0x278] sm:$0xff]  ;;  %v1106_v26 = vor.u32 %v1523_v18, %v1103_v19 }
  0x1d   :  { %906 = vmatpush.bf16.msra.mxu1 %v1542_v27  ;;  %v1098_v27 = vor.u32 %v1522_v21, %v1095_v22  ;;  %v1602_v32 = vld [vmem:[%s2033_s1 + $0x228] sm:$0xff]  ;;  %v1601_v36 = vld [vmem:[%s2033_s1 + $0x220] sm:$0xff]  ;;  %v1599_v44 = vld [vmem:[%s2033_s1 + $0x210] sm:$0xff] }
  0x1e   :  { %893 = vmatpush.bf16.msra.mxu0 %v1533_v28  ;;  %v1603_v28 = vld [vmem:[%s2033_s1 + $0x230] sm:$0xff]  ;;  %v1618_v33 = vld [vmem:[%s2033_s1 + $0x2a8] sm:$0xff]  ;;  %v1625_v38 = vld [vmem:[%s2033_s1 + $0x2e0] sm:$0xff] }
  0x1f   :  { %921 = vmatpush.bf16.msra.mxu2 %v1549_v29  ;;  %v1619_v29 = vld [vmem:[%s2033_s1 + $0x2b0] sm:$0xff]  ;;  %v1610_v35 = vld [vmem:[%s2033_s1 + $0x268] sm:$0xff]  ;;  %v1609_v39 = vld [vmem:[%s2033_s1 + $0x260] sm:$0xff] }
  0x20   :  { %935 = vmatpush.bf16.msra.mxu3 %v1557_v30  ;;  %v1627_v30 = vld [vmem:[%s2033_s1 + $0x2f0] sm:$0xff] }
  0x21   :  { %907 = vmatpush.bf16.msra.mxu1 %v1541_v40  ;;  %894 = vmatmul.bf16.vlgmr.msra.gmra.mxu0 %v1078_v41  ;;  %v1600_v40 = vld [vmem:[%s2033_s1 + $0x218] sm:$0xff]  ;;  %v1615_v45 = vld [vmem:[%s2033_s1 + $0x290] sm:$0xff] }
  0x22   :  { %942 = vmatpush.bf16.msrb.mxu0 %v1572_v31  ;;  %922 = vmatmul.bf16.vlgmr.msra.gmra.mxu2 %v1086_v43  ;;  %v1611_v31 = vld [vmem:[%s2033_s1 + $0x270] sm:$0xff]  ;;  %v1616_v41 = vld [vmem:[%s2033_s1 + $0x298] sm:$0xff] }
  0x23   :  { %970 = vmatpush.bf16.msrb.mxu2 %v1588_v34  ;;  %936 = vmatmul.bf16.vlgmr.msra.gmra.mxu3 %v1090_v47  ;;  %v1626_v34 = vld [vmem:[%s2033_s1 + $0x2e8] sm:$0xff]  ;;  %v1608_v43 = vld [vmem:[%s2033_s1 + $0x258] sm:$0xff]  ;;  %v1607_v47 = vld [vmem:[%s2033_s1 + $0x250] sm:$0xff] }
  0x24   :  { %984 = vmatpush.bf16.msrb.mxu3 %v1596_v37  ;;  %908 = vmatmul.bf16.vlgmr.msra.gmra.mxu1 %v1082_v50  ;;  %v1617_v37 = vld [vmem:[%s2033_s1 + $0x2a0] sm:$0xff]  ;;  %v1622_v50 = vld [vmem:[%s2033_s1 + $0x2c8] sm:$0xff] }
  0x25   :  { %956 = vmatpush.bf16.msrb.mxu1 %v1580_v42  ;;  %v1624_v42 = vld [vmem:[%s2033_s1 + $0x2d8] sm:$0xff] }
  0x26   :  { %943 = vmatpush.bf16.msrb.mxu0 %v1571_v46  ;;  %v1623_v46 = vld [vmem:[%s2033_s1 + $0x2d0] sm:$0xff] }
  0x27   :  { %971 = vmatpush.bf16.msrb.mxu2 %v1587_v48  ;;  %v1598_v48 = vld [vmem:[%s2033_s1 + $0x208] sm:$0xff] }
  0x28   :  { %985 = vmatpush.bf16.msrb.mxu3 %v1595_v49  ;;  %v1614_v49 = vld [vmem:[%s2033_s1 + $0x288] sm:$0xff] }
  0x29   :  { %957 = vmatpush.bf16.msrb.mxu1 %v1579_v51  ;;  %v1606_v51 = vld [vmem:[%s2033_s1 + $0x248] sm:$0xff] }
  0x2a   :  { %944 = vmatpush.bf16.msrb.mxu0 %v1570_v52  ;;  %v1597_v52 = vld [vmem:[%s2033_s1 + $0x200] sm:$0xff] }
  0x2b   :  { %972 = vmatpush.bf16.msrb.mxu2 %v1586_v53  ;;  %v1613_v53 = vld [vmem:[%s2033_s1 + $0x280] sm:$0xff] }
  0x2c   :  { %986 = vmatpush.bf16.msrb.mxu3 %v1594_v54  ;;  %v1621_v54 = vld [vmem:[%s2033_s1 + $0x2c0] sm:$0xff] }
  0x2d   :  { %958 = vmatpush.bf16.msrb.mxu1 %v1578_v55  ;;  %v1109_v55 = vld [vmem:[%s2035_s0 + $0x20] sm:$0xf] }
  0x2e   :  { %945 = vmatpush.bf16.msrb.mxu0 %v1569_v56  ;;  %v1530_v56 = vld [vmem:[%s2035_s0 + $0x50] sm:$0xf0] }
  0x2f   :  { %973 = vmatpush.bf16.msrb.mxu2 %v1585_v57  ;;  %v1117_v57 = vld [vmem:[%s2035_s0 + $0x28] sm:$0xf] }
  0x30   :  { %987 = vmatpush.bf16.msrb.mxu3 %v1593_v58  ;;  %v1531_v58 = vld [vmem:[%s2035_s0 + $0x58] sm:$0xf0] }
  0x31   :  { %959 = vmatpush.bf16.msrb.mxu1 %v1577_v59  ;;  %v1525_v59 = vld [vmem:[%s2035_s0 + $0x2c] sm:$0xf] }
  0x32   :  { %946 = vmatpush.bf16.msrb.mxu0 %v1568_v60  ;;  %v1119_v60 = vld [vmem:[%s2035_s0 + $0x5c] sm:$0xf0] }
  0x33   :  { %974 = vmatpush.bf16.msrb.mxu2 %v1584_v61  ;;  %v1630_v61 = vld [vmem:[%s2033_s1 + $0x308] sm:$0xff] }
  0x34   :  { %988 = vmatpush.bf16.msrb.mxu3 %v1592_v62  ;;  %v1605_v62 = vld [vmem:[%s2033_s1 + $0x240] sm:$0xff] }
  0x35   :  { %960 = vmatpush.bf16.msrb.mxu1 %v1576_v63  ;;  %v1110_v63 = vor.u32 %v1530_v56, %v1109_v55 }
  0x36   :  { %947 = vmatpush.bf16.msrb.mxu0 %v1567_v0  ;;  %v1524_v0 = vld [vmem:[%s2035_s0 + $0x24] sm:$0xf] }
  0x37   :  { %975 = vmatpush.bf16.msrb.mxu2 %v1583_v1  ;;  %v1111_v1 = vld [vmem:[%s2035_s0 + $0x54] sm:$0xf0] }
  0x38   :  { %989 = vmatpush.bf16.msrb.mxu3 %v1591_v2  ;;  %v1118_v2 = vor.u32 %v1531_v58, %v1117_v57 }
  0x39   :  { %961 = vmatpush.bf16.msrb.mxu1 %v1575_v3  ;;  %v1122_v3 = vor.u32 %v1525_v59, %v1119_v60 }
  0x3a   :  { %948 = vmatpush.bf16.msrb.mxu0 %v1566_v4  ;;  %v1114_v4 = vor.u32 %v1524_v0, %v1111_v1 }
  0x3b   :  { %976 = vmatpush.bf16.msrb.mxu2 %v1582_v5  ;;  %v1629_v5 = vld [vmem:[%s2033_s1 + $0x300] sm:$0xff] }
  0x3c   :  { %990 = vmatpush.bf16.msrb.mxu3 %v1590_v6  ;;  %v1125_v6 = vld [vmem:[%s2035_s0 + $0x30] sm:$0xf] }
  0x3d   :  { %962 = vmatpush.bf16.msrb.mxu1 %v1574_v7  ;;  %v1532_v7 = vld [vmem:[%s2035_s0 + $0x60] sm:$0xf0] }
  0x3e   :  { %949 = vmatpush.bf16.msrb.mxu0 %v1565_v8  ;;  %v1126_v8 = vor.u32 %v1532_v7, %v1125_v6 }
  0x3f   :  { %977 = vmatpush.bf16.msrb.mxu2 %v1581_v9 }
  0x40   :  { %991 = vmatpush.bf16.msrb.mxu3 %v1589_v10 }
  0x41   :  { %963 = vmatpush.bf16.msrb.mxu1 %v1573_v20  ;;  %950 = vmatmul.bf16.vlgmr.msrb.gmra.mxu0 %v1094_v23 }
  0x42   :  { %998 = vmatpush.bf16.msra.mxu0 %v1604_v11  ;;  %978 = vmatmul.bf16.vlgmr.msrb.gmra.mxu2 %v1102_v24 }
  0x43   :  { %1026 = vmatpush.bf16.msra.mxu2 %v1620_v12  ;;  %992 = vmatmul.bf16.vlgmr.msrb.gmra.mxu3 %v1106_v26  ;;  %v1631_v12 = vld [vmem:[%s2034_s2] ss:$0 sm:$0xff] }
  0x44   :  { %1040 = vmatpush.bf16.msra.mxu3 %v1628_v17  ;;  %964 = vmatmul.bf16.vlgmr.msrb.gmra.mxu1 %v1098_v27 }
  0x45   :  { %1012 = vmatpush.bf16.msra.mxu1 %v1612_v25 }
  0x46   :  { %999 = vmatpush.bf16.msra.mxu0 %v1603_v28 }
  0x47   :  { %1027 = vmatpush.bf16.msra.mxu2 %v1619_v29 }
  0x48   :  { %1041 = vmatpush.bf16.msra.mxu3 %v1627_v30 }
  0x49   :  { %1013 = vmatpush.bf16.msra.mxu1 %v1611_v31 }
  0x4a   :  { %1000 = vmatpush.bf16.msra.mxu0 %v1602_v32 }
  0x4b   :  { %1028 = vmatpush.bf16.msra.mxu2 %v1618_v33 }
  0x4c   :  { %1042 = vmatpush.bf16.msra.mxu3 %v1626_v34 }
  0x4d   :  { %1014 = vmatpush.bf16.msra.mxu1 %v1610_v35 }
  0x4e   :  { %1001 = vmatpush.bf16.msra.mxu0 %v1601_v36 }
  0x4f   :  { %1029 = vmatpush.bf16.msra.mxu2 %v1617_v37 }
  0x50   :  { %1043 = vmatpush.bf16.msra.mxu3 %v1625_v38 }
  0x51   :  { %1015 = vmatpush.bf16.msra.mxu1 %v1609_v39 }
  0x52   :  { %1002 = vmatpush.bf16.msra.mxu0 %v1600_v40 }
  0x53   :  { %1030 = vmatpush.bf16.msra.mxu2 %v1616_v41 }
  0x54   :  { %1044 = vmatpush.bf16.msra.mxu3 %v1624_v42 }
  0x55   :  { %1016 = vmatpush.bf16.msra.mxu1 %v1608_v43 }
  0x56   :  { %1003 = vmatpush.bf16.msra.mxu0 %v1599_v44 }
  0x57   :  { %1031 = vmatpush.bf16.msra.mxu2 %v1615_v45 }
  0x58   :  { %1045 = vmatpush.bf16.msra.mxu3 %v1623_v46 }
  0x59   :  { %1017 = vmatpush.bf16.msra.mxu1 %v1607_v47 }
  0x5a   :  { %1004 = vmatpush.bf16.msra.mxu0 %v1598_v48 }
  0x5b   :  { %1032 = vmatpush.bf16.msra.mxu2 %v1614_v49 }
  0x5c   :  { %1046 = vmatpush.bf16.msra.mxu3 %v1622_v50 }
  0x5d   :  { %1018 = vmatpush.bf16.msra.mxu1 %v1606_v51 }
  0x5e   :  { %1005 = vmatpush.bf16.msra.mxu0 %v1597_v52 }
  0x5f   :  { %1033 = vmatpush.bf16.msra.mxu2 %v1613_v53 }
  0x60   :  { %1047 = vmatpush.bf16.msra.mxu3 %v1621_v54 }
  0x61   :  { %1019 = vmatpush.bf16.msra.mxu1 %v1605_v62  ;;  %1006 = vmatmul.bf16.vlgmr.msra.gmra.mxu0 %v1110_v63 }
  0x62   :  { %1060 = vmatpush.bf16.msrb.mxu0 %v1630_v61  ;;  %1034 = vmatmul.bf16.vlgmr.msra.gmra.mxu2 %v1118_v2 }
  0x63   :  { %1048 = vmatmul.bf16.vlgmr.msra.gmra.mxu3 %v1122_v3 }
  0x64   :  { %1020 = vmatmul.bf16.vlgmr.msra.gmra.mxu1 %v1114_v4 }
  0x66   :  { %1061 = vmatpush.bf16.msrb.mxu0 %v1629_v5 }
  0x71   :  { %1519 = vmatmul.msk.bf16.vlgmr.msrb.gmra.mxu0 %vm882_vm0, %v1126_v8 }
  0x9e   :  { %v895_v9 = vpop.f32.mrf.mxu0 }
  0x9f   :  { %v896_v15 = vadd.f32 %v1631_v12, %v895_v9 }
  0xa1   :  { %v909_v10 = vpop.f32.mrf.mxu1 }
  0xa2   :  { %v910_v17 = vadd.f32 %v909_v10, %v896_v15 }
  0xa5   :  { %v923_v11 = vpop.f32.mrf.mxu2 }
  0xa6   :  { %v897_v13 = vpop.f32.mrf.mxu0  ;;  %v937_v14 = vpop.f32.mrf.mxu3  ;;  %v924_v20 = vadd.f32 %v923_v11, %v910_v17 }
  0xa7   :  { %v898_v23 = vadd.f32 %v1631_v12, %v897_v13 }
  0xa8   :  { %v938_v24 = vadd.f32 %v937_v14, %v924_v20 }
  0xa9   :  { %v911_v16 = vpop.f32.mrf.mxu1 }
  0xaa   :  { %v912_v26 = vadd.f32 %v911_v16, %v898_v23 }
  0xad   :  { %v925_v18 = vpop.f32.mrf.mxu2 }
  0xae   :  { %v939_v21 = vpop.f32.mrf.mxu3  ;;  %v926_v30 = vadd.f32 %v925_v18, %v912_v26 }
  0xb0   :  { %v940_v33 = vadd.f32 %v939_v21, %v926_v30 }
  0xbe   :  { %v951_v19 = vpop.f32.mrf.mxu0 }
  0xbf   :  { %v952_v27 = vadd.f32 %v951_v19, %v938_v24 }
  0xc1   :  { %v965_v22 = vpop.f32.mrf.mxu1 }
  0xc2   :  { %v966_v31 = vadd.f32 %v965_v22, %v952_v27 }
  0xc5   :  { %v979_v25 = vpop.f32.mrf.mxu2 }
  0xc6   :  { %v953_v28 = vpop.f32.mrf.mxu0  ;;  %v993_v29 = vpop.f32.mrf.mxu3  ;;  %v980_v34 = vadd.f32 %v979_v25, %v966_v31 }
  0xc7   :  { %v954_v37 = vadd.f32 %v953_v28, %v940_v33 }
  0xc8   :  { %v994_v38 = vadd.f32 %v993_v29, %v980_v34 }
  0xc9   :  { %v967_v32 = vpop.f32.mrf.mxu1 }
  0xca   :  { %v968_v41 = vadd.f32 %v967_v32, %v954_v37 }
  0xcd   :  { %v981_v35 = vpop.f32.mrf.mxu2 }
  0xce   :  { %v995_v39 = vpop.f32.mrf.mxu3  ;;  %v982_v43 = vadd.f32 %v981_v35, %v968_v41 }
  0xd0   :  { %v996_v47 = vadd.f32 %v995_v39, %v982_v43 }
  0xde   :  { %v1007_v36 = vpop.f32.mrf.mxu0 }
  0xdf   :  { %v1008_v42 = vadd.f32 %v1007_v36, %v994_v38 }
  0xe1   :  { %v1021_v40 = vpop.f32.mrf.mxu1 }
  0xe2   :  { %v1022_v46 = vadd.f32 %v1021_v40, %v1008_v42 }
  0xe5   :  { %v1035_v44 = vpop.f32.mrf.mxu2 }
  0xe6   :  { %v1009_v45 = vpop.f32.mrf.mxu0  ;;  %v1036_v48 = vadd.f32 %v1035_v44, %v1022_v46  ;;  %v1049_v49 = vpop.f32.mrf.mxu3 }
  0xe7   :  { %v1010_v50 = vadd.f32 %v1009_v45, %v996_v47 }
  0xe8   :  { %v1050_v52 = vadd.f32 %v1049_v49, %v1036_v48 }
  0xe9   :  { %v1023_v51 = vpop.f32.mrf.mxu1 }
  0xea   :  { %v1024_v55 = vadd.f32 %v1023_v51, %v1010_v50 }
  0xed   :  { %v1037_v53 = vpop.f32.mrf.mxu2 }
  0xee   :  { %v1063_v54 = vpop.f32.mrf.mxu0  ;;  %v1038_v57 = vadd.f32 %v1037_v53, %v1024_v55  ;;  %v1051_v58 = vpop.f32.mrf.mxu3 }
  0xef   :  { %v1064_v56 = vadd.f32 %v1063_v54, %v1050_v52 }
  0xf0   :  { %v1052_v59 = vadd.f32 %v1051_v58, %v1038_v57 }
  0xf1   :  { %1069 = vst.msk [vmem:[%s2036_s3] sm:$0xff] %vm1068_vm1, %v1064_v56 }
  0xf6   :  { %v1065_v60 = vpop.f32.mrf.mxu0 }
  0xf7   :  { %v1066_v61 = vadd.f32 %v1065_v60, %v1052_v59 }
  0xf9   :  { %1070 = vst.msk [vmem:[%s2036_s3 + $0x8] sm:$0xff] %vm1068_vm1, %v1066_v61 }

</bundles_post_ra>
